<compile_context>
chip_gen: v7x
topology: tpu7x:2x2x1
jax: 0.10.0
libtpu: 0.0.40
codegen_flags: <defaults>
</compile_context>

<pallas_src>
import functools
import math

import jax
import jax.numpy as jnp
from jax.experimental import pallas as pl
from jax.experimental.pallas import tpu as pltpu


def conv_unit_kernel(x_ref, bfull_ref, biasf_ref, mmean_ref, mband_ref,
                     tchan_ref, tsp_ref, ws_ref, o_ref,
                     xpad_ref, col_ref, smap_ref, *,
                     N, H, W, K, dil, cin, cout, k_s):
    """Fused ConvUnit forward in a c-major folded layout (lanes = co*W + w).

    x_ref     : (N, H, W*cin)          conv input, lanes = w*cin + ci
    bfull_ref : (K*K*W*cin, cout*W)    block-diagonal im2col weights
    biasf_ref : (1, cout*W)            conv bias replicated over w
    mmean_ref : (cout*W, cout)         banded ECA matrix folded with the mean
    mband_ref : (cout, cout)           banded ECA matrix (for the max term)
    tchan_ref : (cout, cout*W)         broadcast channel attention over w
    tsp_ref   : (W, cout*W)            broadcast spatial attention over c
    ws_ref    : (2*k_s*k_s,) SMEM      spatial attention conv weights
    o_ref     : (N*H, cout*W)          output (lane-dense)
    """
    pad = dil * (K - 1) // 2
    ps = k_s // 2
    wcin = W * cin
    lanes = cout * W

    # ---------- dilated conv + bias + ReLU as a single im2col matmul ----------
    xpad_ref[...] = jnp.zeros_like(xpad_ref)
    xpad_ref[:, pad:pad + H, pad * cin:(pad + W) * cin] = x_ref[...]
    for kh in range(K):
        for kw in range(K):
            t = kh * K + kw
            col_ref[:, :, t * wcin:(t + 1) * wcin] = xpad_ref[
                :, kh * dil:kh * dil + H,
                kw * dil * cin:kw * dil * cin + wcin]
    col = col_ref[...].reshape(N * H, K * K * wcin)
    y = jnp.dot(col, bfull_ref[...], preferred_element_type=jnp.float32)
    y = jnp.maximum(y + biasf_ref[...], 0.0)           # (N*H, lanes), ReLU
    y3 = y.reshape(N, H, lanes)

    # ---------- ECA channel attention (banded-matmul form) ----------
    s1 = jnp.sum(y3, axis=1)                            # (N, lanes) row sums
    m1 = jnp.max(y3, axis=1)                            # (N, lanes) row maxes
    att = jnp.dot(s1, mmean_ref[...],
                  preferred_element_type=jnp.float32)   # mean term, (N, cout)
    for co in range(cout):                              # max term
        mx = jnp.max(m1[:, co * W:(co + 1) * W], axis=1, keepdims=True)
        att = att + mx * mband_ref[co:co + 1, :]        # (N,1)*(1,cout)
    att = jax.nn.sigmoid(att)                           # (N, cout)
    att_f = jnp.dot(att, tchan_ref[...],
                    preferred_element_type=jnp.float32)  # (N, lanes)
    x1 = y3 * att_f.reshape(N, 1, lanes)                 # (N, H, lanes)

    # ---------- spatial attention (k_s x k_s conv over [mean_c, max_c]) ------
    x1_2d = x1.reshape(N * H, lanes)
    sum_c = x1_2d[:, 0:W]
    max_c = x1_2d[:, 0:W]
    for co in range(1, cout):
        blk = x1_2d[:, co * W:(co + 1) * W]
        sum_c = sum_c + blk
        max_c = jnp.maximum(max_c, blk)
    avg_c = sum_c * (1.0 / cout)                         # (N*H, W)

    smap_ref[...] = jnp.zeros_like(smap_ref)
    smap_ref[0, :, ps:ps + H, ps:ps + W] = avg_c.reshape(N, H, W)
    smap_ref[1, :, ps:ps + H, ps:ps + W] = max_c.reshape(N, H, W)
    s = jnp.zeros((N, H, W), jnp.float32)
    for ci in range(2):
        spad = smap_ref[ci]                              # one load per map
        for kh in range(k_s):
            for kw in range(k_s):
                wgt = ws_ref[ci * k_s * k_s + kh * k_s + kw]
                s = s + wgt * spad[:, kh:kh + H, kw:kw + W]
    att_s = jax.nn.sigmoid(s).reshape(N * H, W)
    att_s_f = jnp.dot(att_s, tsp_ref[...],
                      preferred_element_type=jnp.float32)  # (N*H, lanes)

    # ---------- LeakyReLU(0.2) + single lane-dense store ----------
    x2 = x1_2d * att_s_f
    o_ref[...] = jnp.where(x2 >= 0, x2, 0.2 * x2).astype(o_ref.dtype)


def _prep_constants(w, bias, wc, *, H, W, k_c):
    """Host-side (static) repacking of module parameters only."""
    K, _, Cin, Cout = w.shape
    f32 = jnp.float32
    # Block-diagonal im2col weight: rows = (tap, w, cin), cols = (cout, w).
    w_t = w.astype(f32).reshape(K * K, Cin, Cout)
    eye_w = jnp.eye(W, dtype=f32)
    bfull = jnp.einsum('tio,wv->twiov', w_t, eye_w).reshape(
        K * K * W * Cin, Cout * W)
    bias_f = jnp.repeat(bias.astype(f32), W).reshape(1, Cout * W)
    # Banded ECA matrix M: att = v @ M  (M[i, c'] = wc[i - c' + pc] on the band)
    pc = k_c // 2
    ii = jnp.arange(Cout)[:, None]
    cc = jnp.arange(Cout)[None, :]
    d = ii - cc + pc
    mband = jnp.where((d >= 0) & (d < k_c),
                      wc.astype(f32)[jnp.clip(d, 0, k_c - 1)], 0.0)
    mmean = jnp.repeat(mband, W, axis=0) / float(H * W)       # (Cout*W, Cout)
    tchan = jnp.repeat(jnp.eye(Cout, dtype=f32), W, axis=1)   # (Cout, Cout*W)
    tsp = jnp.tile(jnp.eye(W, dtype=f32), (1, Cout))          # (W, Cout*W)
    return bfull, bias_f, mmean, mband, tchan, tsp


def conv_unit_forward(x_nchw, w, bias, wc, ws, *, K, dil, k_c, k_s):
    N, Cin, H, W = x_nchw.shape
    Cout = w.shape[-1]
    pad = dil * (K - 1) // 2
    ps = k_s // 2
    lanes = Cout * W
    kkwc = K * K * W * Cin

    bfull, bias_f, mmean, mband, tchan, tsp = _prep_constants(
        w, bias, wc, H=H, W=W, k_c=k_c)

    # NCHW -> folded NHWC: (N, H, W*Cin), lanes = w*Cin + ci.
    x_f = jnp.transpose(x_nchw, (0, 2, 3, 1)).reshape(N, H, W * Cin)

    out2d = pl.pallas_call(
        functools.partial(conv_unit_kernel, N=N, H=H, W=W, K=K, dil=dil,
                          cin=Cin, cout=Cout, k_s=k_s),
        out_shape=jax.ShapeDtypeStruct((N * H, lanes), jnp.float32),
        grid=(1,),
        in_specs=[
            pl.BlockSpec((N, H, W * Cin), lambda i: (0, 0, 0)),
            pl.BlockSpec((kkwc, lanes), lambda i: (0, 0)),
            pl.BlockSpec((1, lanes), lambda i: (0, 0)),
            pl.BlockSpec((lanes, Cout), lambda i: (0, 0)),
            pl.BlockSpec((Cout, Cout), lambda i: (0, 0)),
            pl.BlockSpec((Cout, lanes), lambda i: (0, 0)),
            pl.BlockSpec((W, lanes), lambda i: (0, 0)),
            pl.BlockSpec(memory_space=pltpu.MemorySpace.SMEM),
        ],
        out_specs=pl.BlockSpec((N * H, lanes), lambda i: (0, 0)),
        scratch_shapes=[
            pltpu.VMEM((N, H + 2 * pad, (W + 2 * pad) * Cin), jnp.float32),
            pltpu.VMEM((N, H, kkwc), jnp.float32),
            pltpu.VMEM((2, N, H + 2 * ps, W + 2 * ps), jnp.float32),
        ],
        compiler_params=pltpu.CompilerParams(
            dimension_semantics=("arbitrary",)),
    )(x_f, bfull, bias_f, mmean, mband, tchan, tsp, ws)

    # (N*H, Cout*W) -> (N, Cout, H, W)
    return out2d.reshape(N, H, Cout, W).transpose(0, 2, 1, 3)


def reference_forward(x_nchw, w, bias, wc, ws, *, dil, pad, k_c, k_s):
    """Pure-JAX reference with identical semantics (for verification)."""
    Cout = w.shape[-1]
    w_oihw = jnp.transpose(w, (3, 2, 0, 1))
    y = jax.lax.conv_general_dilated(
        x_nchw, w_oihw, window_strides=(1, 1),
        padding=[(pad, pad), (pad, pad)], rhs_dilation=(dil, dil),
        dimension_numbers=("NCHW", "OIHW", "NCHW"))
    y = jnp.maximum(y + bias.reshape(1, -1, 1, 1), 0.0)
    # channel attention (ECA)
    v = jnp.mean(y, axis=(2, 3)) + jnp.max(y, axis=(2, 3))       # (N, C)
    pc = k_c // 2
    vp = jnp.pad(v, ((0, 0), (pc, pc)))
    att = sum(wc[j] * vp[:, j:j + Cout] for j in range(k_c))
    y1 = y * jax.nn.sigmoid(att)[:, :, None, None]
    # spatial attention
    m = jnp.concatenate([jnp.mean(y1, axis=1, keepdims=True),
                         jnp.max(y1, axis=1, keepdims=True)], axis=1)
    ps = k_s // 2
    s = jax.lax.conv_general_dilated(
        m, ws.reshape(1, 2, k_s, k_s), window_strides=(1, 1),
        padding=[(ps, ps), (ps, ps)],
        dimension_numbers=("NCHW", "OIHW", "NCHW"))
    y2 = y1 * jax.nn.sigmoid(s)
    return jnp.where(y2 >= 0, y2, 0.2 * y2)


if __name__ == "__main__":
    # ConvUnit(inp_dim=4, oup_dim=8, kernel=3, dilation=2)
    N, Cin, H, W = 2, 4, 16, 16
    Cout, K, dil = 8, 3, 2
    pad = dil * (K - 1) // 2
    gamma, b_eca, k_s = 2, 1, 5
    t = int(abs((math.log2(Cout) + b_eca) / gamma))
    k_c = t if t % 2 == 1 else t + 1              # ECA adaptive odd kernel size

    key = jax.random.PRNGKey(0)
    kx, kwt, kb, kc, ks5 = jax.random.split(key, 5)
    x_nchw = jax.random.normal(kx, (N, Cin, H, W), jnp.float32)
    w = jax.random.normal(kwt, (K, K, Cin, Cout), jnp.float32) * 0.1
    bias = jax.random.normal(kb, (Cout,), jnp.float32) * 0.1
    wc = jax.random.normal(kc, (k_c,), jnp.float32) * 0.5
    ws = jax.random.normal(ks5, (2 * k_s * k_s,), jnp.float32) * 0.1

    out = conv_unit_forward(x_nchw, w, bias, wc, ws, K=K, dil=dil,
                            k_c=k_c, k_s=k_s)
    out = jax.block_until_ready(out)

    ref = reference_forward(x_nchw, w, bias, wc, ws, dil=dil, pad=pad,
                            k_c=k_c, k_s=k_s)
    assert out.shape == (N, Cout, H, W), out.shape
    max_err = float(jnp.max(jnp.abs(out - ref)))
    assert jnp.allclose(out, ref, atol=1e-3, rtol=1e-3), max_err
    print("KERNEL_OK")
</pallas_src>

<mosaic_0001>
module attributes {stable_mosaic.version = 11 : i64} {
  func.func @conv_unit_kernel(%arg0: i32, %arg1: memref<2x16x64xf32, #tpu.memory_space<vmem>>, %arg2: memref<576x128xf32, #tpu.memory_space<vmem>>, %arg3: memref<1x128xf32, #tpu.memory_space<vmem>>, %arg4: memref<128x8xf32, #tpu.memory_space<vmem>>, %arg5: memref<8x8xf32, #tpu.memory_space<vmem>>, %arg6: memref<8x128xf32, #tpu.memory_space<vmem>>, %arg7: memref<16x128xf32, #tpu.memory_space<vmem>>, %arg8: memref<50xf32, #tpu.memory_space<smem>>, %arg9: memref<32x128xf32, #tpu.memory_space<vmem>>, %arg10: memref<2x20x80xf32, #tpu.memory_space<vmem>>, %arg11: memref<2x16x576xf32, #tpu.memory_space<vmem>>, %arg12: memref<2x2x20x20xf32, #tpu.memory_space<vmem>>) attributes {dimension_semantics = [#tpu.dimension_semantics<arbitrary>], iteration_bounds = array<i64: 1>, scalar_prefetch = 0 : i64, scratch_operands = 3 : i64, tpu.core_type = #tpu.core_type<tc>, window_params = [{pipeline_mode = #tpu.pipeline_mode<synchronous>, transform_indices = @transform_0, window_bounds = array<i64: 2, 16, 64>}, {pipeline_mode = #tpu.pipeline_mode<synchronous>, transform_indices = @transform_1, window_bounds = array<i64: 576, 128>}, {pipeline_mode = #tpu.pipeline_mode<synchronous>, transform_indices = @transform_2, window_bounds = array<i64: 1, 128>}, {pipeline_mode = #tpu.pipeline_mode<synchronous>, transform_indices = @transform_3, window_bounds = array<i64: 128, 8>}, {pipeline_mode = #tpu.pipeline_mode<synchronous>, transform_indices = @transform_4, window_bounds = array<i64: 8, 8>}, {pipeline_mode = #tpu.pipeline_mode<synchronous>, transform_indices = @transform_5, window_bounds = array<i64: 8, 128>}, {pipeline_mode = #tpu.pipeline_mode<synchronous>, transform_indices = @transform_6, window_bounds = array<i64: 16, 128>}, {transform_indices = @transform_7, window_bounds = array<i64: 50>}, {pipeline_mode = #tpu.pipeline_mode<synchronous>, transform_indices = @transform_8, window_bounds = array<i64: 32, 128>}]} {
    %cst = arith.constant 0.000000e+00 : f32
    %0 = vector.broadcast %cst : f32 to vector<2x20x80xf32>
    %c0 = arith.constant 0 : index
    %c0_0 = arith.constant 0 : index
    %c0_1 = arith.constant 0 : index
    %1 = vector.load %arg10[%c0, %c0_0, %c0_1] : memref<2x20x80xf32, #tpu.memory_space<vmem>>, vector<2x20x80xf32>
    tpu.vector_store %arg10[%c0, %c0_0, %c0_1], %0 {strides = array<i32>} : memref<2x20x80xf32, #tpu.memory_space<vmem>>, vector<2x20x80xf32>,
    %c0_2 = arith.constant 0 : index
    %c0_3 = arith.constant 0 : index
    %c0_4 = arith.constant 0 : index
    %2 = vector.load %arg1[%c0_2, %c0_3, %c0_4] : memref<2x16x64xf32, #tpu.memory_space<vmem>>, vector<2x16x64xf32>
    %c0_5 = arith.constant 0 : index
    %c2 = arith.constant 2 : index
    %c8 = arith.constant 8 : index
    %3 = vector.load %arg10[%c0_5, %c2, %c8] : memref<2x20x80xf32, #tpu.memory_space<vmem>>, vector<2x16x64xf32>
    tpu.vector_store %arg10[%c0_5, %c2, %c8], %2 {strides = array<i32>} : memref<2x20x80xf32, #tpu.memory_space<vmem>>, vector<2x16x64xf32>,
    %c0_6 = arith.constant 0 : index
    %c0_7 = arith.constant 0 : index
    %c0_8 = arith.constant 0 : index
    %4 = vector.load %arg10[%c0_6, %c0_7, %c0_8] : memref<2x20x80xf32, #tpu.memory_space<vmem>>, vector<2x16x64xf32>
    %c0_9 = arith.constant 0 : index
    %c0_10 = arith.constant 0 : index
    %c0_11 = arith.constant 0 : index
    %5 = vector.load %arg11[%c0_9, %c0_10, %c0_11] : memref<2x16x576xf32, #tpu.memory_space<vmem>>, vector<2x16x64xf32>
    tpu.vector_store %arg11[%c0_9, %c0_10, %c0_11], %4 {strides = array<i32>} : memref<2x16x576xf32, #tpu.memory_space<vmem>>, vector<2x16x64xf32>,
    %c0_12 = arith.constant 0 : index
    %c0_13 = arith.constant 0 : index
    %c8_14 = arith.constant 8 : index
    %6 = vector.load %arg10[%c0_12, %c0_13, %c8_14] : memref<2x20x80xf32, #tpu.memory_space<vmem>>, vector<2x16x64xf32>
    %c0_15 = arith.constant 0 : index
    %c0_16 = arith.constant 0 : index
    %c64 = arith.constant 64 : index
    %7 = vector.load %arg11[%c0_15, %c0_16, %c64] : memref<2x16x576xf32, #tpu.memory_space<vmem>>, vector<2x16x64xf32>
    tpu.vector_store %arg11[%c0_15, %c0_16, %c64], %6 {strides = array<i32>} : memref<2x16x576xf32, #tpu.memory_space<vmem>>, vector<2x16x64xf32>,
    %c0_17 = arith.constant 0 : index
    %c0_18 = arith.constant 0 : index
    %c16 = arith.constant 16 : index
    %8 = vector.load %arg10[%c0_17, %c0_18, %c16] : memref<2x20x80xf32, #tpu.memory_space<vmem>>, vector<2x16x64xf32>
    %c0_19 = arith.constant 0 : index
    %c0_20 = arith.constant 0 : index
    %c128 = arith.constant 128 : index
    %9 = vector.load %arg11[%c0_19, %c0_20, %c128] : memref<2x16x576xf32, #tpu.memory_space<vmem>>, vector<2x16x64xf32>
    tpu.vector_store %arg11[%c0_19, %c0_20, %c128], %8 {strides = array<i32>} : memref<2x16x576xf32, #tpu.memory_space<vmem>>, vector<2x16x64xf32>,
    %c0_21 = arith.constant 0 : index
    %c2_22 = arith.constant 2 : index
    %c0_23 = arith.constant 0 : index
    %10 = vector.load %arg10[%c0_21, %c2_22, %c0_23] : memref<2x20x80xf32, #tpu.memory_space<vmem>>, vector<2x16x64xf32>
    %c0_24 = arith.constant 0 : index
    %c0_25 = arith.constant 0 : index
    %c192 = arith.constant 192 : index
    %11 = vector.load %arg11[%c0_24, %c0_25, %c192] : memref<2x16x576xf32, #tpu.memory_space<vmem>>, vector<2x16x64xf32>
    tpu.vector_store %arg11[%c0_24, %c0_25, %c192], %10 {strides = array<i32>} : memref<2x16x576xf32, #tpu.memory_space<vmem>>, vector<2x16x64xf32>,
    %c0_26 = arith.constant 0 : index
    %c2_27 = arith.constant 2 : index
    %c8_28 = arith.constant 8 : index
    %12 = vector.load %arg10[%c0_26, %c2_27, %c8_28] : memref<2x20x80xf32, #tpu.memory_space<vmem>>, vector<2x16x64xf32>
    %c0_29 = arith.constant 0 : index
    %c0_30 = arith.constant 0 : index
    %c256 = arith.constant 256 : index
    %13 = vector.load %arg11[%c0_29, %c0_30, %c256] : memref<2x16x576xf32, #tpu.memory_space<vmem>>, vector<2x16x64xf32>
    tpu.vector_store %arg11[%c0_29, %c0_30, %c256], %12 {strides = array<i32>} : memref<2x16x576xf32, #tpu.memory_space<vmem>>, vector<2x16x64xf32>,
    %c0_31 = arith.constant 0 : index
    %c2_32 = arith.constant 2 : index
    %c16_33 = arith.constant 16 : index
    %14 = vector.load %arg10[%c0_31, %c2_32, %c16_33] : memref<2x20x80xf32, #tpu.memory_space<vmem>>, vector<2x16x64xf32>
    %c0_34 = arith.constant 0 : index
    %c0_35 = arith.constant 0 : index
    %c320 = arith.constant 320 : index
    %15 = vector.load %arg11[%c0_34, %c0_35, %c320] : memref<2x16x576xf32, #tpu.memory_space<vmem>>, vector<2x16x64xf32>
    tpu.vector_store %arg11[%c0_34, %c0_35, %c320], %14 {strides = array<i32>} : memref<2x16x576xf32, #tpu.memory_space<vmem>>, vector<2x16x64xf32>,
    %c0_36 = arith.constant 0 : index
    %c4 = arith.constant 4 : index
    %c0_37 = arith.constant 0 : index
    %16 = vector.load %arg10[%c0_36, %c4, %c0_37] : memref<2x20x80xf32, #tpu.memory_space<vmem>>, vector<2x16x64xf32>
    %c0_38 = arith.constant 0 : index
    %c0_39 = arith.constant 0 : index
    %c384 = arith.constant 384 : index
    %17 = vector.load %arg11[%c0_38, %c0_39, %c384] : memref<2x16x576xf32, #tpu.memory_space<vmem>>, vector<2x16x64xf32>
    tpu.vector_store %arg11[%c0_38, %c0_39, %c384], %16 {strides = array<i32>} : memref<2x16x576xf32, #tpu.memory_space<vmem>>, vector<2x16x64xf32>,
    %c0_40 = arith.constant 0 : index
    %c4_41 = arith.constant 4 : index
    %c8_42 = arith.constant 8 : index
    %18 = vector.load %arg10[%c0_40, %c4_41, %c8_42] : memref<2x20x80xf32, #tpu.memory_space<vmem>>, vector<2x16x64xf32>
    %c0_43 = arith.constant 0 : index
    %c0_44 = arith.constant 0 : index
    %c448 = arith.constant 448 : index
    %19 = vector.load %arg11[%c0_43, %c0_44, %c448] : memref<2x16x576xf32, #tpu.memory_space<vmem>>, vector<2x16x64xf32>
    tpu.vector_store %arg11[%c0_43, %c0_44, %c448], %18 {strides = array<i32>} : memref<2x16x576xf32, #tpu.memory_space<vmem>>, vector<2x16x64xf32>,
    %c0_45 = arith.constant 0 : index
    %c4_46 = arith.constant 4 : index
    %c16_47 = arith.constant 16 : index
    %20 = vector.load %arg10[%c0_45, %c4_46, %c16_47] : memref<2x20x80xf32, #tpu.memory_space<vmem>>, vector<2x16x64xf32>
    %c0_48 = arith.constant 0 : index
    %c0_49 = arith.constant 0 : index
    %c512 = arith.constant 512 : index
    %21 = vector.load %arg11[%c0_48, %c0_49, %c512] : memref<2x16x576xf32, #tpu.memory_space<vmem>>, vector<2x16x64xf32>
    tpu.vector_store %arg11[%c0_48, %c0_49, %c512], %20 {strides = array<i32>} : memref<2x16x576xf32, #tpu.memory_space<vmem>>, vector<2x16x64xf32>,
    %c0_50 = arith.constant 0 : index
    %c0_51 = arith.constant 0 : index
    %c0_52 = arith.constant 0 : index
    %22 = vector.load %arg11[%c0_50, %c0_51, %c0_52] : memref<2x16x576xf32, #tpu.memory_space<vmem>>, vector<2x16x576xf32>
    %23 = vector.shape_cast %22 : vector<2x16x576xf32> to vector<32x576xf32>
    %c0_53 = arith.constant 0 : index
    %c0_54 = arith.constant 0 : index
    %24 = vector.load %arg2[%c0_53, %c0_54] : memref<576x128xf32, #tpu.memory_space<vmem>>, vector<576x128xf32>
    %cst_55 = arith.constant dense<0.000000e+00> : vector<32x128xf32>
    %25 = tpu.matmul %23, %24, %cst_55 {dimension_numbers = #tpu.dot_dimension_numbers<[1], [0], [0], [1], [0, 0, 1, 1], [], []>} : vector<32x576xf32>, vector<576x128xf32>, vector<32x128xf32> -> vector<32x128xf32>
    %c0_56 = arith.constant 0 : index
    %c0_57 = arith.constant 0 : index
    %26 = vector.load %arg3[%c0_56, %c0_57] : memref<1x128xf32, #tpu.memory_space<vmem>>, vector<1x128xf32>
    %27 = vector.broadcast %26 : vector<1x128xf32> to vector<32x128xf32>
    %28 = arith.addf %25, %27 : vector<32x128xf32>
    %cst_58 = arith.constant 0.000000e+00 : f32
    %29 = vector.broadcast %cst_58 : f32 to vector<32x128xf32>
    %30 = arith.maximumf %28, %29 : vector<32x128xf32>
    %31 = vector.shape_cast %30 : vector<32x128xf32> to vector<2x16x128xf32>
    %cst_59 = arith.constant dense<0.000000e+00> : vector<2x128xf32>
    %32 = vector.multi_reduction <add>, %31, %cst_59 [1] : vector<2x16x128xf32> to vector<2x128xf32>
    %cst_60 = arith.constant dense<0xFF800000> : vector<2x128xf32>
    %33 = vector.multi_reduction <maximumf>, %31, %cst_60 [1] : vector<2x16x128xf32> to vector<2x128xf32>
    %c0_61 = arith.constant 0 : index
    %c0_62 = arith.constant 0 : index
    %34 = vector.load %arg4[%c0_61, %c0_62] : memref<128x8xf32, #tpu.memory_space<vmem>>, vector<128x8xf32>
    %cst_63 = arith.constant dense<0.000000e+00> : vector<2x8xf32>
    %35 = tpu.matmul %32, %34, %cst_63 {dimension_numbers = #tpu.dot_dimension_numbers<[1], [0], [0], [1], [0, 0, 1, 1], [], []>} : vector<2x128xf32>, vector<128x8xf32>, vector<2x8xf32> -> vector<2x8xf32>
    %36 = vector.extract_strided_slice %33 {offsets = [0, 0], sizes = [2, 16], strides = [1, 1]} : vector<2x128xf32> to vector<2x16xf32>
    %cst_64 = arith.constant dense<0xFF800000> : vector<2xf32>
    %37 = vector.multi_reduction <maximumf>, %36, %cst_64 [1] : vector<2x16xf32> to vector<2xf32>
    %38 = vector.shape_cast %37 : vector<2xf32> to vector<2x1xf32>
    %c0_65 = arith.constant 0 : index
    %c0_66 = arith.constant 0 : index
    %39 = vector.load %arg5[%c0_65, %c0_66] : memref<8x8xf32, #tpu.memory_space<vmem>>, vector<1x8xf32>
    %40 = vector.broadcast %38 : vector<2x1xf32> to vector<2x8xf32>
    %41 = vector.broadcast %39 : vector<1x8xf32> to vector<2x8xf32>
    %42 = arith.mulf %40, %41 : vector<2x8xf32>
    %43 = arith.addf %35, %42 : vector<2x8xf32>
    %44 = vector.extract_strided_slice %33 {offsets = [0, 16], sizes = [2, 16], strides = [1, 1]} : vector<2x128xf32> to vector<2x16xf32>
    %cst_67 = arith.constant dense<0xFF800000> : vector<2xf32>
    %45 = vector.multi_reduction <maximumf>, %44, %cst_67 [1] : vector<2x16xf32> to vector<2xf32>
    %46 = vector.shape_cast %45 : vector<2xf32> to vector<2x1xf32>
    %c1 = arith.constant 1 : index
    %c0_68 = arith.constant 0 : index
    %47 = vector.load %arg5[%c1, %c0_68] : memref<8x8xf32, #tpu.memory_space<vmem>>, vector<1x8xf32>
    %48 = vector.broadcast %46 : vector<2x1xf32> to vector<2x8xf32>
    %49 = vector.broadcast %47 : vector<1x8xf32> to vector<2x8xf32>
    %50 = arith.mulf %48, %49 : vector<2x8xf32>
    %51 = arith.addf %43, %50 : vector<2x8xf32>
    %52 = vector.extract_strided_slice %33 {offsets = [0, 32], sizes = [2, 16], strides = [1, 1]} : vector<2x128xf32> to vector<2x16xf32>
    %cst_69 = arith.constant dense<0xFF800000> : vector<2xf32>
    %53 = vector.multi_reduction <maximumf>, %52, %cst_69 [1] : vector<2x16xf32> to vector<2xf32>
    %54 = vector.shape_cast %53 : vector<2xf32> to vector<2x1xf32>
    %c2_70 = arith.constant 2 : index
    %c0_71 = arith.constant 0 : index
    %55 = vector.load %arg5[%c2_70, %c0_71] : memref<8x8xf32, #tpu.memory_space<vmem>>, vector<1x8xf32>
    %56 = vector.broadcast %54 : vector<2x1xf32> to vector<2x8xf32>
    %57 = vector.broadcast %55 : vector<1x8xf32> to vector<2x8xf32>
    %58 = arith.mulf %56, %57 : vector<2x8xf32>
    %59 = arith.addf %51, %58 : vector<2x8xf32>
    %60 = vector.extract_strided_slice %33 {offsets = [0, 48], sizes = [2, 16], strides = [1, 1]} : vector<2x128xf32> to vector<2x16xf32>
    %cst_72 = arith.constant dense<0xFF800000> : vector<2xf32>
    %61 = vector.multi_reduction <maximumf>, %60, %cst_72 [1] : vector<2x16xf32> to vector<2xf32>
    %62 = vector.shape_cast %61 : vector<2xf32> to vector<2x1xf32>
    %c3 = arith.constant 3 : index
    %c0_73 = arith.constant 0 : index
    %63 = vector.load %arg5[%c3, %c0_73] : memref<8x8xf32, #tpu.memory_space<vmem>>, vector<1x8xf32>
    %64 = vector.broadcast %62 : vector<2x1xf32> to vector<2x8xf32>
    %65 = vector.broadcast %63 : vector<1x8xf32> to vector<2x8xf32>
    %66 = arith.mulf %64, %65 : vector<2x8xf32>
    %67 = arith.addf %59, %66 : vector<2x8xf32>
    %68 = vector.extract_strided_slice %33 {offsets = [0, 64], sizes = [2, 16], strides = [1, 1]} : vector<2x128xf32> to vector<2x16xf32>
    %cst_74 = arith.constant dense<0xFF800000> : vector<2xf32>
    %69 = vector.multi_reduction <maximumf>, %68, %cst_74 [1] : vector<2x16xf32> to vector<2xf32>
    %70 = vector.shape_cast %69 : vector<2xf32> to vector<2x1xf32>
    %c4_75 = arith.constant 4 : index
    %c0_76 = arith.constant 0 : index
    %71 = vector.load %arg5[%c4_75, %c0_76] : memref<8x8xf32, #tpu.memory_space<vmem>>, vector<1x8xf32>
    %72 = vector.broadcast %70 : vector<2x1xf32> to vector<2x8xf32>
    %73 = vector.broadcast %71 : vector<1x8xf32> to vector<2x8xf32>
    %74 = arith.mulf %72, %73 : vector<2x8xf32>
    %75 = arith.addf %67, %74 : vector<2x8xf32>
    %76 = vector.extract_strided_slice %33 {offsets = [0, 80], sizes = [2, 16], strides = [1, 1]} : vector<2x128xf32> to vector<2x16xf32>
    %cst_77 = arith.constant dense<0xFF800000> : vector<2xf32>
    %77 = vector.multi_reduction <maximumf>, %76, %cst_77 [1] : vector<2x16xf32> to vector<2xf32>
    %78 = vector.shape_cast %77 : vector<2xf32> to vector<2x1xf32>
    %c5 = arith.constant 5 : index
    %c0_78 = arith.constant 0 : index
    %79 = vector.load %arg5[%c5, %c0_78] : memref<8x8xf32, #tpu.memory_space<vmem>>, vector<1x8xf32>
    %80 = vector.broadcast %78 : vector<2x1xf32> to vector<2x8xf32>
    %81 = vector.broadcast %79 : vector<1x8xf32> to vector<2x8xf32>
    %82 = arith.mulf %80, %81 : vector<2x8xf32>
    %83 = arith.addf %75, %82 : vector<2x8xf32>
    %84 = vector.extract_strided_slice %33 {offsets = [0, 96], sizes = [2, 16], strides = [1, 1]} : vector<2x128xf32> to vector<2x16xf32>
    %cst_79 = arith.constant dense<0xFF800000> : vector<2xf32>
    %85 = vector.multi_reduction <maximumf>, %84, %cst_79 [1] : vector<2x16xf32> to vector<2xf32>
    %86 = vector.shape_cast %85 : vector<2xf32> to vector<2x1xf32>
    %c6 = arith.constant 6 : index
    %c0_80 = arith.constant 0 : index
    %87 = vector.load %arg5[%c6, %c0_80] : memref<8x8xf32, #tpu.memory_space<vmem>>, vector<1x8xf32>
    %88 = vector.broadcast %86 : vector<2x1xf32> to vector<2x8xf32>
    %89 = vector.broadcast %87 : vector<1x8xf32> to vector<2x8xf32>
    %90 = arith.mulf %88, %89 : vector<2x8xf32>
    %91 = arith.addf %83, %90 : vector<2x8xf32>
    %92 = vector.extract_strided_slice %33 {offsets = [0, 112], sizes = [2, 16], strides = [1, 1]} : vector<2x128xf32> to vector<2x16xf32>
    %cst_81 = arith.constant dense<0xFF800000> : vector<2xf32>
    %93 = vector.multi_reduction <maximumf>, %92, %cst_81 [1] : vector<2x16xf32> to vector<2xf32>
    %94 = vector.shape_cast %93 : vector<2xf32> to vector<2x1xf32>
    %c7 = arith.constant 7 : index
    %c0_82 = arith.constant 0 : index
    %95 = vector.load %arg5[%c7, %c0_82] : memref<8x8xf32, #tpu.memory_space<vmem>>, vector<1x8xf32>
    %96 = vector.broadcast %94 : vector<2x1xf32> to vector<2x8xf32>
    %97 = vector.broadcast %95 : vector<1x8xf32> to vector<2x8xf32>
    %98 = arith.mulf %96, %97 : vector<2x8xf32>
    %99 = arith.addf %91, %98 : vector<2x8xf32>
    %100 = arith.negf %99 : vector<2x8xf32>
    %101 = math.exp %100 : vector<2x8xf32>
    %cst_83 = arith.constant 1.000000e+00 : f32
    %102 = vector.broadcast %cst_83 : f32 to vector<2x8xf32>
    %103 = arith.addf %102, %101 : vector<2x8xf32>
    %104 = arith.divf %102, %103 : vector<2x8xf32>
    %c0_84 = arith.constant 0 : index
    %c0_85 = arith.constant 0 : index
    %105 = vector.load %arg6[%c0_84, %c0_85] : memref<8x128xf32, #tpu.memory_space<vmem>>, vector<8x128xf32>
    %cst_86 = arith.constant dense<0.000000e+00> : vector<2x128xf32>
    %106 = tpu.matmul %104, %105, %cst_86 {dimension_numbers = #tpu.dot_dimension_numbers<[1], [0], [0], [1], [0, 0, 1, 1], [], []>} : vector<2x8xf32>, vector<8x128xf32>, vector<2x128xf32> -> vector<2x128xf32>
    %107 = vector.shape_cast %106 : vector<2x128xf32> to vector<2x1x128xf32>
    %108 = vector.broadcast %107 : vector<2x1x128xf32> to vector<2x16x128xf32>
    %109 = arith.mulf %31, %108 : vector<2x16x128xf32>
    %110 = vector.shape_cast %109 : vector<2x16x128xf32> to vector<32x128xf32>
    %111 = vector.extract_strided_slice %110 {offsets = [0, 0], sizes = [32, 16], strides = [1, 1]} : vector<32x128xf32> to vector<32x16xf32>
    %112 = vector.extract_strided_slice %110 {offsets = [0, 0], sizes = [32, 16], strides = [1, 1]} : vector<32x128xf32> to vector<32x16xf32>
    %113 = vector.extract_strided_slice %110 {offsets = [0, 16], sizes = [32, 16], strides = [1, 1]} : vector<32x128xf32> to vector<32x16xf32>
    %114 = arith.addf %111, %113 : vector<32x16xf32>
    %115 = arith.maximumf %112, %113 : vector<32x16xf32>
    %116 = vector.extract_strided_slice %110 {offsets = [0, 32], sizes = [32, 16], strides = [1, 1]} : vector<32x128xf32> to vector<32x16xf32>
    %117 = arith.addf %114, %116 : vector<32x16xf32>
    %118 = arith.maximumf %115, %116 : vector<32x16xf32>
    %119 = vector.extract_strided_slice %110 {offsets = [0, 48], sizes = [32, 16], strides = [1, 1]} : vector<32x128xf32> to vector<32x16xf32>
    %120 = arith.addf %117, %119 : vector<32x16xf32>
    %121 = arith.maximumf %118, %119 : vector<32x16xf32>
    %122 = vector.extract_strided_slice %110 {offsets = [0, 64], sizes = [32, 16], strides = [1, 1]} : vector<32x128xf32> to vector<32x16xf32>
    %123 = arith.addf %120, %122 : vector<32x16xf32>
    %124 = arith.maximumf %121, %122 : vector<32x16xf32>
    %125 = vector.extract_strided_slice %110 {offsets = [0, 80], sizes = [32, 16], strides = [1, 1]} : vector<32x128xf32> to vector<32x16xf32>
    %126 = arith.addf %123, %125 : vector<32x16xf32>
    %127 = arith.maximumf %124, %125 : vector<32x16xf32>
    %128 = vector.extract_strided_slice %110 {offsets = [0, 96], sizes = [32, 16], strides = [1, 1]} : vector<32x128xf32> to vector<32x16xf32>
    %129 = arith.addf %126, %128 : vector<32x16xf32>
    %130 = arith.maximumf %127, %128 : vector<32x16xf32>
    %131 = vector.extract_strided_slice %110 {offsets = [0, 112], sizes = [32, 16], strides = [1, 1]} : vector<32x128xf32> to vector<32x16xf32>
    %132 = arith.addf %129, %131 : vector<32x16xf32>
    %133 = arith.maximumf %130, %131 : vector<32x16xf32>
    %cst_87 = arith.constant 1.250000e-01 : f32
    %134 = vector.broadcast %cst_87 : f32 to vector<32x16xf32>
    %135 = arith.mulf %132, %134 : vector<32x16xf32>
    %cst_88 = arith.constant 0.000000e+00 : f32
    %136 = vector.broadcast %cst_88 : f32 to vector<2x2x20x20xf32>
    %c0_89 = arith.constant 0 : index
    %c0_90 = arith.constant 0 : index
    %c0_91 = arith.constant 0 : index
    %c0_92 = arith.constant 0 : index
    %137 = vector.load %arg12[%c0_89, %c0_90, %c0_91, %c0_92] : memref<2x2x20x20xf32, #tpu.memory_space<vmem>>, vector<2x2x20x20xf32>
    tpu.vector_store %arg12[%c0_89, %c0_90, %c0_91, %c0_92], %136 {strides = array<i32>} : memref<2x2x20x20xf32, #tpu.memory_space<vmem>>, vector<2x2x20x20xf32>,
    %138 = vector.shape_cast %135 : vector<32x16xf32> to vector<2x16x16xf32>
    %c0_93 = arith.constant 0 : index
    %c0_94 = arith.constant 0 : index
    %c2_95 = arith.constant 2 : index
    %c2_96 = arith.constant 2 : index
    %139 = vector.load %arg12[%c0_93, %c0_94, %c2_95, %c2_96] : memref<2x2x20x20xf32, #tpu.memory_space<vmem>>, vector<1x2x16x16xf32>
    %140 = vector.shape_cast %139 : vector<1x2x16x16xf32> to vector<2x16x16xf32>
    %141 = vector.shape_cast %138 : vector<2x16x16xf32> to vector<1x2x16x16xf32>
    tpu.vector_store %arg12[%c0_93, %c0_94, %c2_95, %c2_96], %141 {strides = array<i32>} : memref<2x2x20x20xf32, #tpu.memory_space<vmem>>, vector<1x2x16x16xf32>,
    %142 = vector.shape_cast %133 : vector<32x16xf32> to vector<2x16x16xf32>
    %c1_97 = arith.constant 1 : index
    %c0_98 = arith.constant 0 : index
    %c2_99 = arith.constant 2 : index
    %c2_100 = arith.constant 2 : index
    %143 = vector.load %arg12[%c1_97, %c0_98, %c2_99, %c2_100] : memref<2x2x20x20xf32, #tpu.memory_space<vmem>>, vector<1x2x16x16xf32>
    %144 = vector.shape_cast %143 : vector<1x2x16x16xf32> to vector<2x16x16xf32>
    %145 = vector.shape_cast %142 : vector<2x16x16xf32> to vector<1x2x16x16xf32>
    tpu.vector_store %arg12[%c1_97, %c0_98, %c2_99, %c2_100], %145 {strides = array<i32>} : memref<2x2x20x20xf32, #tpu.memory_space<vmem>>, vector<1x2x16x16xf32>,
    %cst_101 = arith.constant 0.000000e+00 : f32
    %146 = vector.broadcast %cst_101 : f32 to vector<2x16x16xf32>
    %c0_102 = arith.constant 0 : index
    %c0_103 = arith.constant 0 : index
    %c0_104 = arith.constant 0 : index
    %c0_105 = arith.constant 0 : index
    %147 = vector.load %arg12[%c0_102, %c0_103, %c0_104, %c0_105] : memref<2x2x20x20xf32, #tpu.memory_space<vmem>>, vector<1x2x20x20xf32>
    %148 = vector.shape_cast %147 : vector<1x2x20x20xf32> to vector<2x20x20xf32>
    %c0_106 = arith.constant 0 : index
    %149 = memref.load %arg8[%c0_106] : memref<50xf32, #tpu.memory_space<smem>>
    %150 = vector.extract_strided_slice %148 {offsets = [0, 0, 0], sizes = [2, 16, 16], strides = [1, 1, 1]} : vector<2x20x20xf32> to vector<2x16x16xf32>
    %151 = vector.broadcast %149 : f32 to vector<2x16x16xf32>
    %152 = arith.mulf %151, %150 : vector<2x16x16xf32>
    %153 = arith.addf %146, %152 : vector<2x16x16xf32>
    %c1_107 = arith.constant 1 : index
    %154 = memref.load %arg8[%c1_107] : memref<50xf32, #tpu.memory_space<smem>>
    %155 = vector.extract_strided_slice %148 {offsets = [0, 0, 1], sizes = [2, 16, 16], strides = [1, 1, 1]} : vector<2x20x20xf32> to vector<2x16x16xf32>
    %156 = vector.broadcast %154 : f32 to vector<2x16x16xf32>
    %157 = arith.mulf %156, %155 : vector<2x16x16xf32>
    %158 = arith.addf %153, %157 : vector<2x16x16xf32>
    %c2_108 = arith.constant 2 : index
    %159 = memref.load %arg8[%c2_108] : memref<50xf32, #tpu.memory_space<smem>>
    %160 = vector.extract_strided_slice %148 {offsets = [0, 0, 2], sizes = [2, 16, 16], strides = [1, 1, 1]} : vector<2x20x20xf32> to vector<2x16x16xf32>
    %161 = vector.broadcast %159 : f32 to vector<2x16x16xf32>
    %162 = arith.mulf %161, %160 : vector<2x16x16xf32>
    %163 = arith.addf %158, %162 : vector<2x16x16xf32>
    %c3_109 = arith.constant 3 : index
    %164 = memref.load %arg8[%c3_109] : memref<50xf32, #tpu.memory_space<smem>>
    %165 = vector.extract_strided_slice %148 {offsets = [0, 0, 3], sizes = [2, 16, 16], strides = [1, 1, 1]} : vector<2x20x20xf32> to vector<2x16x16xf32>
    %166 = vector.broadcast %164 : f32 to vector<2x16x16xf32>
    %167 = arith.mulf %166, %165 : vector<2x16x16xf32>
    %168 = arith.addf %163, %167 : vector<2x16x16xf32>
    %c4_110 = arith.constant 4 : index
    %169 = memref.load %arg8[%c4_110] : memref<50xf32, #tpu.memory_space<smem>>
    %170 = vector.extract_strided_slice %148 {offsets = [0, 0, 4], sizes = [2, 16, 16], strides = [1, 1, 1]} : vector<2x20x20xf32> to vector<2x16x16xf32>
    %171 = vector.broadcast %169 : f32 to vector<2x16x16xf32>
    %172 = arith.mulf %171, %170 : vector<2x16x16xf32>
    %173 = arith.addf %168, %172 : vector<2x16x16xf32>
    %c5_111 = arith.constant 5 : index
    %174 = memref.load %arg8[%c5_111] : memref<50xf32, #tpu.memory_space<smem>>
    %175 = vector.extract_strided_slice %148 {offsets = [0, 1, 0], sizes = [2, 16, 16], strides = [1, 1, 1]} : vector<2x20x20xf32> to vector<2x16x16xf32>
    %176 = vector.broadcast %174 : f32 to vector<2x16x16xf32>
    %177 = arith.mulf %176, %175 : vector<2x16x16xf32>
    %178 = arith.addf %173, %177 : vector<2x16x16xf32>
    %c6_112 = arith.constant 6 : index
    %179 = memref.load %arg8[%c6_112] : memref<50xf32, #tpu.memory_space<smem>>
    %180 = vector.extract_strided_slice %148 {offsets = [0, 1, 1], sizes = [2, 16, 16], strides = [1, 1, 1]} : vector<2x20x20xf32> to vector<2x16x16xf32>
    %181 = vector.broadcast %179 : f32 to vector<2x16x16xf32>
    %182 = arith.mulf %181, %180 : vector<2x16x16xf32>
    %183 = arith.addf %178, %182 : vector<2x16x16xf32>
    %c7_113 = arith.constant 7 : index
    %184 = memref.load %arg8[%c7_113] : memref<50xf32, #tpu.memory_space<smem>>
    %185 = vector.extract_strided_slice %148 {offsets = [0, 1, 2], sizes = [2, 16, 16], strides = [1, 1, 1]} : vector<2x20x20xf32> to vector<2x16x16xf32>
    %186 = vector.broadcast %184 : f32 to vector<2x16x16xf32>
    %187 = arith.mulf %186, %185 : vector<2x16x16xf32>
    %188 = arith.addf %183, %187 : vector<2x16x16xf32>
    %c8_114 = arith.constant 8 : index
    %189 = memref.load %arg8[%c8_114] : memref<50xf32, #tpu.memory_space<smem>>
    %190 = vector.extract_strided_slice %148 {offsets = [0, 1, 3], sizes = [2, 16, 16], strides = [1, 1, 1]} : vector<2x20x20xf32> to vector<2x16x16xf32>
    %191 = vector.broadcast %189 : f32 to vector<2x16x16xf32>
    %192 = arith.mulf %191, %190 : vector<2x16x16xf32>
    %193 = arith.addf %188, %192 : vector<2x16x16xf32>
    %c9 = arith.constant 9 : index
    %194 = memref.load %arg8[%c9] : memref<50xf32, #tpu.memory_space<smem>>
    %195 = vector.extract_strided_slice %148 {offsets = [0, 1, 4], sizes = [2, 16, 16], strides = [1, 1, 1]} : vector<2x20x20xf32> to vector<2x16x16xf32>
    %196 = vector.broadcast %194 : f32 to vector<2x16x16xf32>
    %197 = arith.mulf %196, %195 : vector<2x16x16xf32>
    %198 = arith.addf %193, %197 : vector<2x16x16xf32>
    %c10 = arith.constant 10 : index
    %199 = memref.load %arg8[%c10] : memref<50xf32, #tpu.memory_space<smem>>
    %200 = vector.extract_strided_slice %148 {offsets = [0, 2, 0], sizes = [2, 16, 16], strides = [1, 1, 1]} : vector<2x20x20xf32> to vector<2x16x16xf32>
    %201 = vector.broadcast %199 : f32 to vector<2x16x16xf32>
    %202 = arith.mulf %201, %200 : vector<2x16x16xf32>
    %203 = arith.addf %198, %202 : vector<2x16x16xf32>
    %c11 = arith.constant 11 : index
    %204 = memref.load %arg8[%c11] : memref<50xf32, #tpu.memory_space<smem>>
    %205 = vector.extract_strided_slice %148 {offsets = [0, 2, 1], sizes = [2, 16, 16], strides = [1, 1, 1]} : vector<2x20x20xf32> to vector<2x16x16xf32>
    %206 = vector.broadcast %204 : f32 to vector<2x16x16xf32>
    %207 = arith.mulf %206, %205 : vector<2x16x16xf32>
    %208 = arith.addf %203, %207 : vector<2x16x16xf32>
    %c12 = arith.constant 12 : index
    %209 = memref.load %arg8[%c12] : memref<50xf32, #tpu.memory_space<smem>>
    %210 = vector.extract_strided_slice %148 {offsets = [0, 2, 2], sizes = [2, 16, 16], strides = [1, 1, 1]} : vector<2x20x20xf32> to vector<2x16x16xf32>
    %211 = vector.broadcast %209 : f32 to vector<2x16x16xf32>
    %212 = arith.mulf %211, %210 : vector<2x16x16xf32>
    %213 = arith.addf %208, %212 : vector<2x16x16xf32>
    %c13 = arith.constant 13 : index
    %214 = memref.load %arg8[%c13] : memref<50xf32, #tpu.memory_space<smem>>
    %215 = vector.extract_strided_slice %148 {offsets = [0, 2, 3], sizes = [2, 16, 16], strides = [1, 1, 1]} : vector<2x20x20xf32> to vector<2x16x16xf32>
    %216 = vector.broadcast %214 : f32 to vector<2x16x16xf32>
    %217 = arith.mulf %216, %215 : vector<2x16x16xf32>
    %218 = arith.addf %213, %217 : vector<2x16x16xf32>
    %c14 = arith.constant 14 : index
    %219 = memref.load %arg8[%c14] : memref<50xf32, #tpu.memory_space<smem>>
    %220 = vector.extract_strided_slice %148 {offsets = [0, 2, 4], sizes = [2, 16, 16], strides = [1, 1, 1]} : vector<2x20x20xf32> to vector<2x16x16xf32>
    %221 = vector.broadcast %219 : f32 to vector<2x16x16xf32>
    %222 = arith.mulf %221, %220 : vector<2x16x16xf32>
    %223 = arith.addf %218, %222 : vector<2x16x16xf32>
    %c15 = arith.constant 15 : index
    %224 = memref.load %arg8[%c15] : memref<50xf32, #tpu.memory_space<smem>>
    %225 = vector.extract_strided_slice %148 {offsets = [0, 3, 0], sizes = [2, 16, 16], strides = [1, 1, 1]} : vector<2x20x20xf32> to vector<2x16x16xf32>
    %226 = vector.broadcast %224 : f32 to vector<2x16x16xf32>
    %227 = arith.mulf %226, %225 : vector<2x16x16xf32>
    %228 = arith.addf %223, %227 : vector<2x16x16xf32>
    %c16_115 = arith.constant 16 : index
    %229 = memref.load %arg8[%c16_115] : memref<50xf32, #tpu.memory_space<smem>>
    %230 = vector.extract_strided_slice %148 {offsets = [0, 3, 1], sizes = [2, 16, 16], strides = [1, 1, 1]} : vector<2x20x20xf32> to vector<2x16x16xf32>
    %231 = vector.broadcast %229 : f32 to vector<2x16x16xf32>
    %232 = arith.mulf %231, %230 : vector<2x16x16xf32>
    %233 = arith.addf %228, %232 : vector<2x16x16xf32>
    %c17 = arith.constant 17 : index
    %234 = memref.load %arg8[%c17] : memref<50xf32, #tpu.memory_space<smem>>
    %235 = vector.extract_strided_slice %148 {offsets = [0, 3, 2], sizes = [2, 16, 16], strides = [1, 1, 1]} : vector<2x20x20xf32> to vector<2x16x16xf32>
    %236 = vector.broadcast %234 : f32 to vector<2x16x16xf32>
    %237 = arith.mulf %236, %235 : vector<2x16x16xf32>
    %238 = arith.addf %233, %237 : vector<2x16x16xf32>
    %c18 = arith.constant 18 : index
    %239 = memref.load %arg8[%c18] : memref<50xf32, #tpu.memory_space<smem>>
    %240 = vector.extract_strided_slice %148 {offsets = [0, 3, 3], sizes = [2, 16, 16], strides = [1, 1, 1]} : vector<2x20x20xf32> to vector<2x16x16xf32>
    %241 = vector.broadcast %239 : f32 to vector<2x16x16xf32>
    %242 = arith.mulf %241, %240 : vector<2x16x16xf32>
    %243 = arith.addf %238, %242 : vector<2x16x16xf32>
    %c19 = arith.constant 19 : index
    %244 = memref.load %arg8[%c19] : memref<50xf32, #tpu.memory_space<smem>>
    %245 = vector.extract_strided_slice %148 {offsets = [0, 3, 4], sizes = [2, 16, 16], strides = [1, 1, 1]} : vector<2x20x20xf32> to vector<2x16x16xf32>
    %246 = vector.broadcast %244 : f32 to vector<2x16x16xf32>
    %247 = arith.mulf %246, %245 : vector<2x16x16xf32>
    %248 = arith.addf %243, %247 : vector<2x16x16xf32>
    %c20 = arith.constant 20 : index
    %249 = memref.load %arg8[%c20] : memref<50xf32, #tpu.memory_space<smem>>
    %250 = vector.extract_strided_slice %148 {offsets = [0, 4, 0], sizes = [2, 16, 16], strides = [1, 1, 1]} : vector<2x20x20xf32> to vector<2x16x16xf32>
    %251 = vector.broadcast %249 : f32 to vector<2x16x16xf32>
    %252 = arith.mulf %251, %250 : vector<2x16x16xf32>
    %253 = arith.addf %248, %252 : vector<2x16x16xf32>
    %c21 = arith.constant 21 : index
    %254 = memref.load %arg8[%c21] : memref<50xf32, #tpu.memory_space<smem>>
    %255 = vector.extract_strided_slice %148 {offsets = [0, 4, 1], sizes = [2, 16, 16], strides = [1, 1, 1]} : vector<2x20x20xf32> to vector<2x16x16xf32>
    %256 = vector.broadcast %254 : f32 to vector<2x16x16xf32>
    %257 = arith.mulf %256, %255 : vector<2x16x16xf32>
    %258 = arith.addf %253, %257 : vector<2x16x16xf32>
    %c22 = arith.constant 22 : index
    %259 = memref.load %arg8[%c22] : memref<50xf32, #tpu.memory_space<smem>>
    %260 = vector.extract_strided_slice %148 {offsets = [0, 4, 2], sizes = [2, 16, 16], strides = [1, 1, 1]} : vector<2x20x20xf32> to vector<2x16x16xf32>
    %261 = vector.broadcast %259 : f32 to vector<2x16x16xf32>
    %262 = arith.mulf %261, %260 : vector<2x16x16xf32>
    %263 = arith.addf %258, %262 : vector<2x16x16xf32>
    %c23 = arith.constant 23 : index
    %264 = memref.load %arg8[%c23] : memref<50xf32, #tpu.memory_space<smem>>
    %265 = vector.extract_strided_slice %148 {offsets = [0, 4, 3], sizes = [2, 16, 16], strides = [1, 1, 1]} : vector<2x20x20xf32> to vector<2x16x16xf32>
    %266 = vector.broadcast %264 : f32 to vector<2x16x16xf32>
    %267 = arith.mulf %266, %265 : vector<2x16x16xf32>
    %268 = arith.addf %263, %267 : vector<2x16x16xf32>
    %c24 = arith.constant 24 : index
    %269 = memref.load %arg8[%c24] : memref<50xf32, #tpu.memory_space<smem>>
    %270 = vector.extract_strided_slice %148 {offsets = [0, 4, 4], sizes = [2, 16, 16], strides = [1, 1, 1]} : vector<2x20x20xf32> to vector<2x16x16xf32>
    %271 = vector.broadcast %269 : f32 to vector<2x16x16xf32>
    %272 = arith.mulf %271, %270 : vector<2x16x16xf32>
    %273 = arith.addf %268, %272 : vector<2x16x16xf32>
    %c1_116 = arith.constant 1 : index
    %c0_117 = arith.constant 0 : index
    %c0_118 = arith.constant 0 : index
    %c0_119 = arith.constant 0 : index
    %274 = vector.load %arg12[%c1_116, %c0_117, %c0_118, %c0_119] : memref<2x2x20x20xf32, #tpu.memory_space<vmem>>, vector<1x2x20x20xf32>
    %275 = vector.shape_cast %274 : vector<1x2x20x20xf32> to vector<2x20x20xf32>
    %c25 = arith.constant 25 : index
    %276 = memref.load %arg8[%c25] : memref<50xf32, #tpu.memory_space<smem>>
    %277 = vector.extract_strided_slice %275 {offsets = [0, 0, 0], sizes = [2, 16, 16], strides = [1, 1, 1]} : vector<2x20x20xf32> to vector<2x16x16xf32>
    %278 = vector.broadcast %276 : f32 to vector<2x16x16xf32>
    %279 = arith.mulf %278, %277 : vector<2x16x16xf32>
    %280 = arith.addf %273, %279 : vector<2x16x16xf32>
    %c26 = arith.constant 26 : index
    %281 = memref.load %arg8[%c26] : memref<50xf32, #tpu.memory_space<smem>>
    %282 = vector.extract_strided_slice %275 {offsets = [0, 0, 1], sizes = [2, 16, 16], strides = [1, 1, 1]} : vector<2x20x20xf32> to vector<2x16x16xf32>
    %283 = vector.broadcast %281 : f32 to vector<2x16x16xf32>
    %284 = arith.mulf %283, %282 : vector<2x16x16xf32>
    %285 = arith.addf %280, %284 : vector<2x16x16xf32>
    %c27 = arith.constant 27 : index
    %286 = memref.load %arg8[%c27] : memref<50xf32, #tpu.memory_space<smem>>
    %287 = vector.extract_strided_slice %275 {offsets = [0, 0, 2], sizes = [2, 16, 16], strides = [1, 1, 1]} : vector<2x20x20xf32> to vector<2x16x16xf32>
    %288 = vector.broadcast %286 : f32 to vector<2x16x16xf32>
    %289 = arith.mulf %288, %287 : vector<2x16x16xf32>
    %290 = arith.addf %285, %289 : vector<2x16x16xf32>
    %c28 = arith.constant 28 : index
    %291 = memref.load %arg8[%c28] : memref<50xf32, #tpu.memory_space<smem>>
    %292 = vector.extract_strided_slice %275 {offsets = [0, 0, 3], sizes = [2, 16, 16], strides = [1, 1, 1]} : vector<2x20x20xf32> to vector<2x16x16xf32>
    %293 = vector.broadcast %291 : f32 to vector<2x16x16xf32>
    %294 = arith.mulf %293, %292 : vector<2x16x16xf32>
    %295 = arith.addf %290, %294 : vector<2x16x16xf32>
    %c29 = arith.constant 29 : index
    %296 = memref.load %arg8[%c29] : memref<50xf32, #tpu.memory_space<smem>>
    %297 = vector.extract_strided_slice %275 {offsets = [0, 0, 4], sizes = [2, 16, 16], strides = [1, 1, 1]} : vector<2x20x20xf32> to vector<2x16x16xf32>
    %298 = vector.broadcast %296 : f32 to vector<2x16x16xf32>
    %299 = arith.mulf %298, %297 : vector<2x16x16xf32>
    %300 = arith.addf %295, %299 : vector<2x16x16xf32>
    %c30 = arith.constant 30 : index
    %301 = memref.load %arg8[%c30] : memref<50xf32, #tpu.memory_space<smem>>
    %302 = vector.extract_strided_slice %275 {offsets = [0, 1, 0], sizes = [2, 16, 16], strides = [1, 1, 1]} : vector<2x20x20xf32> to vector<2x16x16xf32>
    %303 = vector.broadcast %301 : f32 to vector<2x16x16xf32>
    %304 = arith.mulf %303, %302 : vector<2x16x16xf32>
    %305 = arith.addf %300, %304 : vector<2x16x16xf32>
    %c31 = arith.constant 31 : index
    %306 = memref.load %arg8[%c31] : memref<50xf32, #tpu.memory_space<smem>>
    %307 = vector.extract_strided_slice %275 {offsets = [0, 1, 1], sizes = [2, 16, 16], strides = [1, 1, 1]} : vector<2x20x20xf32> to vector<2x16x16xf32>
    %308 = vector.broadcast %306 : f32 to vector<2x16x16xf32>
    %309 = arith.mulf %308, %307 : vector<2x16x16xf32>
    %310 = arith.addf %305, %309 : vector<2x16x16xf32>
    %c32 = arith.constant 32 : index
    %311 = memref.load %arg8[%c32] : memref<50xf32, #tpu.memory_space<smem>>
    %312 = vector.extract_strided_slice %275 {offsets = [0, 1, 2], sizes = [2, 16, 16], strides = [1, 1, 1]} : vector<2x20x20xf32> to vector<2x16x16xf32>
    %313 = vector.broadcast %311 : f32 to vector<2x16x16xf32>
    %314 = arith.mulf %313, %312 : vector<2x16x16xf32>
    %315 = arith.addf %310, %314 : vector<2x16x16xf32>
    %c33 = arith.constant 33 : index
    %316 = memref.load %arg8[%c33] : memref<50xf32, #tpu.memory_space<smem>>
    %317 = vector.extract_strided_slice %275 {offsets = [0, 1, 3], sizes = [2, 16, 16], strides = [1, 1, 1]} : vector<2x20x20xf32> to vector<2x16x16xf32>
    %318 = vector.broadcast %316 : f32 to vector<2x16x16xf32>
    %319 = arith.mulf %318, %317 : vector<2x16x16xf32>
    %320 = arith.addf %315, %319 : vector<2x16x16xf32>
    %c34 = arith.constant 34 : index
    %321 = memref.load %arg8[%c34] : memref<50xf32, #tpu.memory_space<smem>>
    %322 = vector.extract_strided_slice %275 {offsets = [0, 1, 4], sizes = [2, 16, 16], strides = [1, 1, 1]} : vector<2x20x20xf32> to vector<2x16x16xf32>
    %323 = vector.broadcast %321 : f32 to vector<2x16x16xf32>
    %324 = arith.mulf %323, %322 : vector<2x16x16xf32>
    %325 = arith.addf %320, %324 : vector<2x16x16xf32>
    %c35 = arith.constant 35 : index
    %326 = memref.load %arg8[%c35] : memref<50xf32, #tpu.memory_space<smem>>
    %327 = vector.extract_strided_slice %275 {offsets = [0, 2, 0], sizes = [2, 16, 16], strides = [1, 1, 1]} : vector<2x20x20xf32> to vector<2x16x16xf32>
    %328 = vector.broadcast %326 : f32 to vector<2x16x16xf32>
    %329 = arith.mulf %328, %327 : vector<2x16x16xf32>
    %330 = arith.addf %325, %329 : vector<2x16x16xf32>
    %c36 = arith.constant 36 : index
    %331 = memref.load %arg8[%c36] : memref<50xf32, #tpu.memory_space<smem>>
    %332 = vector.extract_strided_slice %275 {offsets = [0, 2, 1], sizes = [2, 16, 16], strides = [1, 1, 1]} : vector<2x20x20xf32> to vector<2x16x16xf32>
    %333 = vector.broadcast %331 : f32 to vector<2x16x16xf32>
    %334 = arith.mulf %333, %332 : vector<2x16x16xf32>
    %335 = arith.addf %330, %334 : vector<2x16x16xf32>
    %c37 = arith.constant 37 : index
    %336 = memref.load %arg8[%c37] : memref<50xf32, #tpu.memory_space<smem>>
    %337 = vector.extract_strided_slice %275 {offsets = [0, 2, 2], sizes = [2, 16, 16], strides = [1, 1, 1]} : vector<2x20x20xf32> to vector<2x16x16xf32>
    %338 = vector.broadcast %336 : f32 to vector<2x16x16xf32>
    %339 = arith.mulf %338, %337 : vector<2x16x16xf32>
    %340 = arith.addf %335, %339 : vector<2x16x16xf32>
    %c38 = arith.constant 38 : index
    %341 = memref.load %arg8[%c38] : memref<50xf32, #tpu.memory_space<smem>>
    %342 = vector.extract_strided_slice %275 {offsets = [0, 2, 3], sizes = [2, 16, 16], strides = [1, 1, 1]} : vector<2x20x20xf32> to vector<2x16x16xf32>
    %343 = vector.broadcast %341 : f32 to vector<2x16x16xf32>
    %344 = arith.mulf %343, %342 : vector<2x16x16xf32>
    %345 = arith.addf %340, %344 : vector<2x16x16xf32>
    %c39 = arith.constant 39 : index
    %346 = memref.load %arg8[%c39] : memref<50xf32, #tpu.memory_space<smem>>
    %347 = vector.extract_strided_slice %275 {offsets = [0, 2, 4], sizes = [2, 16, 16], strides = [1, 1, 1]} : vector<2x20x20xf32> to vector<2x16x16xf32>
    %348 = vector.broadcast %346 : f32 to vector<2x16x16xf32>
    %349 = arith.mulf %348, %347 : vector<2x16x16xf32>
    %350 = arith.addf %345, %349 : vector<2x16x16xf32>
    %c40 = arith.constant 40 : index
    %351 = memref.load %arg8[%c40] : memref<50xf32, #tpu.memory_space<smem>>
    %352 = vector.extract_strided_slice %275 {offsets = [0, 3, 0], sizes = [2, 16, 16], strides = [1, 1, 1]} : vector<2x20x20xf32> to vector<2x16x16xf32>
    %353 = vector.broadcast %351 : f32 to vector<2x16x16xf32>
    %354 = arith.mulf %353, %352 : vector<2x16x16xf32>
    %355 = arith.addf %350, %354 : vector<2x16x16xf32>
    %c41 = arith.constant 41 : index
    %356 = memref.load %arg8[%c41] : memref<50xf32, #tpu.memory_space<smem>>
    %357 = vector.extract_strided_slice %275 {offsets = [0, 3, 1], sizes = [2, 16, 16], strides = [1, 1, 1]} : vector<2x20x20xf32> to vector<2x16x16xf32>
    %358 = vector.broadcast %356 : f32 to vector<2x16x16xf32>
    %359 = arith.mulf %358, %357 : vector<2x16x16xf32>
    %360 = arith.addf %355, %359 : vector<2x16x16xf32>
    %c42 = arith.constant 42 : index
    %361 = memref.load %arg8[%c42] : memref<50xf32, #tpu.memory_space<smem>>
    %362 = vector.extract_strided_slice %275 {offsets = [0, 3, 2], sizes = [2, 16, 16], strides = [1, 1, 1]} : vector<2x20x20xf32> to vector<2x16x16xf32>
    %363 = vector.broadcast %361 : f32 to vector<2x16x16xf32>
    %364 = arith.mulf %363, %362 : vector<2x16x16xf32>
    %365 = arith.addf %360, %364 : vector<2x16x16xf32>
    %c43 = arith.constant 43 : index
    %366 = memref.load %arg8[%c43] : memref<50xf32, #tpu.memory_space<smem>>
    %367 = vector.extract_strided_slice %275 {offsets = [0, 3, 3], sizes = [2, 16, 16], strides = [1, 1, 1]} : vector<2x20x20xf32> to vector<2x16x16xf32>
    %368 = vector.broadcast %366 : f32 to vector<2x16x16xf32>
    %369 = arith.mulf %368, %367 : vector<2x16x16xf32>
    %370 = arith.addf %365, %369 : vector<2x16x16xf32>
    %c44 = arith.constant 44 : index
    %371 = memref.load %arg8[%c44] : memref<50xf32, #tpu.memory_space<smem>>
    %372 = vector.extract_strided_slice %275 {offsets = [0, 3, 4], sizes = [2, 16, 16], strides = [1, 1, 1]} : vector<2x20x20xf32> to vector<2x16x16xf32>
    %373 = vector.broadcast %371 : f32 to vector<2x16x16xf32>
    %374 = arith.mulf %373, %372 : vector<2x16x16xf32>
    %375 = arith.addf %370, %374 : vector<2x16x16xf32>
    %c45 = arith.constant 45 : index
    %376 = memref.load %arg8[%c45] : memref<50xf32, #tpu.memory_space<smem>>
    %377 = vector.extract_strided_slice %275 {offsets = [0, 4, 0], sizes = [2, 16, 16], strides = [1, 1, 1]} : vector<2x20x20xf32> to vector<2x16x16xf32>
    %378 = vector.broadcast %376 : f32 to vector<2x16x16xf32>
    %379 = arith.mulf %378, %377 : vector<2x16x16xf32>
    %380 = arith.addf %375, %379 : vector<2x16x16xf32>
    %c46 = arith.constant 46 : index
    %381 = memref.load %arg8[%c46] : memref<50xf32, #tpu.memory_space<smem>>
    %382 = vector.extract_strided_slice %275 {offsets = [0, 4, 1], sizes = [2, 16, 16], strides = [1, 1, 1]} : vector<2x20x20xf32> to vector<2x16x16xf32>
    %383 = vector.broadcast %381 : f32 to vector<2x16x16xf32>
    %384 = arith.mulf %383, %382 : vector<2x16x16xf32>
    %385 = arith.addf %380, %384 : vector<2x16x16xf32>
    %c47 = arith.constant 47 : index
    %386 = memref.load %arg8[%c47] : memref<50xf32, #tpu.memory_space<smem>>
    %387 = vector.extract_strided_slice %275 {offsets = [0, 4, 2], sizes = [2, 16, 16], strides = [1, 1, 1]} : vector<2x20x20xf32> to vector<2x16x16xf32>
    %388 = vector.broadcast %386 : f32 to vector<2x16x16xf32>
    %389 = arith.mulf %388, %387 : vector<2x16x16xf32>
    %390 = arith.addf %385, %389 : vector<2x16x16xf32>
    %c48 = arith.constant 48 : index
    %391 = memref.load %arg8[%c48] : memref<50xf32, #tpu.memory_space<smem>>
    %392 = vector.extract_strided_slice %275 {offsets = [0, 4, 3], sizes = [2, 16, 16], strides = [1, 1, 1]} : vector<2x20x20xf32> to vector<2x16x16xf32>
    %393 = vector.broadcast %391 : f32 to vector<2x16x16xf32>
    %394 = arith.mulf %393, %392 : vector<2x16x16xf32>
    %395 = arith.addf %390, %394 : vector<2x16x16xf32>
    %c49 = arith.constant 49 : index
    %396 = memref.load %arg8[%c49] : memref<50xf32, #tpu.memory_space<smem>>
    %397 = vector.extract_strided_slice %275 {offsets = [0, 4, 4], sizes = [2, 16, 16], strides = [1, 1, 1]} : vector<2x20x20xf32> to vector<2x16x16xf32>
    %398 = vector.broadcast %396 : f32 to vector<2x16x16xf32>
    %399 = arith.mulf %398, %397 : vector<2x16x16xf32>
    %400 = arith.addf %395, %399 : vector<2x16x16xf32>
    %401 = arith.negf %400 : vector<2x16x16xf32>
    %402 = math.exp %401 : vector<2x16x16xf32>
    %cst_120 = arith.constant 1.000000e+00 : f32
    %403 = vector.broadcast %cst_120 : f32 to vector<2x16x16xf32>
    %404 = arith.addf %403, %402 : vector<2x16x16xf32>
    %405 = arith.divf %403, %404 : vector<2x16x16xf32>
    %406 = vector.shape_cast %405 : vector<2x16x16xf32> to vector<32x16xf32>
    %c0_121 = arith.constant 0 : index
    %c0_122 = arith.constant 0 : index
    %407 = vector.load %arg7[%c0_121, %c0_122] : memref<16x128xf32, #tpu.memory_space<vmem>>, vector<16x128xf32>
    %cst_123 = arith.constant dense<0.000000e+00> : vector<32x128xf32>
    %408 = tpu.matmul %406, %407, %cst_123 {dimension_numbers = #tpu.dot_dimension_numbers<[1], [0], [0], [1], [0, 0, 1, 1], [], []>} : vector<32x16xf32>, vector<16x128xf32>, vector<32x128xf32> -> vector<32x128xf32>
    %409 = arith.mulf %110, %408 : vector<32x128xf32>
    %cst_124 = arith.constant 0.000000e+00 : f32
    %410 = vector.broadcast %cst_124 : f32 to vector<32x128xf32>
    %411 = arith.cmpf oge, %409, %410 : vector<32x128xf32>
    %cst_125 = arith.constant 2.000000e-01 : f32
    %412 = vector.broadcast %cst_125 : f32 to vector<32x128xf32>
    %413 = arith.mulf %412, %409 : vector<32x128xf32>
    %414 = arith.select %411, %409, %413 : vector<32x128xi1>, vector<32x128xf32>
    %c0_126 = arith.constant 0 : index
    %c0_127 = arith.constant 0 : index
    %415 = vector.load %arg9[%c0_126, %c0_127] : memref<32x128xf32, #tpu.memory_space<vmem>>, vector<32x128xf32>
    tpu.vector_store %arg9[%c0_126, %c0_127], %414 {strides = array<i32>} : memref<32x128xf32, #tpu.memory_space<vmem>>, vector<32x128xf32>,
    return
  }
  func.func @transform_0(%arg0: i32) -> (i32, i32, i32) {
    %c0_i32 = arith.constant 0 : i32
    %c0_i32_0 = arith.constant 0 : i32
    %c0_i32_1 = arith.constant 0 : i32
    %c0_i32_2 = arith.constant 0 : i32
    return %c0_i32, %c0_i32_0, %c0_i32_1 : i32, i32, i32
  }
  func.func @transform_1(%arg0: i32) -> (i32, i32) {
    %c0_i32 = arith.constant 0 : i32
    %c0_i32_0 = arith.constant 0 : i32
    %c0_i32_1 = arith.constant 0 : i32
    return %c0_i32, %c0_i32_0 : i32, i32
  }
  func.func @transform_2(%arg0: i32) -> (i32, i32) {
    %c0_i32 = arith.constant 0 : i32
    %c0_i32_0 = arith.constant 0 : i32
    %c0_i32_1 = arith.constant 0 : i32
    return %c0_i32, %c0_i32_0 : i32, i32
  }
  func.func @transform_3(%arg0: i32) -> (i32, i32) {
    %c0_i32 = arith.constant 0 : i32
    %c0_i32_0 = arith.constant 0 : i32
    %c0_i32_1 = arith.constant 0 : i32
    return %c0_i32, %c0_i32_0 : i32, i32
  }
  func.func @transform_4(%arg0: i32) -> (i32, i32) {
    %c0_i32 = arith.constant 0 : i32
    %c0_i32_0 = arith.constant 0 : i32
    %c0_i32_1 = arith.constant 0 : i32
    return %c0_i32, %c0_i32_0 : i32, i32
  }
  func.func @transform_5(%arg0: i32) -> (i32, i32) {
    %c0_i32 = arith.constant 0 : i32
    %c0_i32_0 = arith.constant 0 : i32
    %c0_i32_1 = arith.constant 0 : i32
    return %c0_i32, %c0_i32_0 : i32, i32
  }
  func.func @transform_6(%arg0: i32) -> (i32, i32) {
    %c0_i32 = arith.constant 0 : i32
    %c0_i32_0 = arith.constant 0 : i32
    %c0_i32_1 = arith.constant 0 : i32
    return %c0_i32, %c0_i32_0 : i32, i32
  }
  func.func @transform_7(%arg0: i32) -> i32 {
    %c0_i32 = arith.constant 0 : i32
    %c0_i32_0 = arith.constant 0 : i32
    return %c0_i32 : i32
  }
  func.func @transform_8(%arg0: i32) -> (i32, i32) {
    %c0_i32 = arith.constant 0 : i32
    %c0_i32_0 = arith.constant 0 : i32
    %c0_i32_1 = arith.constant 0 : i32
    return %c0_i32, %c0_i32_0 : i32, i32
  }
}

</mosaic_0001>

<bundles_post_ra>
// kernel: tpu_custom_call.1
= control target key start
LH: loop header
LB: loop body
LE: loop exit
PB: predicated region body
PF: predicated region fallthrough
CT: control target
= control target key end

     0   :  { %13 = vsyncpa [#allocation6], 0  ;;  %s5467_s0 = inlined_call_operand.vmem [shape: f32[2,16,64], index: 0, kind: input, shape index: {}]   ;;  %s5468_s1 = inlined_call_operand.hbm [shape: f32[576,128], index: 1, kind: input, shape index: {}]   ;;  %s5469_s2 = inlined_call_operand.vmem [shape: f32[1,128], index: 2, kind: input, shape index: {}]   ;;  %s5470_s3 = inlined_call_operand.vmem [shape: f32[128,8], index: 3, kind: input, shape index: {}]   ;;  %s5471_s4 = inlined_call_operand.vmem [shape: f32[8,8], index: 4, kind: input, shape index: {}]   ;;  %s5472_s5 = inlined_call_operand.vmem [shape: f32[8,128], index: 5, kind: input, shape index: {}]   ;;  %s5473_s6 = inlined_call_operand.vmem [shape: f32[16,128], index: 6, kind: input, shape index: {}]   ;;  %s5474_s7 = inlined_call_operand.vmem [shape: f32[50], index: 7, kind: input, shape index: {}]   ;;  %s5475_s8 = inlined_call_operand.hbm [shape: f32[32,128], index: 8, kind: output, shape index: {}]  }
   0x1   :  { %14 = vsyncpa [#allocation8], 0 }
   0x2   :  { %15 = vsyncpa [#allocation7], 0  ;;  %s3620_s27 = smov [#allocation5]   ;;  %s46_s9 = sshll.u32 %s5474_s7, 4  ;;  %s47_s9 = int_to_ptr.vmem [resolvable:$true] %s46_s9 }
   0x3   :  { %s23_s28 = sshll.u32 %s3620_s27, 4  ;;  %s3558_s12 = scalar_lea.hbm %s5468_s1, 9216  ;;  %s24_s28 = int_to_ptr.vmem [resolvable:$true] %s23_s28 }
   0x4   :  { %p3559_p0 = scmp.ne.s32.totalorder %s5468_s1, %s3558_s12  ;;  %p3562_p1 = scmp.lt.u32.totalorder %s3558_s12, %s5468_s1 }
   0x6   :  { %p3564_p2 = pnand %p3562_p1, %p3559_p0 }
   0x8   :  { %3567 = shalt.err (!%p3564_p2)
}
   0x9   :  { %s3568_s17 = scalar_lea.vmem %s24_s28, 9216  ;;  %p3573_p4 = scmp.lt.s32.totalorder %s24_s28, %s24_s28 }
   0xa   :  { %p3569_p3 = scmp.ne.s32.totalorder %s24_s28, %s3568_s17  ;;  %p3574_p5 = scmp.lt.s32.totalorder %s3568_s17, %s3568_s17 }
   0xc   :  { %p3575_p6 = por %p3574_p5, %p3573_p4 }
   0xe   :  { %p3576_p7 = pnand %p3575_p6, %p3569_p3 }
  0x10   :  { %3579 = shalt.err (!%p3576_p7)
}
  0x11   :  { %s3621_s7 = smov 128   ;;  %s3622_s18 = smov 8  }
  0x12   :  { %29 = dma.hbm_to_vmem [thread:$0]  %s5468_s1, 9216, %s24_s28, [#allocation6], %s3621_s7, %s3621_s7, %s3622_s18  }
  0x13   :  { %s3580_s21 = scalar_lea.vmem %s47_s9, 16  ;;  %p3585_p9 = scmp.lt.s32.totalorder %s47_s9, %s47_s9 }
  0x14   :  { %p3581_p8 = scmp.ne.s32.totalorder %s47_s9, %s3580_s21  ;;  %p3586_p10 = scmp.lt.s32.totalorder %s3580_s21, %s3580_s21 }
  0x16   :  { %p3587_p11 = por %p3586_p10, %p3585_p9 }
  0x18   :  { %p3588_p12 = pnand %p3587_p11, %p3581_p8 }
  0x1a   :  { %3591 = shalt.err (!%p3588_p12)
}
  0x1b   :  { %s3623_s22 = smov [#allocation9]  }
  0x1c   :  { %49 = dma.vmem_to_smem %s47_s9, 16, %s3623_s22, [#allocation8]  }
  0x1d   :  { %3614 = dma.done.wait [#allocation6], 9216  }
  0x1e   :  { %3615 = vsyncadd [#allocation6], 4294958080 }
  0x1f   :  { %3616 = dma.done.wait [#allocation8], 16  }
  0x20   :  { %3617 = vsyncadd [#allocation8], 4294967280 }
  0x21   :  { %56 = sfence }
  0x22   :  { %v65_v0 = vld [vmem:[%s5467_s0] sm:$0xff]  ;;  %v67_v1 = vld [vmem:[%s5467_s0 + $0x10] sm:$0xff]  ;;  %vm57_vm0 = vcmask 654336   ;;  %v3624_v2 = vmov 0.0   ;;  %vm60_vm1 = vcmask 650240   ;;  %v66_v3 = vld [vmem:[%s5467_s0 + $0x8] sm:$0xff] }
  0x23   :  { %73 = vrot.lane.b32.xlu0 %v65_v0, %s3622_s18  ;;  %77 = vrot.lane.b32.xlu1 %v67_v1, %s3622_s18  ;;  %58 = vst.msk [vmem:[#allocation2] sm:$0xff] %vm57_vm0, %v3624_v2  ;;  %59 = vst.msk [vmem:[#allocation2 + $0x8] sm:$0xff] %vm57_vm0, %v3624_v2  ;;  %v68_v4 = vld [vmem:[%s5467_s0 + $0x18] sm:$0xff]  ;;  %v312_v5 = vld [vmem:[#allocation5 + $0x80] sm:$0xff]  ;;  %vm85_vm2 = vcmask 588864   ;;  %vm94_vm3 = vcmask 523264  }
  0x24   :  { %62 = vst.msk [vmem:[#allocation2 + $0x18] sm:$0xff] %vm57_vm0, %v3624_v2  ;;  %63 = vst.msk [vmem:[#allocation2 + $0x20] sm:$0xff] %vm57_vm0, %v3624_v2  ;;  %v313_v6 = vld [vmem:[#allocation5 + $0x88] sm:$0xff]  ;;  %v296_v7 = vld [vmem:[#allocation5] sm:$0xff]  ;;  %s3625_s0 = smov 64   ;;  %s3626_s30 = smov 112  }
  0x25   :  { %61 = vst.msk [vmem:[#allocation2 + $0x10] sm:$0xf] %vm60_vm1, %v3624_v2  ;;  %64 = vst.msk [vmem:[#allocation2 + $0x28] sm:$0xf] %vm60_vm1, %v3624_v2  ;;  %v3389_v8 = vpack.c.bf16 %v313_v6, %v312_v5  ;;  %v297_v9 = vld [vmem:[#allocation5 + $0x8] sm:$0xff]  ;;  %v314_v10 = vld [vmem:[#allocation5 + $0x90] sm:$0xff] }
  0x26   :  { %v315_v11 = vld [vmem:[#allocation5 + $0x98] sm:$0xff]  ;;  %v3391_v12 = vpack.c.bf16 %v297_v9, %v296_v7  ;;  %v298_v14 = vld [vmem:[#allocation5 + $0x10] sm:$0xff]  ;;  %v316_v16 = vld [vmem:[#allocation5 + $0xa0] sm:$0xff]  ;;  %s3627_s9 = smov 56   ;;  %s3628_s10 = smov 120   ;;  %vm119_vm4 = vcmask 1048064  }
  0x27   :  { %75 = vrot.lane.b32.xlu0 %v66_v3, %s3622_s18  ;;  %79 = vrot.lane.b32.xlu1 %v68_v4, %s3622_s18  ;;  %v3393_v13 = vpack.c.bf16 %v315_v11, %v314_v10  ;;  %v299_v15 = vld [vmem:[#allocation5 + $0x18] sm:$0xff]  ;;  %v317_v17 = vld [vmem:[#allocation5 + $0xa8] sm:$0xff]  ;;  %v300_v19 = vld [vmem:[#allocation5 + $0x20] sm:$0xff]  ;;  %s3629_s11 = smov 48   ;;  %vm3631_vm5 = vmmov 0   ;;  %vm692_vm6 = vcmask 1041409  }
  0x28   :  { %3390 = vmatprep.subr.bf16.mxu0 %v3389_v8  ;;  %v3395_v18 = vpack.c.bf16 %v299_v15, %v298_v14  ;;  %v344_v20 = vld [vmem:[#allocation5 + $0x180] sm:$0xff]  ;;  %v3397_v21 = vpack.c.bf16 %v317_v17, %v316_v16  ;;  %v301_v22 = vld [vmem:[#allocation5 + $0x28] sm:$0xff]  ;;  %v318_v23 = vld [vmem:[#allocation5 + $0xb0] sm:$0xff]  ;;  %vm779_vm7 = vcmask 255104   ;;  %vm695_vm8 = vcmask 123904   ;;  %s3634_s22 = smov 80  }
  0x29   :  { %3392 = vmatpush3.bf16.msra.mxu0 %v3391_v12  ;;  %v345_v24 = vld [vmem:[#allocation5 + $0x188] sm:$0xff]  ;;  %v319_v25 = vld [vmem:[#allocation5 + $0xb8] sm:$0xff]  ;;  %v328_v27 = vld [vmem:[#allocation5 + $0x100] sm:$0xff]  ;;  %v3399_v32 = vpack.c.bf16 %v301_v22, %v300_v19  ;;  %vm812_vm9 = vcmask 648704   ;;  %vm790_vm10 = vcmask 386304   ;;  %vm834_vm11 = vcmask 911104  }
  0x2a   :  { %3394 = vmatprep.subr.bf16.mxu0 %v3393_v13  ;;  %v3421_v26 = vpack.c.bf16 %v345_v24, %v344_v20  ;;  %v329_v28 = vld [vmem:[#allocation5 + $0x108] sm:$0xff]  ;;  %v346_v30 = vld [vmem:[#allocation5 + $0x190] sm:$0xff]  ;;  %v347_v31 = vld [vmem:[#allocation5 + $0x198] sm:$0xff]  ;;  %v3401_v35 = vpack.c.bf16 %v319_v25, %v318_v23  ;;  %vm801_vm12 = vcmask 517504   ;;  %vm823_vm13 = vcmask 779904   ;;  %s3636_s23 = smov 16  }
  0x2b   :  { %v3423_v29 = vpack.c.bf16 %v329_v28, %v328_v27  ;;  %v3425_v33 = vpack.c.bf16 %v347_v31, %v346_v30  ;;  %v330_v34 = vld [vmem:[#allocation5 + $0x110] sm:$0xff]  ;;  %v303_v37 = vld [vmem:[#allocation5 + $0x38] sm:$0xff]  ;;  %v320_v39 = vld [vmem:[#allocation5 + $0xc0] sm:$0xff]  ;;  %vm845_vm14 = vcmask 1042304   ;;  %vm863_vm15 = vcmask 64512   ;;  %s3160_s24 = sld [smem:[#allocation9 + $0x1a]] }
  0x2c   :  { %3422 = vmatprep.subr.bf16.mxu1 %v3421_v26  ;;  %v302_v36 = vld [vmem:[#allocation5 + $0x30] sm:$0xff]  ;;  %v331_v38 = vld [vmem:[#allocation5 + $0x118] sm:$0xff]  ;;  %v321_v40 = vld [vmem:[#allocation5 + $0xc8] sm:$0xff]  ;;  %vm1122_vm0 = vcmask 162816   ;;  %vm1125_vm1 = vcmask 158720   ;;  %s3135_s1 = sld [smem:[#allocation9 + $0x1]] }
  0x2d   :  { %3396 = vmatpush3.bf16.msra.mxu0 %v3395_v18  ;;  %3424 = vmatpush3.bf16.msra.mxu1 %v3423_v29  ;;  %v3427_v41 = vpack.c.bf16 %v331_v38, %v330_v34  ;;  %v3403_v42 = vpack.c.bf16 %v303_v37, %v302_v36  ;;  %v3405_v43 = vpack.c.bf16 %v321_v40, %v320_v39  ;;  %v304_v44 = vld [vmem:[#allocation5 + $0x40] sm:$0xff]  ;;  %v305_v45 = vld [vmem:[#allocation5 + $0x48] sm:$0xff]  ;;  %v322_v47 = vld [vmem:[#allocation5 + $0xd0] sm:$0xff]  ;;  %s3136_s25 = sld [smem:[#allocation9 + $0x2]]  ;;  %s3639_s26 = smov 127  }
  0x2e   :  { %3398 = vmatprep.subr.bf16.mxu0 %v3397_v21  ;;  %3426 = vmatprep.subr.bf16.mxu1 %v3425_v33  ;;  %v3407_v46 = vpack.c.bf16 %v305_v45, %v304_v44  ;;  %v323_v48 = vld [vmem:[#allocation5 + $0xd8] sm:$0xff]  ;;  %v348_v49 = vld [vmem:[#allocation5 + $0x1a0] sm:$0xff]  ;;  %v349_v51 = vld [vmem:[#allocation5 + $0x1a8] sm:$0xff]  ;;  %1130 = vst.msk [vmem:[#allocation4 + $0x30] sm:$0xff] %vm1122_vm0, %v3624_v2  ;;  %s3163_s27 = sld [smem:[#allocation9 + $0x1d]]  ;;  %s3640_s28 = smov 125  }
  0x2f   :  { %v3409_v50 = vpack.c.bf16 %v323_v48, %v322_v47  ;;  %v306_v52 = vld [vmem:[#allocation5 + $0x50] sm:$0xff]  ;;  %v307_v53 = vld [vmem:[#allocation5 + $0x58] sm:$0xff]  ;;  %v3429_v54 = vpack.c.bf16 %v349_v51, %v348_v49  ;;  %v332_v56 = vld [vmem:[#allocation5 + $0x120] sm:$0xff]  ;;  %1131 = vst.msk [vmem:[#allocation4 + $0x38] sm:$0xff] %vm1122_vm0, %v3624_v2  ;;  %s3641_s29 = smov 124   ;;  %s3138_s12 = sld [smem:[#allocation9 + $0x4]] }
  0x30   :  { %v3411_v55 = vpack.c.bf16 %v307_v53, %v306_v52  ;;  %v333_v57 = vld [vmem:[#allocation5 + $0x128] sm:$0xff]  ;;  %v324_v59 = vld [vmem:[#allocation5 + $0xe0] sm:$0xff]  ;;  %v350_v61 = vld [vmem:[#allocation5 + $0x1b0] sm:$0xff]  ;;  %1123 = vst.msk [vmem:[#allocation4] sm:$0xff] %vm1122_vm0, %v3624_v2  ;;  %s3165_s13 = sld [smem:[#allocation9 + $0x1f]]  ;;  %s3146_s14 = sld [smem:[#allocation9 + $0xc]] }
  0x31   :  { %3400 = vmatpush3.bf16.msra.mxu0 %v3399_v32  ;;  %3428 = vmatpush3.bf16.msra.mxu1 %v3427_v41  ;;  %v3431_v58 = vpack.c.bf16 %v333_v57, %v332_v56  ;;  %v325_v60 = vld [vmem:[#allocation5 + $0xe8] sm:$0xff]  ;;  %v351_v63 = vld [vmem:[#allocation5 + $0x1b8] sm:$0xff]  ;;  %v308_v0 = vld [vmem:[#allocation5 + $0x60] sm:$0xff]  ;;  %1124 = vst.msk [vmem:[#allocation4 + $0x8] sm:$0xff] %vm1122_vm0, %v3624_v2  ;;  %s3167_s15 = sld [smem:[#allocation9 + $0x21]]  ;;  %s3168_s16 = sld [smem:[#allocation9 + $0x22]] }
  0x32   :  { %3402 = vmatprep.subr.bf16.mxu0 %v3401_v35  ;;  %3430 = vmatprep.subr.bf16.mxu1 %v3429_v54  ;;  %v3413_v62 = vpack.c.bf16 %v325_v60, %v324_v59  ;;  %v309_v1 = vld [vmem:[#allocation5 + $0x68] sm:$0xff]  ;;  %v3433_v3 = vpack.c.bf16 %v351_v63, %v350_v61  ;;  %v334_v5 = vld [vmem:[#allocation5 + $0x130] sm:$0xff]  ;;  %v335_v6 = vld [vmem:[#allocation5 + $0x138] sm:$0xff]  ;;  %1127 = vst.msk [vmem:[#allocation4 + $0x18] sm:$0xff] %vm1122_vm0, %v3624_v2  ;;  %s3141_s17 = sld [smem:[#allocation9 + $0x7]]  ;;  %s3170_s19 = sld [smem:[#allocation9 + $0x24]] }
  0x33   :  { %v3415_v4 = vpack.c.bf16 %v309_v1, %v308_v0  ;;  %v3435_v9 = vpack.c.bf16 %v335_v6, %v334_v5  ;;  %v326_v10 = vld [vmem:[#allocation5 + $0xf0] sm:$0xff]  ;;  %v327_v11 = vld [vmem:[#allocation5 + $0xf8] sm:$0xff]  ;;  %v352_v12 = vld [vmem:[#allocation5 + $0x1c0] sm:$0xff]  ;;  %1128 = vst.msk [vmem:[#allocation4 + $0x20] sm:$0xff] %vm1122_vm0, %v3624_v2  ;;  %s3151_s20 = sld [smem:[#allocation9 + $0x11]]  ;;  %s3156_s21 = sld [smem:[#allocation9 + $0x16]] }
  0x34   :  { %v3417_v13 = vpack.c.bf16 %v327_v11, %v326_v10  ;;  %v353_v14 = vld [vmem:[#allocation5 + $0x1c8] sm:$0xff]  ;;  %v310_v15 = vld [vmem:[#allocation5 + $0x70] sm:$0xff]  ;;  %v311_v16 = vld [vmem:[#allocation5 + $0x78] sm:$0xff]  ;;  %1133 = vst.msk [vmem:[#allocation4 + $0x48] sm:$0xff] %vm1122_vm0, %v3624_v2 }
  0x35   :  { %3404 = vmatpush3.bf16.msra.mxu0 %v3403_v42  ;;  %3432 = vmatpush3.bf16.msra.mxu1 %v3431_v58  ;;  %v3437_v17 = vpack.c.bf16 %v353_v14, %v352_v12  ;;  %v3419_v18 = vpack.c.bf16 %v311_v16, %v310_v15  ;;  %v336_v19 = vld [vmem:[#allocation5 + $0x140] sm:$0xff]  ;;  %v337_v20 = vld [vmem:[#allocation5 + $0x148] sm:$0xff]  ;;  %v354_v24 = vld [vmem:[#allocation5 + $0x1d0] sm:$0xff]  ;;  %1134 = vst.msk [vmem:[#allocation4 + $0x50] sm:$0xff] %vm1122_vm0, %v3624_v2 }
  0x36   :  { %3406 = vmatprep.subr.bf16.mxu0 %v3405_v43  ;;  %3434 = vmatprep.subr.bf16.mxu1 %v3433_v3  ;;  %v3439_v23 = vpack.c.bf16 %v337_v20, %v336_v19  ;;  %v355_v25 = vld [vmem:[#allocation5 + $0x1d8] sm:$0xff]  ;;  %v338_v27 = vld [vmem:[#allocation5 + $0x150] sm:$0xff]  ;;  %v356_v33 = vld [vmem:[#allocation5 + $0x1e0] sm:$0xff]  ;;  %1132 = vst.msk [vmem:[#allocation4 + $0x40] sm:$0xf] %vm1125_vm1, %v3624_v2 }
  0x37   :  { %v3441_v26 = vpack.c.bf16 %v355_v25, %v354_v24  ;;  %v339_v28 = vld [vmem:[#allocation5 + $0x158] sm:$0xff]  ;;  %v357_v34 = vld [vmem:[#allocation5 + $0x1e8] sm:$0xff]  ;;  %v340_v36 = vld [vmem:[#allocation5 + $0x160] sm:$0xff]  ;;  %1126 = vst.msk [vmem:[#allocation4 + $0x10] sm:$0xf] %vm1125_vm1, %v3624_v2 }
  0x38   :  { %v3443_v29 = vpack.c.bf16 %v339_v28, %v338_v27  ;;  %v3445_v35 = vpack.c.bf16 %v357_v34, %v356_v33  ;;  %v341_v37 = vld [vmem:[#allocation5 + $0x168] sm:$0xff]  ;;  %v358_v45 = vld [vmem:[#allocation5 + $0x1f0] sm:$0xff]  ;;  %v343_v48 = vld [vmem:[#allocation5 + $0x178] sm:$0xff]  ;;  %1129 = vst.msk [vmem:[#allocation4 + $0x28] sm:$0xf] %vm1125_vm1, %v3624_v2 }
  0x39   :  { %3408 = vmatpush3.bf16.msra.mxu0 %v3407_v46  ;;  %3436 = vmatpush3.bf16.msra.mxu1 %v3435_v9  ;;  %v3447_v38 = vpack.c.bf16 %v341_v37, %v340_v36  ;;  %v359_v46 = vld [vmem:[#allocation5 + $0x1f8] sm:$0xff]  ;;  %v342_v47 = vld [vmem:[#allocation5 + $0x170] sm:$0xff]  ;;  %v360_v53 = vld [vmem:[#allocation5 + $0x200] sm:$0xff]  ;;  %1135 = vst.msk [vmem:[#allocation4 + $0x58] sm:$0xf] %vm1125_vm1, %v3624_v2 }
  0x3a   :  { %3410 = vmatprep.subr.bf16.mxu0 %v3409_v50  ;;  %3438 = vmatprep.subr.bf16.mxu1 %v3437_v17  ;;  %v3449_v50 = vpack.c.bf16 %v359_v46, %v358_v45  ;;  %v3451_v51 = vpack.c.bf16 %v343_v48, %v342_v47  ;;  %v361_v54 = vld [vmem:[#allocation5 + $0x208] sm:$0xff]  ;;  %v362_v63 = vld [vmem:[#allocation5 + $0x210] sm:$0xff]  ;;  %v363_v0 = vld [vmem:[#allocation5 + $0x218] sm:$0xff] }
  0x3b   :  { %v3457_v3 = vpack.c.bf16 %v363_v0, %v362_v63  ;;  %v367_v14 = vld [vmem:[#allocation5 + $0x238] sm:$0xff]  ;;  %v682_v0 = vld [vmem:[%s5470_s3 + $0x40] sm:$0xff] }
  0x3d   :  { %3412 = vmatpush3.bf16.msra.mxu0 %v3411_v55  ;;  %3440 = vmatpush3.bf16.msra.mxu1 %v3439_v23  ;;  %v3453_v55 = vpack.c.bf16 %v361_v54, %v360_v53  ;;  %v3630_v54 = vmov 0.0|0.0  }
  0x3e   :  { %3414 = vmatprep.subr.bf16.mxu0 %v3413_v62  ;;  %3442 = vmatprep.subr.bf16.mxu1 %v3441_v26 }
  0x41   :  { %3416 = vmatpush3.bf16.msra.mxu0 %v3415_v4  ;;  %3444 = vmatpush3.bf16.msra.mxu1 %v3443_v29 }
  0x42   :  { %3418 = vmatprep.subr.bf16.mxu0 %v3417_v13  ;;  %3446 = vmatprep.subr.bf16.mxu1 %v3445_v35  ;;  %v366_v13 = vld [vmem:[#allocation5 + $0x230] sm:$0xff] }
  0x43   :  { %v3465_v15 = vpack.c.bf16 %v367_v14, %v366_v13 }
  0x45   :  { %3420 = vmatpush3.bf16.msra.mxu0 %v3419_v18  ;;  %3448 = vmatpush3.bf16.msra.mxu1 %v3447_v38 }
  0x46   :  { %3450 = vmatprep.subr.bf16.mxu1 %v3449_v50  ;;  %3454 = vmatprep.subr.bf16.mxu0 %v3453_v55 }
  0x49   :  { %3452 = vmatpush3.bf16.msra.mxu1 %v3451_v51  ;;  %v674_v51 = vld [vmem:[%s5470_s3] sm:$0xff] }
  0x4a   :  { %3469 = vmatprep.subr.bf16.mxu1 %v3630_v54 }
  0x95   :  { %v74_v7 = vpop.permute.xlu0 %73  ;;  %v78_v8 = vpop.permute.xlu1 %77 }
  0x96   :  { %86 = vst.msk [vmem:[#allocation2 + $0x2] sm:$0xff] %vm85_vm2, %v74_v7  ;;  %88 = vst.msk [vmem:[#allocation2 + $0x1a] sm:$0xff] %vm85_vm2, %v78_v8  ;;  %v364_v7 = vld [vmem:[#allocation5 + $0x220] sm:$0xff]  ;;  %v365_v8 = vld [vmem:[#allocation5 + $0x228] sm:$0xff] }
  0x97   :  { %v3461_v9 = vpack.c.bf16 %v365_v8, %v364_v7  ;;  %v686_v7 = vld [vmem:[%s5470_s3 + $0x60] sm:$0xff]  ;;  %v687_v8 = vld [vmem:[%s5470_s3 + $0x68] sm:$0xff] }
  0x99   :  { %v76_v21 = vpop.permute.xlu0 %75  ;;  %v80_v22 = vpop.permute.xlu1 %79 }
  0x9a   :  { %87 = vst.msk [vmem:[#allocation2 + $0xa] sm:$0xff] %vm85_vm2, %v76_v21  ;;  %89 = vst.msk [vmem:[#allocation2 + $0x22] sm:$0xff] %vm85_vm2, %v80_v22  ;;  %vm1152_vm2 = vcmask 146448  }
  0x9d   :  { %v148_v30 = vld [vmem:[#allocation2 + $0x2] sm:$0xff]  ;;  %v126_v32 = vld [vmem:[#allocation2 + $0x18] sm:$0xff] }
  0x9e   :  { %v124_v31 = vld [vmem:[#allocation2] sm:$0xff]  ;;  %156 = vrot.lane.b32.xlu1 %v148_v30, %s3625_s0  ;;  %97 = vst.msk [vmem:[#allocation3 + $0x50] sm:$0xff] %vm94_vm3, %v126_v32 }
  0x9f   :  { %132 = vrot.lane.b32.xlu0 %v124_v31, %s3626_s30  ;;  %95 = vst.msk [vmem:[#allocation3] sm:$0xff] %vm94_vm3, %v124_v31  ;;  %v150_v52 = vld [vmem:[#allocation2 + $0x1a] sm:$0xff] }
  0xa1   :  { %v125_v39 = vld [vmem:[#allocation2 + $0x8] sm:$0xff]  ;;  %v127_v42 = vld [vmem:[#allocation2 + $0x20] sm:$0xff] }
  0xa2   :  { %v228_v40 = vld [vmem:[#allocation2 + $0x4] sm:$0xff]  ;;  %134 = vrot.lane.b32.xlu1 %v125_v39, %s3626_s30  ;;  %v229_v41 = vld [vmem:[#allocation2 + $0xc] sm:$0xff]  ;;  %96 = vst.msk [vmem:[#allocation3 + $0x28] sm:$0xff] %vm94_vm3, %v125_v39  ;;  %v230_v43 = vld [vmem:[#allocation2 + $0x1c] sm:$0xff] }
  0xa3   :  { %107 = vrot.lane.b32.xlu0 %v124_v31, %s3627_s9  ;;  %224 = vst.msk [vmem:[#allocation3 + $0x18] sm:$0xff] %vm94_vm3, %v228_v40  ;;  %v231_v44 = vld [vmem:[#allocation2 + $0x24] sm:$0xff]  ;;  %225 = vst.msk [vmem:[#allocation3 + $0x40] sm:$0xff] %vm94_vm3, %v229_v41 }
  0xa4   :  { %98 = vst.msk [vmem:[#allocation3 + $0x78] sm:$0xff] %vm94_vm3, %v127_v42  ;;  %226 = vst.msk [vmem:[#allocation3 + $0x68] sm:$0xff] %vm94_vm3, %v230_v43  ;;  %v149_v49 = vld [vmem:[#allocation2 + $0xa] sm:$0xff]  ;;  %v151_v56 = vld [vmem:[#allocation2 + $0x22] sm:$0xff] }
  0xa5   :  { %227 = vst.msk [vmem:[#allocation3 + $0x90] sm:$0xff] %vm94_vm3, %v231_v44 }
  0xa6   :  { %180 = vrot.lane.b32.xlu1 %v148_v30, %s3628_s10 }
  0xa7   :  { %158 = vrot.lane.b32.xlu0 %v149_v49, %s3625_s0 }
  0xaa   :  { %109 = vrot.lane.b32.xlu1 %v125_v39, %s3627_s9 }
  0xab   :  { %236 = vrot.lane.b32.xlu0 %v228_v40, %s3627_s9 }
  0xae   :  { %136 = vrot.lane.b32.xlu1 %v126_v32, %s3626_s30 }
  0xaf   :  { %204 = vrot.lane.b32.xlu0 %v148_v30, %s3629_s11 }
  0xb2   :  { %182 = vrot.lane.b32.xlu1 %v149_v49, %s3628_s10 }
  0xb3   :  { %160 = vrot.lane.b32.xlu0 %v150_v52, %s3625_s0 }
  0xb6   :  { %111 = vrot.lane.b32.xlu1 %v126_v32, %s3627_s9 }
  0xb7   :  { %238 = vrot.lane.b32.xlu0 %v229_v41, %s3627_s9 }
  0xba   :  { %138 = vrot.lane.b32.xlu1 %v127_v42, %s3626_s30 }
  0xbb   :  { %206 = vrot.lane.b32.xlu0 %v149_v49, %s3629_s11 }
  0xbe   :  { %184 = vrot.lane.b32.xlu1 %v150_v52, %s3628_s10 }
  0xbf   :  { %162 = vrot.lane.b32.xlu0 %v151_v56, %s3625_s0 }
  0xc2   :  { %113 = vrot.lane.b32.xlu1 %v127_v42, %s3627_s9 }
  0xc3   :  { %240 = vrot.lane.b32.xlu0 %v230_v43, %s3627_s9 }
  0xc6   :  { %186 = vrot.lane.b32.xlu1 %v151_v56, %s3628_s10  ;;  %s3137_s10 = sld [smem:[#allocation9 + $0x3]] }
  0xc7   :  { %208 = vrot.lane.b32.xlu0 %v150_v52, %s3629_s11  ;;  %v675_v52 = vld [vmem:[%s5470_s3 + $0x8] sm:$0xff] }
  0xc8   :  { %v3470_v53 = vpack.c.bf16 %v675_v52, %v674_v51 }
  0xca   :  { %260 = vrot.lane.b32.xlu1 %v228_v40, %s3626_s30 }
  0xcb   :  { %242 = vrot.lane.b32.xlu0 %v231_v44, %s3627_s9  ;;  %s3166_s9 = sld [smem:[#allocation9 + $0x20]] }
  0xce   :  { %262 = vrot.lane.b32.xlu1 %v229_v41, %s3626_s30 }
  0xcf   :  { %210 = vrot.lane.b32.xlu0 %v151_v56, %s3629_s11  ;;  %v677_v56 = vld [vmem:[%s5470_s3 + $0x18] sm:$0xff] }
  0xd2   :  { %266 = vrot.lane.b32.xlu1 %v231_v44, %s3626_s30 }
  0xd3   :  { %264 = vrot.lane.b32.xlu0 %v230_v43, %s3626_s30 }
 0x110   :  { %v157_v57 = vpop.permute.xlu1 %156 }
 0x111   :  { %v133_v58 = vpop.permute.xlu0 %132 }
 0x112   :  { %144 = vst.msk [vmem:[#allocation3 + $0x8] sm:$0xff] %vm94_vm3, %v133_v58  ;;  %v678_v58 = vld [vmem:[%s5470_s3 + $0x20] sm:$0xff] }
 0x113   :  { %168 = vst.msk [vmem:[#allocation3 + $0x8] sm:$0xff] %vm119_vm4, %v157_v57 }
 0x114   :  { %v135_v59 = vpop.permute.xlu1 %134 }
 0x115   :  { %v108_v60 = vpop.permute.xlu0 %107  ;;  %145 = vst.msk [vmem:[#allocation3 + $0x30] sm:$0xff] %vm94_vm3, %v135_v59  ;;  %v679_v59 = vld [vmem:[%s5470_s3 + $0x28] sm:$0xff] }
 0x116   :  { %120 = vst.msk [vmem:[#allocation3] sm:$0xff] %vm119_vm4, %v108_v60  ;;  %v3476_v60 = vpack.c.bf16 %v679_v59, %v678_v58 }
 0x118   :  { %v181_v61 = vpop.permute.xlu1 %180 }
 0x119   :  { %v159_v62 = vpop.permute.xlu0 %158  ;;  %192 = vst.msk [vmem:[#allocation3 + $0x10] sm:$0xff] %vm94_vm3, %v181_v61  ;;  %v680_v61 = vld [vmem:[%s5470_s3 + $0x30] sm:$0xff] }
 0x11a   :  { %169 = vst.msk [vmem:[#allocation3 + $0x30] sm:$0xff] %vm119_vm4, %v159_v62  ;;  %v277_v1 = vld [vmem:[#allocation3 + $0x8] sm:$0xff] }
 0x11b   :  { %451 = vmatprep.mubr.f32.mxu0 %v277_v1  ;;  %v681_v62 = vld [vmem:[%s5470_s3 + $0x38] sm:$0xff]  ;;  %v683_v1 = vld [vmem:[%s5470_s3 + $0x48] sm:$0xff] }
 0x11c   :  { %v110_v4 = vpop.permute.xlu1 %109  ;;  %v3479_v63 = vpack.c.bf16 %v681_v62, %v680_v61 }
 0x11d   :  { %v237_v5 = vpop.permute.xlu0 %236  ;;  %v276_v6 = vld [vmem:[#allocation3] sm:$0xff]  ;;  %121 = vst.msk [vmem:[#allocation3 + $0x28] sm:$0xff] %vm119_vm4, %v110_v4 }
 0x11e   :  { %248 = vst.msk [vmem:[#allocation3 + $0x18] sm:$0xff] %vm119_vm4, %v237_v5  ;;  %452 = vmatmul.mubr.f32.vlgmr.msra.gmra.mrb[0].mxu0 %v276_v6  ;;  %v684_v4 = vld [vmem:[%s5470_s3 + $0x50] sm:$0xff]  ;;  %v685_v5 = vld [vmem:[%s5470_s3 + $0x58] sm:$0xff] }
 0x11f   :  { %3456 = vmatpush3.bf16.msra.mxu0 %v3453_v55  ;;  %v676_v55 = vld [vmem:[%s5470_s3 + $0x10] sm:$0xff]  ;;  %v3485_v6 = vpack.c.bf16 %v685_v5, %v684_v4 }
 0x120   :  { %3458 = vmatprep.subr.bf16.mxu0 %v3457_v3  ;;  %v137_v10 = vpop.permute.xlu1 %136  ;;  %v3473_v57 = vpack.c.bf16 %v677_v56, %v676_v55 }
 0x121   :  { %v205_v11 = vpop.permute.xlu0 %204  ;;  %v282_v12 = vld [vmem:[#allocation3 + $0x30] sm:$0xff]  ;;  %146 = vst.msk [vmem:[#allocation3 + $0x58] sm:$0xff] %vm94_vm3, %v137_v10  ;;  %v688_v10 = vld [vmem:[%s5470_s3 + $0x70] sm:$0xff] }
 0x122   :  { %216 = vst.msk [vmem:[#allocation3 + $0x10] sm:$0xff] %vm119_vm4, %v205_v11  ;;  %456 = vmatprep.mubr.f32.mxu0 %v282_v12  ;;  %v689_v11 = vld [vmem:[%s5470_s3 + $0x78] sm:$0xff]  ;;  %s3638_s3 = smov 126  }
 0x123   :  { %3460 = vmatpush3.bf16.msra.mxu0 %v3457_v3  ;;  %v3482_v3 = vpack.c.bf16 %v683_v1, %v682_v0  ;;  %v3491_v12 = vpack.c.bf16 %v689_v11, %v688_v10 }
 0x124   :  { %3462 = vmatprep.subr.bf16.mxu0 %v3461_v9  ;;  %v183_v16 = vpop.permute.xlu1 %182  ;;  %v281_v18 = vld [vmem:[#allocation3 + $0x28] sm:$0xff] }
 0x125   :  { %v161_v17 = vpop.permute.xlu0 %160  ;;  %v279_v19 = vld [vmem:[#allocation3 + $0x18] sm:$0xff]  ;;  %193 = vst.msk [vmem:[#allocation3 + $0x38] sm:$0xff] %vm94_vm3, %v183_v16  ;;  %457 = vmatmul.mubr.f32.gmra.mrb[2].mxu0 %v281_v18 }
 0x126   :  { %170 = vst.msk [vmem:[#allocation3 + $0x58] sm:$0xff] %vm119_vm4, %v161_v17  ;;  %536 = vmatprep.mubr.f32.mxu1 %v279_v19  ;;  %v3120_v19 = vld [vmem:[%s5469_s2] ss:$0 sm:$0xff]  ;;  %s3162_s2 = sld [smem:[#allocation9 + $0x1c]] }
 0x127   :  { %3464 = vmatpush3.bf16.msra.mxu0 %v3461_v9  ;;  %v3488_v9 = vpack.c.bf16 %v687_v8, %v686_v7 }
 0x128   :  { %3466 = vmatprep.subr.bf16.mxu0 %v3465_v15  ;;  %v112_v20 = vpop.permute.xlu1 %111 }
 0x129   :  { %v239_v21 = vpop.permute.xlu0 %238  ;;  %v278_v22 = vld [vmem:[#allocation3 + $0x10] sm:$0xff]  ;;  %122 = vst.msk [vmem:[#allocation3 + $0x50] sm:$0xff] %vm119_vm4, %v112_v20 }
 0x12a   :  { %249 = vst.msk [vmem:[#allocation3 + $0x40] sm:$0xff] %vm119_vm4, %v239_v21  ;;  %537 = vmatmul.mubr.f32.vlgmr.msra.gmra.mrb[0].mxu1 %v278_v22 }
 0x12b   :  { %3468 = vmatpush3.bf16.msra.mxu0 %v3465_v15  ;;  %3471 = vmatpush3.bf16.msra.mxu1 %v3470_v53 }
 0x12c   :  { %3374 = vmatprep.subr.mxu0 %v3624_v2  ;;  %v139_v23 = vpop.permute.xlu1 %138  ;;  %3472 = vmatprep.subr.bf16.mxu1 %v3630_v54 }
 0x12d   :  { %v207_v24 = vpop.permute.xlu0 %206  ;;  %v287_v25 = vld [vmem:[#allocation3 + $0x58] sm:$0xff]  ;;  %147 = vst.msk [vmem:[#allocation3 + $0x80] sm:$0xff] %vm94_vm3, %v139_v23 }
 0x12e   :  { %217 = vst.msk [vmem:[#allocation3 + $0x38] sm:$0xff] %vm119_vm4, %v207_v24  ;;  %461 = vmatprep.mubr.f32.mxu0 %v287_v25 }
 0x12f   :  { %3474 = vmatpush3.bf16.msra.mxu1 %v3473_v57 }
 0x130   :  { %v185_v26 = vpop.permute.xlu1 %184  ;;  %v286_v28 = vld [vmem:[#allocation3 + $0x50] sm:$0xff]  ;;  %3475 = vmatprep.subr.bf16.mxu1 %v3630_v54 }
 0x131   :  { %v163_v27 = vpop.permute.xlu0 %162  ;;  %v284_v29 = vld [vmem:[#allocation3 + $0x40] sm:$0xff]  ;;  %194 = vst.msk [vmem:[#allocation3 + $0x60] sm:$0xff] %vm94_vm3, %v185_v26  ;;  %462 = vmatmul.mubr.f32.gmra.mrb[4].mxu0 %v286_v28 }
 0x132   :  { %171 = vst.msk [vmem:[#allocation3 + $0x80] sm:$0xff] %vm119_vm4, %v163_v27  ;;  %541 = vmatprep.mubr.f32.mxu1 %v284_v29 }
 0x133   :  { %3477 = vmatpush3.bf16.msra.mxu1 %v3476_v60 }
 0x134   :  { %v114_v30 = vpop.permute.xlu1 %113  ;;  %3478 = vmatprep.subr.bf16.mxu1 %v3630_v54 }
 0x135   :  { %v241_v31 = vpop.permute.xlu0 %240  ;;  %v283_v32 = vld [vmem:[#allocation3 + $0x38] sm:$0xff]  ;;  %123 = vst.msk [vmem:[#allocation3 + $0x78] sm:$0xff] %vm119_vm4, %v114_v30 }
 0x136   :  { %250 = vst.msk [vmem:[#allocation3 + $0x68] sm:$0xff] %vm119_vm4, %v241_v31  ;;  %542 = vmatmul.mubr.f32.gmra.mrb[2].mxu1 %v283_v32 }
 0x137   :  { %3480 = vmatpush3.bf16.msra.mxu1 %v3479_v63 }
 0x138   :  { %v187_v33 = vpop.permute.xlu1 %186  ;;  %3481 = vmatprep.subr.bf16.mxu1 %v3630_v54 }
 0x139   :  { %v209_v34 = vpop.permute.xlu0 %208  ;;  %v292_v35 = vld [vmem:[#allocation3 + $0x80] sm:$0xff]  ;;  %195 = vst.msk [vmem:[#allocation3 + $0x88] sm:$0xff] %vm94_vm3, %v187_v33 }
 0x13a   :  { %218 = vst.msk [vmem:[#allocation3 + $0x60] sm:$0xff] %vm119_vm4, %v209_v34  ;;  %466 = vmatprep.mubr.f32.mxu0 %v292_v35 }
 0x13b   :  { %3483 = vmatpush3.bf16.msra.mxu1 %v3482_v3 }
 0x13c   :  { %v261_v36 = vpop.permute.xlu1 %260  ;;  %v291_v38 = vld [vmem:[#allocation3 + $0x78] sm:$0xff]  ;;  %3484 = vmatprep.subr.bf16.mxu1 %v3630_v54 }
 0x13d   :  { %v243_v37 = vpop.permute.xlu0 %242  ;;  %v289_v39 = vld [vmem:[#allocation3 + $0x68] sm:$0xff]  ;;  %272 = vst.msk [vmem:[#allocation3 + $0x20] sm:$0xff] %vm94_vm3, %v261_v36  ;;  %467 = vmatmul.mubr.f32.gmra.mrb[6].mxu0 %v291_v38 }
 0x13e   :  { %251 = vst.msk [vmem:[#allocation3 + $0x90] sm:$0xff] %vm119_vm4, %v243_v37  ;;  %546 = vmatprep.mubr.f32.mxu1 %v289_v39 }
 0x13f   :  { %3486 = vmatpush3.bf16.msra.mxu1 %v3485_v6 }
 0x140   :  { %v263_v40 = vpop.permute.xlu1 %262  ;;  %3487 = vmatprep.subr.bf16.mxu1 %v3630_v54 }
 0x141   :  { %v211_v41 = vpop.permute.xlu0 %210  ;;  %v288_v42 = vld [vmem:[#allocation3 + $0x60] sm:$0xff]  ;;  %273 = vst.msk [vmem:[#allocation3 + $0x48] sm:$0xff] %vm94_vm3, %v263_v40 }
 0x142   :  { %219 = vst.msk [vmem:[#allocation3 + $0x88] sm:$0xff] %vm119_vm4, %v211_v41  ;;  %547 = vmatmul.mubr.f32.gmra.mrb[4].mxu1 %v288_v42  ;;  %vm1505_vm4 = vcmask 1045504  }
 0x143   :  { %3489 = vmatpush3.bf16.msra.mxu1 %v3488_v9 }
 0x144   :  { %v267_v43 = vpop.permute.xlu1 %266  ;;  %v280_v46 = vld [vmem:[#allocation3 + $0x20] sm:$0xff]  ;;  %3490 = vmatprep.subr.bf16.mxu1 %v3630_v54 }
 0x145   :  { %v265_v44 = vpop.permute.xlu0 %264  ;;  %v294_v45 = vld [vmem:[#allocation3 + $0x90] sm:$0xff]  ;;  %275 = vst.msk [vmem:[#allocation3 + $0x98] sm:$0xff] %vm94_vm3, %v267_v43  ;;  %3333 = vmatprep.mubr.msk.f32.mxu0 %vm94_vm3, %v280_v46 }
 0x146   :  { %274 = vst.msk [vmem:[#allocation3 + $0x70] sm:$0xff] %vm94_vm3, %v265_v44  ;;  %551 = vmatprep.mubr.f32.mxu1 %v294_v45 }
 0x147   :  { %3492 = vmatpush3.bf16.msra.mxu1 %v3491_v12 }
 0x148   :  { %v285_v48 = vld [vmem:[#allocation3 + $0x48] sm:$0xff] }
 0x149   :  { %v293_v47 = vld [vmem:[#allocation3 + $0x88] sm:$0xff]  ;;  %3334 = vmatmul.mubr.msk.f32.vlgmr.msra.gmra.mrb[8].mxu0 %vm94_vm3, %v285_v48 }
 0x14a   :  { %552 = vmatmul.mubr.f32.gmra.mrb[6].mxu1 %v293_v47 }
 0x14b   :  { %3371 = vmatprep.mubr.msk.f32.mxu1 %vm3631_vm5, %v3624_v2 }
 0x14c   :  { %v295_v50 = vld [vmem:[#allocation3 + $0x98] sm:$0xff] }
 0x14d   :  { %v290_v49 = vld [vmem:[#allocation3 + $0x70] sm:$0xff] }
 0x14e   :  { %3336 = vmatprep.mubr.msk.f32.mxu0 %vm94_vm3, %v290_v49 }
 0x14f   :  { %3337 = vmatmul.mubr.msk.f32.gmra.mrb[10].mxu0 %vm94_vm3, %v295_v50  ;;  %vm1312_vm3 = vcmask 1046528  }
 0x150   :  { %3376 = vmatprep.mubr.msk.f32.mxu0 %vm3631_vm5, %v3624_v2  ;;  %vm1698_vm5 = vcmask 1044480  }
 0x1f1   :  { %v3224_v13 = vpop.f32.mrb[0].mxu0 }
 0x1f2   :  { %v3225_v14 = vpop.f32.mrb[1].mxu0 }
 0x1f3   :  { %v3226_v15 = vadd.f32 %v3225_v14, %v3224_v13 }
 0x1f5   :  { %v454_v22 = vadd.f32 %v3226_v15, %v3120_v19 }
 0x1f8   :  { %v3227_v16 = vpop.f32.mrb[2].mxu0 }
 0x1f9   :  { %v3228_v17 = vpop.f32.mrb[3].mxu0 }
 0x1fa   :  { %v3229_v18 = vadd.f32 %v3228_v17, %v3227_v16 }
 0x1fc   :  { %v459_v30 = vadd.f32 %v3229_v18, %v3120_v19 }
 0x1fd   :  { %v3268_v20 = vpop.f32.mrb[0].mxu1 }
 0x1fe   :  { %v3269_v21 = vpop.f32.mrb[1].mxu1 }
 0x1ff   :  { %v3270_v23 = vadd.f32 %v3269_v21, %v3268_v20 }
 0x201   :  { %v539_v24 = vadd.f32 %v3270_v23, %v454_v22 }
 0x204   :  { %v3230_v25 = vpop.f32.mrb[4].mxu0 }
 0x205   :  { %v3231_v26 = vpop.f32.mrb[5].mxu0 }
 0x206   :  { %v3232_v27 = vadd.f32 %v3231_v26, %v3230_v25 }
 0x208   :  { %v464_v38 = vadd.f32 %v3232_v27, %v3120_v19 }
 0x209   :  { %v3271_v28 = vpop.f32.mrb[2].mxu1 }
 0x20a   :  { %v3272_v29 = vpop.f32.mrb[3].mxu1 }
 0x20b   :  { %v3273_v31 = vadd.f32 %v3272_v29, %v3271_v28 }
 0x20d   :  { %v544_v32 = vadd.f32 %v3273_v31, %v459_v30 }
 0x210   :  { %v3233_v33 = vpop.f32.mrb[6].mxu0 }
 0x211   :  { %v3234_v34 = vpop.f32.mrb[7].mxu0 }
 0x212   :  { %v3235_v35 = vadd.f32 %v3234_v34, %v3233_v33  ;;  %v862_v33 = vld [vmem:[%s5472_s5] sm:$0xff]  ;;  %s3171_s5 = sld [smem:[#allocation9 + $0x25]] }
 0x213   :  { %3375 = vmatpush3.msra.mxu0 %v862_v33 }
 0x214   :  { %v469_v46 = vadd.f32 %v3235_v35, %v3120_v19 }
 0x215   :  { %v3274_v36 = vpop.f32.mrb[4].mxu1 }
 0x216   :  { %v3275_v37 = vpop.f32.mrb[5].mxu1 }
 0x217   :  { %v3276_v39 = vadd.f32 %v3275_v37, %v3274_v36  ;;  %v3125_v37 = vld [vmem:[%s5471_s4] ss:$0 sm:$0xff] }
 0x219   :  { %v549_v40 = vadd.f32 %v3276_v39, %v464_v38  ;;  %v3126_v38 = vld [vmem:[%s5471_s4 + $0x1] ss:$0 sm:$0xff] }
 0x21c   :  { %v3335_v42 = vpop.f32.mrb[8].mxu0 }
 0x21d   :  { %v3277_v41 = vpop.f32.mrb[6].mxu1  ;;  %v629_v43 = vadd.f32 %v3335_v42, %v544_v32  ;;  %v623_v45 = vpop.f32.mrb[9].mxu0 }
 0x21e   :  { %v3278_v44 = vpop.f32.mrb[7].mxu1  ;;  %v624_v48 = vadd.f32 %v623_v45, %v539_v24 }
 0x21f   :  { %v3279_v47 = vadd.f32 %v3278_v44, %v3277_v41  ;;  %v3850_v49 = vmax.f32 %v629_v43, 0.0  ;;  %v3127_v41 = vld [vmem:[%s5471_s4 + $0x2] ss:$0 sm:$0xff] }
 0x220   :  { %v3852_v50 = vmax.f32 %v624_v48, 0.0 }
 0x221   :  { %v554_v51 = vadd.f32 %v3279_v47, %v469_v46  ;;  %v3128_v47 = vld [vmem:[%s5471_s4 + $0x3] ss:$0 sm:$0xff] }
 0x222   :  { %v3338_v52 = vpop.f32.mrb[10].mxu0  ;;  %v646_v53 = vadd.f32 %v3850_v49, %v3852_v50  ;;  %v660_v54 = vmax.f32 %v3852_v50, %v3850_v49 }
 0x223   :  { %v639_v55 = vadd.f32 %v3338_v52, %v554_v51  ;;  %v633_v56 = vpop.f32.mrb[11].mxu0  ;;  %v3129_v52 = vld [vmem:[%s5471_s4 + $0x4] ss:$0 sm:$0xff] }
 0x224   :  { %v634_v57 = vadd.f32 %v633_v56, %v549_v40  ;;  %v647_v58 = vrot.slane %v646_v53, 4  ;;  %v661_v59 = vrot.slane %v660_v54, 4  ;;  %v3130_v56 = vld [vmem:[%s5471_s4 + $0x5] ss:$0 sm:$0xff] }
 0x225   :  { %v3858_v60 = vmax.f32 %v639_v55, 0.0 }
 0x226   :  { %v3860_v61 = vmax.f32 %v634_v57, 0.0  ;;  %v648_v62 = vadd.f32 %v647_v58, %v646_v53  ;;  %v662_v63 = vmax.f32 %v660_v54, %v661_v59  ;;  %v3131_v59 = vld [vmem:[%s5471_s4 + $0x6] ss:$0 sm:$0xff] }
 0x228   :  { %v653_v0 = vadd.f32 %v3858_v60, %v3860_v61  ;;  %v667_v1 = vmax.f32 %v3860_v61, %v3858_v60  ;;  %v649_v3 = vrot.slane %v648_v62, 2  ;;  %v663_v4 = vrot.slane %v662_v63, 2 }
 0x22a   :  { %v654_v5 = vrot.slane %v653_v0, 4  ;;  %v668_v6 = vrot.slane %v667_v1, 4  ;;  %v650_v7 = vadd.f32 %v649_v3, %v648_v62  ;;  %v664_v8 = vmax.f32 %v662_v63, %v663_v4 }
 0x22c   :  { %v655_v9 = vadd.f32 %v654_v5, %v653_v0  ;;  %v669_v10 = vmax.f32 %v667_v1, %v668_v6  ;;  %v651_v13 = vrot.slane %v650_v7, 1  ;;  %v665_v14 = vrot.slane %v664_v8, 1  ;;  %v3132_v1 = vld [vmem:[%s5471_s4 + $0x7] ss:$0 sm:$0xff]  ;;  %s3633_s4 = smov 96  }
 0x22e   :  { %v656_v11 = vrot.slane %v655_v9, 2  ;;  %v670_v12 = vrot.slane %v669_v10, 2  ;;  %v666_v19 = vmax.f32 %v664_v8, %v665_v14  ;;  %v652_v21 = vadd.f32 %v651_v13, %v650_v7 }
 0x22f   :  { %v3632_v13 = vmov 1966171168  }
 0x230   :  { %v657_v15 = vadd.f32 %v656_v11, %v655_v9  ;;  %v671_v16 = vmax.f32 %v669_v10, %v670_v12  ;;  %v939_v14 = vunpack.c.l.s4 %v3632_v13 }
 0x232   :  { %v658_v17 = vrot.slane %v657_v15, 1  ;;  %v672_v18 = vrot.slane %v671_v16, 1 }
 0x234   :  { %v673_v20 = vmax.f32 %v671_v16, %v672_v18  ;;  %v659_v22 = vadd.f32 %v658_v17, %v657_v15  ;;  %v941_v15 = vlaneseq  ;;  %v940_v16 = vunpack.c.0.s8 %v939_v14 }
 0x236   :  { %v693_v23 = vsel %vm692_vm6, %v673_v20, %v666_v19  ;;  %v707_v24 = vsel %vm692_vm6, %v659_v22, %v652_v21  ;;  %v942_v17 = vshrl.u32 %v941_v15, 7  ;;  %vm1891_vm6 = vcmask 1043456  }
 0x237   :  { %3372 = vmatmul.mubr.f32.vlgmr.msra.gmra.mrb[8].mxu1 %v707_v24  ;;  %v780_v25 = vsel %vm779_vm7, %v693_v23, -inf  ;;  %v696_v26 = vsel %vm695_vm8, %v693_v23, -inf  ;;  %v813_v27 = vsel %vm812_vm9, %v693_v23, -inf  ;;  %v791_v28 = vsel %vm790_vm10, %v693_v23, -inf }
 0x238   :  { %781 = vmax.xlane.f32.xlu1 %v780_v25  ;;  %697 = vmax.xlane.f32.xlu0 %v696_v26  ;;  %v835_v29 = vsel %vm834_vm11, %v693_v23, -inf  ;;  %v802_v30 = vsel %vm801_vm12, %v693_v23, -inf  ;;  %v824_v31 = vsel %vm823_vm13, %v693_v23, -inf  ;;  %v846_v32 = vsel %vm845_vm14, %v693_v23, -inf }
 0x239   :  { %v943_v18 = vsub.s32 %v940_v16, %v942_v17  ;;  %v962_v21 = vsub.s32 0, %v942_v17  ;;  %vm2984_vm7 = vcmask 130048  }
 0x23c   :  { %814 = vmax.xlane.f32.xlu1 %v813_v27  ;;  %792 = vmax.xlane.f32.xlu0 %v791_v28 }
 0x240   :  { %836 = vmax.xlane.f32.xlu1 %v835_v29  ;;  %803 = vmax.xlane.f32.xlu0 %v802_v30 }
 0x244   :  { %825 = vmax.xlane.f32.xlu0 %v824_v31 }
 0x248   :  { %847 = vmax.xlane.f32.xlu0 %v846_v32 }
 0x2c5   :  { %v698_v34 = vpop.xlane.xlu0 %697  ;;  %v782_v36 = vpop.xlane.xlu1 %781 }
 0x2c6   :  { %v704_v40 = vmul.f32 %v3125_v37, %v698_v34  ;;  %v788_v43 = vmul.f32 %v3126_v38, %v782_v36 }
 0x2c9   :  { %v793_v35 = vpop.xlane.xlu0 %792  ;;  %v815_v46 = vpop.xlane.xlu1 %814 }
 0x2ca   :  { %v799_v48 = vmul.f32 %v3127_v41, %v793_v35  ;;  %v821_v57 = vmul.f32 %v3129_v52, %v815_v46 }
 0x2cd   :  { %v804_v39 = vpop.xlane.xlu0 %803  ;;  %v837_v62 = vpop.xlane.xlu1 %836 }
 0x2ce   :  { %v810_v54 = vmul.f32 %v3128_v47, %v804_v39  ;;  %v843_v4 = vmul.f32 %v3131_v59, %v837_v62 }
 0x2d1   :  { %v826_v53 = vpop.xlane.xlu0 %825 }
 0x2d2   :  { %v832_v63 = vmul.f32 %v3130_v56, %v826_v53 }
 0x2d5   :  { %v848_v3 = vpop.xlane.xlu0 %847 }
 0x2d6   :  { %v854_v6 = vmul.f32 %v3132_v1, %v848_v3 }
 0x30a   :  { %v775_v42 = vpop.f32.mrb[8].mxu1 }
 0x30b   :  { %v776_v44 = vadd.f32 %v775_v42, %v704_v40  ;;  %v3373_v45 = vpop.f32.mrb[9].mxu1 }
 0x30d   :  { %v789_v51 = vadd.f32 %v788_v43, %v776_v44 }
 0x30f   :  { %v800_v55 = vadd.f32 %v799_v48, %v789_v51 }
 0x311   :  { %v811_v58 = vadd.f32 %v810_v54, %v800_v55 }
 0x313   :  { %v822_v0 = vadd.f32 %v821_v57, %v811_v58 }
 0x315   :  { %v833_v5 = vadd.f32 %v832_v63, %v822_v0 }
 0x317   :  { %v844_v7 = vadd.f32 %v843_v4, %v833_v5 }
 0x319   :  { %v855_v8 = vadd.f32 %v854_v6, %v844_v7 }
 0x31b   :  { %v3133_v9 = vmul.f32 -1.442695, %v855_v8 }
 0x31d   :  { %3520 = vpow2.f32 %v3133_v9 }
 0x327   :  { %v3521_v10 = vpop.eup %3520 }
 0x328   :  { %v859_v11 = vadd.f32 1.0, %v3521_v10 }
 0x32a   :  { %3522 = vrcp.f32 %v859_v11 }
 0x334   :  { %v3523_v12 = vpop.eup %3522 }
 0x335   :  { %3377 = vmatmul.mubr.msk.f32.vlgmr.msra.gmra.mrb[12].mxu0 %vm863_vm15, %v3523_v12 }
 0x408   :  { %v933_v19 = vpop.f32.mrb[12].mxu0 }
 0x409   :  { %v944_v20 = vrot.slane %v933_v19, %v943_v18  ;;  %v3378_v22 = vpop.f32.mrb[13].mxu0 }
 0x40b   :  { %v945_v23 = vcombine.high %v944_v20, %v944_v20  ;;  %v952_v24 = vrot.slane %v944_v20, %v943_v18 }
 0x40d   :  { %v959_v25 = vrot.slane %v945_v23, %v943_v18  ;;  %v963_v26 = vrot.slane %v952_v24, %v962_v21 }
 0x40f   :  { %v967_v27 = vrot.slane %v959_v25, %v962_v21  ;;  %v3894_v28 = vmul.f32 %v963_v26, %v3852_v50  ;;  %v3897_v29 = vmul.f32 %v963_v26, %v3850_v49 }
 0x411   :  { %5487 = vst [vmem:[#allocation14_spill] sm:$0xff] %v3894_v28  ;;  %5488 = vst [vmem:[#allocation15_spill] sm:$0xff] %v3897_v29  ;;  %980 = vrot.lane.b32.xlu0 %v3897_v29, %s3626_s30  ;;  %978 = vrot.lane.b32.xlu1 %v3894_v28, %s3626_s30  ;;  %v3904_v30 = vmul.f32 %v967_v27, %v3860_v61  ;;  %v3910_v50 = vmul.f32 %v967_v27, %v3858_v60 }
 0x413   :  { %5489 = vst [vmem:[#allocation16_spill] sm:$0xff] %v3904_v30  ;;  %5490 = vst [vmem:[#allocation17_spill] sm:$0xff] %v3910_v50 }
 0x415   :  { %998 = vrot.lane.b32.xlu1 %v3894_v28, %s3633_s4  ;;  %982 = vrot.lane.b32.xlu0 %v3904_v30, %s3626_s30 }
 0x419   :  { %1000 = vrot.lane.b32.xlu1 %v3897_v29, %s3633_s4  ;;  %984 = vrot.lane.b32.xlu0 %v3910_v50, %s3626_s30  ;;  %s3635_s30 = smov 32  }
 0x41d   :  { %1018 = vrot.lane.b32.xlu1 %v3894_v28, %s3634_s22  ;;  %1002 = vrot.lane.b32.xlu0 %v3904_v30, %s3633_s4 }
 0x421   :  { %1020 = vrot.lane.b32.xlu1 %v3897_v29, %s3634_s22  ;;  %1004 = vrot.lane.b32.xlu0 %v3910_v50, %s3633_s4  ;;  %s3172_s4 = sld [smem:[#allocation9 + $0x26]] }
 0x425   :  { %1038 = vrot.lane.b32.xlu1 %v3894_v28, %s3625_s0  ;;  %1022 = vrot.lane.b32.xlu0 %v3904_v30, %s3634_s22 }
 0x429   :  { %1040 = vrot.lane.b32.xlu1 %v3897_v29, %s3625_s0  ;;  %1024 = vrot.lane.b32.xlu0 %v3910_v50, %s3634_s22  ;;  %s3142_s22 = sld [smem:[#allocation9 + $0x8]] }
 0x42d   :  { %1058 = vrot.lane.b32.xlu1 %v3894_v28, %s3629_s11  ;;  %1042 = vrot.lane.b32.xlu0 %v3904_v30, %s3625_s0 }
 0x431   :  { %1060 = vrot.lane.b32.xlu1 %v3897_v29, %s3629_s11  ;;  %1044 = vrot.lane.b32.xlu0 %v3910_v50, %s3625_s0  ;;  %s3637_s0 = smov 2  }
 0x435   :  { %1078 = vrot.lane.b32.xlu1 %v3894_v28, %s3635_s30  ;;  %1062 = vrot.lane.b32.xlu0 %v3904_v30, %s3629_s11 }
 0x439   :  { %1080 = vrot.lane.b32.xlu1 %v3897_v29, %s3635_s30  ;;  %1064 = vrot.lane.b32.xlu0 %v3910_v50, %s3629_s11  ;;  %s3161_s11 = sld [smem:[#allocation9 + $0x1b]] }
 0x43d   :  { %1098 = vrot.lane.b32.xlu1 %v3894_v28, %s3636_s23  ;;  %1082 = vrot.lane.b32.xlu0 %v3904_v30, %s3635_s30 }
 0x441   :  { %1100 = vrot.lane.b32.xlu1 %v3897_v29, %s3636_s23  ;;  %1102 = vrot.lane.b32.xlu0 %v3904_v30, %s3636_s23 }
 0x445   :  { %1084 = vrot.lane.b32.xlu1 %v3910_v50, %s3635_s30  ;;  %s3173_s30 = sld [smem:[#allocation9 + $0x27]] }
 0x449   :  { %1104 = vrot.lane.b32.xlu1 %v3910_v50, %s3636_s23  ;;  %s3140_s23 = sld [smem:[#allocation9 + $0x6]] }
 0x483   :  { %v981_v49 = vpop.permute.xlu0 %980  ;;  %v979_v60 = vpop.permute.xlu1 %978 }
 0x484   :  { %v990_v46 = vadd.f32 %v979_v60, %v3894_v28  ;;  %v994_v47 = vmax.f32 %v3894_v28, %v979_v60  ;;  %v991_v54 = vadd.f32 %v981_v49, %v3897_v29  ;;  %v995_v55 = vmax.f32 %v3897_v29, %v981_v49 }
 0x487   :  { %v999_v61 = vpop.permute.xlu1 %998  ;;  %v983_v31 = vpop.permute.xlu0 %982 }
 0x488   :  { %v1010_v48 = vadd.f32 %v999_v61, %v990_v46  ;;  %v1014_v51 = vmax.f32 %v994_v47, %v999_v61  ;;  %v992_v0 = vadd.f32 %v983_v31, %v3904_v30  ;;  %v996_v1 = vmax.f32 %v3904_v30, %v983_v31 }
 0x48b   :  { %v1001_v32 = vpop.permute.xlu1 %1000  ;;  %v985_v33 = vpop.permute.xlu0 %984 }
 0x48c   :  { %v1011_v58 = vadd.f32 %v1001_v32, %v991_v54  ;;  %v1015_v59 = vmax.f32 %v995_v55, %v1001_v32  ;;  %v993_v15 = vadd.f32 %v985_v33, %v3910_v50  ;;  %v997_v2 = vmax.f32 %v3910_v50, %v985_v33 }
 0x48f   :  { %v1019_v34 = vpop.permute.xlu1 %1018  ;;  %v1003_v35 = vpop.permute.xlu0 %1002 }
 0x490   :  { %v1030_v56 = vadd.f32 %v1019_v34, %v1010_v48  ;;  %v1034_v57 = vmax.f32 %v1014_v51, %v1019_v34  ;;  %v1012_v9 = vadd.f32 %v1003_v35, %v992_v0  ;;  %v1016_v10 = vmax.f32 %v996_v1, %v1003_v35 }
 0x491   :  { %v2087_v0 = vstv %s3160_s24  ;;  %s3147_s24 = sld [smem:[#allocation9 + $0xd]] }
 0x493   :  { %v1021_v36 = vpop.permute.xlu1 %1020  ;;  %v1005_v37 = vpop.permute.xlu0 %1004 }
 0x494   :  { %v1031_v5 = vadd.f32 %v1021_v36, %v1011_v58  ;;  %v1035_v6 = vmax.f32 %v1015_v59, %v1021_v36  ;;  %v1013_v24 = vadd.f32 %v1005_v37, %v993_v15  ;;  %v1017_v25 = vmax.f32 %v997_v2, %v1005_v37 }
 0x497   :  { %v1039_v38 = vpop.permute.xlu1 %1038  ;;  %v1023_v39 = vpop.permute.xlu0 %1022 }
 0x498   :  { %v1050_v62 = vadd.f32 %v1039_v38, %v1030_v56  ;;  %v1054_v63 = vmax.f32 %v1034_v57, %v1039_v38  ;;  %v1032_v16 = vadd.f32 %v1023_v39, %v1012_v9  ;;  %v1036_v17 = vmax.f32 %v1016_v10, %v1023_v39 }
 0x49b   :  { %v1041_v40 = vpop.permute.xlu1 %1040  ;;  %v3953_v41 = vpop.permute.xlu0 %1024 }
 0x49c   :  { %v1051_v11 = vadd.f32 %v1041_v40, %v1031_v5  ;;  %v1055_v12 = vmax.f32 %v1035_v6, %v1041_v40  ;;  %v1033_v61 = vadd.f32 %v3953_v41, %v1013_v24  ;;  %v1037_v31 = vmax.f32 %v1017_v25, %v3953_v41 }
 0x49d   :  { %v2165_v24 = vstv %s3163_s27  ;;  %s3153_s27 = sld [smem:[#allocation9 + $0x13]] }
 0x49f   :  { %v1059_v42 = vpop.permute.xlu1 %1058  ;;  %v1043_v43 = vpop.permute.xlu0 %1042 }
 0x4a0   :  { %v1070_v7 = vadd.f32 %v1059_v42, %v1050_v62  ;;  %v1074_v8 = vmax.f32 %v1054_v63, %v1059_v42  ;;  %v1052_v26 = vadd.f32 %v1043_v43, %v1032_v16  ;;  %v1056_v27 = vmax.f32 %v1036_v17, %v1043_v43 }
 0x4a1   :  { %v2113_v63 = vstv %s3161_s11  ;;  %s3145_s11 = sld [smem:[#allocation9 + $0xb]] }
 0x4a3   :  { %v1061_v44 = vpop.permute.xlu1 %1060  ;;  %v1045_v45 = vpop.permute.xlu0 %1044 }
 0x4a4   :  { %v1071_v20 = vadd.f32 %v1061_v44, %v1051_v11  ;;  %v1075_v21 = vmax.f32 %v1055_v12, %v1061_v44  ;;  %v1053_v39 = vadd.f32 %v1045_v45, %v1033_v61  ;;  %v1057_v37 = vmax.f32 %v1037_v31, %v1045_v45 }
 0x4a7   :  { %v1079_v52 = vpop.permute.xlu1 %1078  ;;  %v1063_v53 = vpop.permute.xlu0 %1062 }
 0x4a8   :  { %v1090_v13 = vadd.f32 %v1079_v52, %v1070_v7  ;;  %v1094_v14 = vmax.f32 %v1074_v8, %v1079_v52  ;;  %v1072_v32 = vadd.f32 %v1063_v53, %v1052_v26  ;;  %v1076_v34 = vmax.f32 %v1056_v27, %v1063_v53 }
 0x4a9   :  { %v3986_v7 = vstv %s3135_s1  ;;  %s3148_s1 = sld [smem:[#allocation9 + $0xe]] }
 0x4ab   :  { %v1081_v3 = vpop.permute.xlu1 %1080  ;;  %v1065_v4 = vpop.permute.xlu0 %1064 }
 0x4ac   :  { %v1091_v49 = vadd.f32 %v1081_v3, %v1071_v20  ;;  %v1095_v60 = vmax.f32 %v1075_v21, %v1081_v3  ;;  %v1073_v44 = vadd.f32 %v1065_v4, %v1053_v39  ;;  %v1077_v47 = vmax.f32 %v1057_v37, %v1065_v4 }
 0x4ad   :  { %v4059_v37 = vstv %s3171_s5  ;;  %s3157_s5 = sld [smem:[#allocation9 + $0x17]] }
 0x4af   :  { %v1099_v18 = vpop.permute.xlu1 %1098  ;;  %v1083_v19 = vpop.permute.xlu0 %1082 }
 0x4b0   :  { %v1110_v22 = vadd.f32 %v1099_v18, %v1090_v13  ;;  %v1114_v23 = vmax.f32 %v1094_v14, %v1099_v18  ;;  %v1092_v42 = vadd.f32 %v1083_v19, %v1072_v32  ;;  %v1096_v43 = vmax.f32 %v1076_v34, %v1083_v19 }
 0x4b1   :  { %v3999_v14 = vstv %s3136_s25  ;;  %v4009_v18 = vstv %s3162_s2  ;;  %v4044_v34 = vstv %s3166_s9  ;;  %s3150_s25 = sld [smem:[#allocation9 + $0x10]]  ;;  %s3152_s2 = sld [smem:[#allocation9 + $0x12]] }
 0x4b2   :  { %1161 = vrot.lane.b32.xlu0 %v1114_v23, %s3637_s0  ;;  %v1118_v38 = vmul.f32 0.125, %v1110_v22  ;;  %s3176_s9 = sld [smem:[#allocation9 + $0x2a]] }
 0x4b3   :  { %v1101_v33 = vpop.permute.xlu1 %1100  ;;  %v1103_v40 = vpop.permute.xlu0 %1102 }
 0x4b4   :  { %v1111_v35 = vadd.f32 %v1101_v33, %v1091_v49  ;;  %v1115_v36 = vmax.f32 %v1095_v60, %v1101_v33  ;;  %v1112_v48 = vadd.f32 %v1103_v40, %v1092_v42  ;;  %v1116_v41 = vmax.f32 %v1096_v43, %v1103_v40 }
 0x4b6   :  { %1163 = vrot.lane.b32.xlu1 %v1115_v36, %s3637_s0  ;;  %1140 = vrot.lane.b32.xlu0 %v1118_v38, %s3637_s0  ;;  %v1119_v51 = vmul.f32 0.125, %v1111_v35  ;;  %v1120_v56 = vmul.f32 0.125, %v1112_v48  ;;  %v4046_v35 = vstv %s3137_s10  ;;  %s3155_s10 = sld [smem:[#allocation9 + $0x15]] }
 0x4b7   :  { %v1085_v46 = vpop.permute.xlu1 %1084  ;;  %v4518_v50 = vstv %s3150_s25  ;;  %s3642_s25 = smov [#allocation10]  }
 0x4b8   :  { %v1093_v52 = vadd.f32 %v1085_v46, %v1073_v44  ;;  %v1097_v53 = vmax.f32 %v1077_v47, %v1085_v46 }
 0x4ba   :  { %1142 = vrot.lane.b32.xlu1 %v1119_v51, %s3637_s0  ;;  %1165 = vrot.lane.b32.xlu0 %v1116_v41, %s3637_s0  ;;  %v4075_v41 = vstv %s3138_s12  ;;  %s3158_s12 = sld [smem:[#allocation9 + $0x18]] }
 0x4bb   :  { %v1105_v54 = vpop.permute.xlu1 %1104 }
 0x4bc   :  { %v1113_v45 = vadd.f32 %v1105_v54, %v1093_v52  ;;  %v1117_v55 = vmax.f32 %v1097_v53, %v1105_v54 }
 0x4be   :  { %1167 = vrot.lane.b32.xlu1 %v1117_v55, %s3637_s0  ;;  %1144 = vrot.lane.b32.xlu0 %v1120_v56, %s3637_s0  ;;  %v1121_v57 = vmul.f32 0.125, %v1113_v45 }
 0x4c2   :  { %1146 = vrot.lane.b32.xlu1 %v1121_v57, %s3637_s0  ;;  %v4093_v57 = vstv %s3165_s13  ;;  %s3143_s0 = sld [smem:[#allocation9 + $0x9]] }
 0x4c3   :  { %s3175_s13 = sld [smem:[#allocation9 + $0x29]] }
 0x524   :  { %v1162_v58 = vpop.permute.xlu0 %1161 }
 0x525   :  { %1174 = vst.msk [vmem:[#allocation4 + $0x32] sm:$0xff] %vm1152_vm2, %v1162_v58  ;;  %v4095_v58 = vstv %s3146_s14  ;;  %s1184_s14 = sld [smem:[#allocation9]] }
 0x528   :  { %v1164_v59 = vpop.permute.xlu1 %1163  ;;  %v1141_v62 = vpop.permute.xlu0 %1140 }
 0x529   :  { %1175 = vst.msk [vmem:[#allocation4 + $0x3a] sm:$0xff] %vm1152_vm2, %v1164_v59  ;;  %1153 = vst.msk [vmem:[#allocation4 + $0x2] sm:$0xff] %vm1152_vm2, %v1141_v62 }
 0x52c   :  { %v3980_v1 = vld [vmem:[#allocation4 + $0x30] sm:$0xff]  ;;  %v1143_v3 = vpop.permute.xlu1 %1142  ;;  %v1166_v4 = vpop.permute.xlu0 %1165 }
 0x52d   :  { %1154 = vst.msk [vmem:[#allocation4 + $0xa] sm:$0xff] %vm1152_vm2, %v1143_v3  ;;  %1176 = vst.msk [vmem:[#allocation4 + $0x4a] sm:$0xff] %vm1152_vm2, %v1166_v4  ;;  %v2114_v5 = vmul.f32 %v2113_v63, %v3980_v1  ;;  %v2088_v6 = vmul.f32 %v2087_v0, %v3980_v1  ;;  %v2140_v19 = vmul.f32 %v4009_v18, %v3980_v1 }
 0x52e   :  { %v2166_v25 = vmul.f32 %v2165_v24, %v3980_v1  ;;  %v2264_v38 = vmul.f32 %v4044_v34, %v3980_v1  ;;  %v2456_v46 = vmul.f32 %v4059_v37, %v3980_v1  ;;  %v2224_v4 = vmul.f32 %v4093_v57, %v3980_v1 }
 0x52f   :  { %2122 = vrot.lane.b32.xlu0 %v2114_v5, %s3638_s3  ;;  %2096 = vrot.lane.b32.xlu1 %v2088_v6, %s3639_s26 }
 0x530   :  { %v3990_v8 = vld [vmem:[#allocation4 + $0x38] sm:$0xff]  ;;  %v3992_v9 = vld [vmem:[#allocation4] sm:$0xff]  ;;  %v1168_v10 = vpop.permute.xlu1 %1167  ;;  %v1145_v11 = vpop.permute.xlu0 %1144  ;;  %v2276_v44 = vrot.slane %v2264_v38, 1  ;;  %v2468_v52 = vrot.slane %v2456_v46, 2  ;;  %v4158_v38 = vstv %s3168_s16  ;;  %s4857_s16 = sld [smem:[#allocation9 + $0x2b]] }
 0x531   :  { %1177 = vst.msk [vmem:[#allocation4 + $0x52] sm:$0xff] %vm1152_vm2, %v1168_v10  ;;  %1155 = vst.msk [vmem:[#allocation4 + $0x1a] sm:$0xff] %vm1152_vm2, %v1145_v11  ;;  %v2089_v12 = vmul.f32 %v2087_v0, %v3990_v8  ;;  %v1196_v13 = vmul.f32 %v3986_v7, %v3992_v9  ;;  %v2115_v2 = vmul.f32 %v2113_v63, %v3990_v8 }
 0x532   :  { %v1222_v16 = vmul.f32 %v3999_v14, %v3992_v9  ;;  %v2141_v22 = vmul.f32 %v4009_v18, %v3990_v8  ;;  %v2167_v27 = vmul.f32 %v2165_v24, %v3990_v8  ;;  %v4050_v36 = vmul.f32 %v4044_v34, %v3990_v8 }
 0x533   :  { %2098 = vrot.lane.b32.xlu1 %v2089_v12, %s3639_s26  ;;  %1204 = vrot.lane.b32.xlu0 %v1196_v13, %s3639_s26  ;;  %v1248_v39 = vmul.f32 %v4046_v35, %v3992_v9  ;;  %v4064_v43 = vmul.f32 %v4059_v37, %v3990_v8  ;;  %v1274_v53 = vmul.f32 %v4075_v41, %v3992_v9 }
 0x534   :  { %v1147_v15 = vpop.permute.xlu1 %1146  ;;  %v4007_v17 = vld [vmem:[#allocation4 + $0x48] sm:$0xff]  ;;  %v2277_v42 = vrot.slane %v4050_v36, 1  ;;  %v2225_v62 = vmul.f32 %v4093_v57, %v3990_v8  ;;  %v4107_v3 = vld [vmem:[#allocation4 + $0x10] sm:$0xf]  ;;  %v2344_v46 = vmul.f32 %v4158_v38, %v3980_v1 }
 0x535   :  { %1156 = vst.msk [vmem:[#allocation4 + $0x22] sm:$0xff] %vm1152_vm2, %v1147_v15  ;;  %v2090_v20 = vmul.f32 %v2087_v0, %v4007_v17  ;;  %v2116_v26 = vmul.f32 %v2113_v63, %v4007_v17  ;;  %v4031_v60 = vld [vmem:[#allocation4 + $0x8] sm:$0xff]  ;;  %v2142_v31 = vmul.f32 %v4009_v18, %v4007_v17  ;;  %v2168_v33 = vmul.f32 %v2165_v24, %v4007_v17 }
 0x536   :  { %v1197_v61 = vmul.f32 %v3986_v7, %v4031_v60  ;;  %v1223_v32 = vmul.f32 %v3999_v14, %v4031_v60  ;;  %v1249_v47 = vmul.f32 %v4046_v35, %v4031_v60  ;;  %v2278_v48 = vsel %vm1312_vm3, %v2276_v44, %v2277_v42 }
 0x537   :  { %2124 = vrot.lane.b32.xlu1 %v2115_v2, %s3638_s3  ;;  %1230 = vrot.lane.b32.xlu0 %v1222_v16, %s3638_s3  ;;  %v2469_v51 = vrot.slane %v4064_v43, 2  ;;  %v1275_v55 = vmul.f32 %v4075_v41, %v4031_v60  ;;  %v2237_v10 = vrot.slane %v2225_v62, 1  ;;  %v1568_v13 = vmul.f32 %v4095_v58, %v4107_v3 }
 0x538   :  { %v4016_v21 = vld [vmem:[#allocation4 + $0x50] sm:$0xff]  ;;  %v4082_v54 = vld [vmem:[#allocation4 + $0x18] sm:$0xff]  ;;  %v2236_v15 = vrot.slane %v2224_v4, 1  ;;  %v1566_v4 = vmul.f32 %v4095_v58, %v3992_v9 }
 0x539   :  { %v2091_v23 = vmul.f32 %v2087_v0, %v4016_v21  ;;  %v2117_v49 = vmul.f32 %v2113_v63, %v4016_v21  ;;  %v2169_v40 = vmul.f32 %v2165_v24, %v4016_v21  ;;  %v2470_v45 = vsel %vm1505_vm4, %v2468_v52, %v2469_v51  ;;  %v4105_v0 = vld [vmem:[#allocation4 + $0x40] sm:$0xf] }
 0x53a   :  { %v1198_v56 = vmul.f32 %v3986_v7, %v4082_v54  ;;  %v4103_v63 = vmul.f32 %v4095_v58, %v4031_v60  ;;  %v2143_v5 = vmul.f32 %v4009_v18, %v4016_v21  ;;  %v2226_v11 = vmul.f32 %v4093_v57, %v4105_v0 }
 0x53b   :  { %2148 = vrot.lane.b32.xlu1 %v2140_v19, %s3640_s28  ;;  %2100 = vrot.lane.b32.xlu0 %v2090_v20, %s3639_s26  ;;  %v1581_v2 = vrot.slane %v1568_v13, 2  ;;  %v1224_v16 = vmul.f32 %v3999_v14, %v4082_v54  ;;  %v2266_v19 = vmul.f32 %v4044_v34, %v4105_v0 }
 0x53c   :  { %v4097_v59 = vld [vmem:[#allocation4 + $0x20] sm:$0xff]  ;;  %v1579_v12 = vrot.slane %v4103_v63, 2  ;;  %v2239_v18 = vrot.slane %v2226_v11, 1  ;;  %v2458_v63 = vmul.f32 %v4059_v37, %v4105_v0 }
 0x53d   :  { %v1199_v6 = vmul.f32 %v3986_v7, %v4097_v59  ;;  %v2238_v7 = vsel %vm1312_vm3, %v2236_v15, %v2237_v10 }
 0x53e   :  { %v4132_v20 = vsel %vm1505_vm4, %v1579_v12, %v1581_v2  ;;  %v2240_v24 = vsel %vm1312_vm3, %v2237_v10, %v2239_v18  ;;  %v1578_v2 = vrot.slane %v1566_v4, 2 }
 0x53f   :  { %2150 = vrot.lane.b32.xlu1 %v2141_v22, %s3640_s28  ;;  %2102 = vrot.lane.b32.xlu0 %v2091_v23, %s3639_s26  ;;  %v1225_v22 = vmul.f32 %v3999_v14, %v4097_v59  ;;  %v4138_v23 = vstv %s3167_s15  ;;  %v1250_v14 = vmul.f32 %v4046_v35, %v4082_v54  ;;  %s3139_s15 = sld [smem:[#allocation9 + $0x5]] }
 0x543   :  { %2174 = vrot.lane.b32.xlu1 %v2166_v25, %s3641_s29  ;;  %2126 = vrot.lane.b32.xlu0 %v2116_v26, %s3638_s3  ;;  %v2279_v25 = vrot.slane %v2266_v19, 1  ;;  %v2305_v26 = vmul.f32 %v4138_v23, %v3990_v8 }
 0x547   :  { %2176 = vrot.lane.b32.xlu1 %v2167_v27, %s3641_s29  ;;  %2128 = vrot.lane.b32.xlu0 %v2117_v49, %s3638_s3  ;;  %v2304_v27 = vmul.f32 %v4138_v23, %v3980_v1  ;;  %v2280_v49 = vsel %vm1312_vm3, %v2277_v42, %v2279_v25  ;;  %v2345_v42 = vmul.f32 %v4158_v38, %v3990_v8 }
 0x548   :  { %v1580_v25 = vsel %vm1505_vm4, %v1578_v2, %v1579_v12 }
 0x54b   :  { %1206 = vrot.lane.b32.xlu1 %v1197_v61, %s3639_s26  ;;  %2152 = vrot.lane.b32.xlu0 %v2142_v31, %s3640_s28  ;;  %v2317_v61 = vrot.slane %v2305_v26, 1  ;;  %v2306_v31 = vmul.f32 %v4138_v23, %v4105_v0 }
 0x54f   :  { %1232 = vrot.lane.b32.xlu1 %v1223_v32, %s3638_s3  ;;  %2178 = vrot.lane.b32.xlu0 %v2168_v33, %s3641_s29  ;;  %v2316_v32 = vrot.slane %v2304_v27, 1  ;;  %v1276_v33 = vmul.f32 %v4075_v41, %v4082_v54 }
 0x551   :  { %v2318_v36 = vsel %vm1312_vm3, %v2316_v32, %v2317_v61 }
 0x553   :  { %1256 = vrot.lane.b32.xlu1 %v1248_v39, %s3640_s28  ;;  %2180 = vrot.lane.b32.xlu0 %v2169_v40, %s3641_s29  ;;  %v4160_v39 = vstv %s3141_s17  ;;  %v2319_v40 = vrot.slane %v2306_v31, 1  ;;  %s4865_s17 = sld [smem:[#allocation9 + $0xa]] }
 0x554   :  { %v4167_v44 = vmul.f32 %v4160_v39, %v4031_v60 }
 0x555   :  { %v2320_v52 = vsel %vm1312_vm3, %v2317_v61, %v2319_v40  ;;  %v4231_v40 = vld [vmem:[#allocation4 + $0x58] sm:$0xf] }
 0x556   :  { %v2229_v4 = vmul.f32 %v4093_v57, %v4231_v40 }
 0x557   :  { %1258 = vrot.lane.b32.xlu1 %v1249_v47, %s3640_s28  ;;  %2286 = vrot.lane.b32.xlu0 %v2278_v48, %s3638_s3  ;;  %v1373_v47 = vmul.f32 %v4160_v39, %v3992_v9  ;;  %v1277_v48 = vmul.f32 %v4075_v41, %v4097_v59 }
 0x559   :  { %v1385_v62 = vrot.slane %v1373_v47, 1  ;;  %v4237_v47 = vstv %s3172_s4  ;;  %s5043_s4 = sld [smem:[#allocation9 + $0x2f]] }
 0x55b   :  { %1282 = vrot.lane.b32.xlu1 %v1274_v53, %s3641_s29  ;;  %2478 = vrot.lane.b32.xlu0 %v2470_v45, %s3638_s3  ;;  %v2357_v53 = vrot.slane %v2345_v42, 1  ;;  %v1386_v45 = vrot.slane %v4167_v44, 1 }
 0x55d   :  { %v1387_v11 = vsel %vm1312_vm3, %v1385_v62, %v1386_v45  ;;  %v2497_v62 = vmul.f32 %v4237_v47, %v3990_v8 }
 0x55f   :  { %1284 = vrot.lane.b32.xlu1 %v1275_v55, %s3641_s29  ;;  %1208 = vrot.lane.b32.xlu0 %v1198_v56, %s3639_s26  ;;  %v2346_v55 = vmul.f32 %v4158_v38, %v4105_v0  ;;  %v2356_v56 = vrot.slane %v2344_v46, 1  ;;  %v2227_v46 = vmul.f32 %v4093_v57, %v4007_v17 }
 0x561   :  { %v2358_v10 = vsel %vm1312_vm3, %v2356_v56, %v2357_v53  ;;  %v2359_v13 = vrot.slane %v2346_v55, 1 }
 0x563   :  { %2154 = vrot.lane.b32.xlu1 %v2143_v5, %s3640_s28  ;;  %1210 = vrot.lane.b32.xlu0 %v1199_v6, %s3639_s26  ;;  %v4185_v5 = vstv %s3170_s19  ;;  %v4189_v6 = vstv %s3151_s20  ;;  %s4963_s19 = sld [smem:[#allocation9 + $0x2c]]  ;;  %s4998_s20 = sld [smem:[#allocation9 + $0x2e]] }
 0x564   :  { %v2417_v41 = vmul.f32 %v4185_v5, %v3990_v8  ;;  %v4197_v15 = vmul.f32 %v4189_v6, %v4031_v60  ;;  %v2418_v19 = vmul.f32 %v4185_v5, %v4105_v0 }
 0x566   :  { %v2429_v18 = vrot.slane %v2417_v41, 2  ;;  %v5479_v26 = vrot.slane %v4197_v15, 3  ;;  %v2431_v31 = vrot.slane %v2418_v19, 2  ;;  %v2268_v19 = vmul.f32 %v4044_v34, %v4016_v21 }
 0x567   :  { %2246 = vrot.lane.b32.xlu1 %v2238_v7, %s3639_s26  ;;  %1234 = vrot.lane.b32.xlu0 %v1224_v16, %s3638_s3  ;;  %v2416_v16 = vmul.f32 %v4185_v5, %v3980_v1  ;;  %v1759_v7 = vmul.f32 %v4189_v6, %v3992_v9 }
 0x56b   :  { %2248 = vrot.lane.b32.xlu1 %v2240_v24, %s3639_s26  ;;  %1236 = vrot.lane.b32.xlu0 %v1225_v22, %s3638_s3  ;;  %v4207_v22 = vstv %s3156_s21  ;;  %v2360_v24 = vsel %vm1312_vm3, %v2357_v53, %v2359_v13  ;;  %v4240_v53 = vstv %s3142_s22  ;;  %v2496_v13 = vmul.f32 %v4237_v47, %v3980_v1  ;;  %s5017_s21 = sld [smem:[#allocation9 + $0xf]]  ;;  %s5065_s22 = sld [smem:[#allocation9 + $0x30]] }
 0x56c   :  { %v4216_v27 = vmul.f32 %v4207_v22, %v4031_v60  ;;  %v1952_v61 = vmul.f32 %v4207_v22, %v3992_v9  ;;  %v4253_v41 = vmul.f32 %v4240_v53, %v4097_v59 }
 0x56e   :  { %v1964_v42 = vrot.slane %v1952_v61, 4 }
 0x56f   :  { %2288 = vrot.lane.b32.xlu1 %v2280_v49, %s3638_s3  ;;  %1260 = vrot.lane.b32.xlu0 %v1250_v14, %s3640_s28  ;;  %v2428_v14 = vrot.slane %v2416_v16, 2  ;;  %v1771_v49 = vrot.slane %v1759_v7, 3  ;;  %v2509_v7 = vrot.slane %v2497_v62, 2 }
 0x571   :  { %v2430_v12 = vsel %vm1505_vm4, %v2428_v14, %v2429_v18  ;;  %v1773_v32 = vsel %vm1698_vm5, %v1771_v49, %v5479_v26  ;;  %v4274_v14 = vstv %s3173_s30  ;;  %s5107_s30 = sld [smem:[#allocation9 + $0x31]] }
 0x572   :  { %v2537_v61 = vmul.f32 %v4274_v14, %v3990_v8  ;;  %v2538_v62 = vmul.f32 %v4274_v14, %v4105_v0 }
 0x573   :  { %2326 = vrot.lane.b32.xlu1 %v2318_v36, %s3640_s28  ;;  %1286 = vrot.lane.b32.xlu0 %v1276_v33, %s3641_s29  ;;  %v5478_v33 = vrot.slane %v4216_v27, 4  ;;  %v2228_v36 = vmul.f32 %v4093_v57, %v4016_v21  ;;  %v2498_v57 = vmul.f32 %v4237_v47, %v4105_v0  ;;  %v2348_v0 = vmul.f32 %v4158_v38, %v4016_v21 }
 0x575   :  { %v1966_v55 = vsel %vm1891_vm6, %v1964_v42, %v5478_v33  ;;  %v2242_v56 = vrot.slane %v2228_v36, 1  ;;  %v2511_v49 = vrot.slane %v2498_v57, 2  ;;  %v2269_v36 = vmul.f32 %v4044_v34, %v4231_v40 }
 0x576   :  { %v2536_v42 = vmul.f32 %v4274_v14, %v3980_v1  ;;  %v2551_v57 = vrot.slane %v2538_v62, 2  ;;  %v1375_v62 = vmul.f32 %v4160_v39, %v4107_v3 }
 0x577   :  { %2328 = vrot.lane.b32.xlu1 %v2320_v52, %s3640_s28  ;;  %1288 = vrot.lane.b32.xlu0 %v1277_v48, %s3641_s29  ;;  %v2432_v48 = vsel %vm1505_vm4, %v2429_v18, %v2431_v31  ;;  %v2471_v52 = vrot.slane %v2458_v63, 2  ;;  %v2244_v18 = vrot.slane %v2229_v4, 1  ;;  %v4297_v4 = vmul.f32 %v4138_v23, %v4016_v21 }
 0x578   :  { %v2548_v1 = vrot.slane %v2536_v42, 2 }
 0x579   :  { %v2472_v2 = vsel %vm1505_vm4, %v2469_v51, %v2471_v52  ;;  %v2508_v51 = vrot.slane %v2496_v13, 2  ;;  %v2512_v52 = vsel %vm1505_vm4, %v2509_v7, %v2511_v49  ;;  %v2362_v49 = vrot.slane %v2348_v0, 1 }
 0x57b   :  { %2366 = vrot.lane.b32.xlu1 %v2358_v10, %s3641_s29  ;;  %1395 = vrot.lane.b32.xlu0 %v1387_v11, %s3638_s3  ;;  %v4255_v10 = vld [vmem:[#allocation4 + $0x28] sm:$0xf]  ;;  %v2241_v11 = vrot.slane %v2227_v46, 1  ;;  %v2510_v63 = vsel %vm1505_vm4, %v2508_v51, %v2509_v7 }
 0x57c   :  { %v1418_v43 = vmul.f32 %v4240_v53, %v4255_v10  ;;  %v1378_v33 = vmul.f32 %v4160_v39, %v4255_v10 }
 0x57d   :  { %v2243_v16 = vsel %vm1312_vm3, %v2241_v11, %v2242_v56  ;;  %v2307_v11 = vmul.f32 %v4138_v23, %v4007_v17 }
 0x57e   :  { %v1433_v31 = vrot.slane %v1418_v43, 1 }
 0x57f   :  { %2368 = vrot.lane.b32.xlu1 %v2360_v24, %s3641_s29  ;;  %1588 = vrot.lane.b32.xlu0 %v1580_v25, %s3638_s3  ;;  %v5480_v24 = vrot.slane %v4253_v41, 1  ;;  %v2267_v25 = vmul.f32 %v4044_v34, %v4007_v17  ;;  %v2284_v34 = vrot.slane %v2269_v36, 1  ;;  %v2321_v7 = vrot.slane %v2307_v11, 1 }
 0x581   :  { %v4289_v46 = vsel %vm1312_vm3, %v5480_v24, %v1433_v31  ;;  %v4491_v24 = vstv %s3148_s1  ;;  %s3179_s1 = sld [smem:[#allocation9 + $0x2d]] }
 0x583   :  { %2438 = vrot.lane.b32.xlu1 %v2430_v12, %s3639_s26  ;;  %1781 = vrot.lane.b32.xlu0 %v1773_v32, %s3638_s3  ;;  %v2245_v12 = vsel %vm1312_vm3, %v2242_v56, %v2244_v18  ;;  %v2282_v32 = vrot.slane %v2268_v19, 1  ;;  %v2347_v18 = vmul.f32 %v4158_v38, %v4007_v17  ;;  %v4312_v19 = vstv %s3140_s23 }
 0x584   :  { %v1334_v43 = vmul.f32 %v4312_v19, %v4031_v60  ;;  %v1333_v31 = vmul.f32 %v4312_v19, %v3992_v9 }
 0x587   :  { %2440 = vrot.lane.b32.xlu1 %v2432_v48, %s3639_s26  ;;  %1974 = vrot.lane.b32.xlu0 %v1966_v55, %s3638_s3  ;;  %v2281_v48 = vrot.slane %v2267_v25, 1  ;;  %v2549_v55 = vrot.slane %v2537_v61, 2  ;;  %v2349_v61 = vmul.f32 %v4158_v38, %v4231_v40  ;;  %v2420_v38 = vmul.f32 %v4185_v5, %v4016_v21 }
 0x589   :  { %v2283_v56 = vsel %vm1312_vm3, %v2281_v48, %v2282_v32  ;;  %v2550_v13 = vsel %vm1505_vm4, %v2548_v1, %v2549_v55  ;;  %v2552_v51 = vsel %vm1505_vm4, %v2549_v55, %v2551_v57  ;;  %v2364_v42 = vrot.slane %v2349_v61, 1 }
 0x58a   :  { %v1335_v48 = vmul.f32 %v4312_v19, %v4107_v3  ;;  %v2419_v55 = vmul.f32 %v4185_v5, %v4007_v17  ;;  %v1413_v61 = vmul.f32 %v4240_v53, %v3992_v9 }
 0x58b   :  { %2480 = vrot.lane.b32.xlu1 %v2472_v2, %s3638_s3  ;;  %2250 = vrot.lane.b32.xlu0 %v2243_v16, %s3639_s26  ;;  %v2285_v2 = vsel %vm1312_vm3, %v2282_v32, %v2284_v34  ;;  %v5477_v16 = vrot.slane %v4297_v4, 1  ;;  %v1346_v32 = vrot.slane %v1334_v43, 1  ;;  %v2365_v1 = vsel %vm1312_vm3, %v2362_v49, %v2364_v42 }
 0x58c   :  { %v1348_v11 = vrot.slane %v1335_v48, 1  ;;  %v2433_v57 = vrot.slane %v2419_v55, 2  ;;  %v1414_v43 = vmul.f32 %v4240_v53, %v4031_v60  ;;  %v1425_v55 = vrot.slane %v1413_v61, 1 }
 0x58d   :  { %v2323_v25 = vsel %vm1312_vm3, %v2321_v7, %v5477_v16 }
 0x58f   :  { %2518 = vrot.lane.b32.xlu1 %v2510_v63, %s3640_s28  ;;  %2252 = vrot.lane.b32.xlu0 %v2245_v12, %s3639_s26  ;;  %v2361_v63 = vrot.slane %v2347_v18, 1  ;;  %v1251_v12 = vmul.f32 %v4046_v35, %v4097_v59  ;;  %v1388_v18 = vrot.slane %v1375_v62, 1  ;;  %v4379_v62 = vstv %s3143_s0  ;;  %s3159_s0 = sld [smem:[#allocation9 + $0x19]] }
 0x591   :  { %v2363_v36 = vsel %vm1312_vm3, %v2361_v63, %v2362_v49 }
 0x593   :  { %2520 = vrot.lane.b32.xlu1 %v2512_v52, %s3640_s28  ;;  %2290 = vrot.lane.b32.xlu0 %v2283_v56, %s3638_s3  ;;  %v1345_v52 = vrot.slane %v1333_v31, 1  ;;  %v2459_v31 = vmul.f32 %v4059_v37, %v4007_v17 }
 0x595   :  { %v1347_v34 = vsel %vm1312_vm3, %v1345_v52, %v1346_v32  ;;  %v2461_v52 = vmul.f32 %v4059_v37, %v4231_v40 }
 0x597   :  { %2558 = vrot.lane.b32.xlu1 %v2550_v13, %s3641_s29  ;;  %2292 = vrot.lane.b32.xlu0 %v2285_v2, %s3638_s3  ;;  %v2434_v13 = vrot.slane %v2420_v38, 2  ;;  %v2421_v2 = vmul.f32 %v4185_v5, %v4231_v40  ;;  %v2460_v5 = vmul.f32 %v4059_v37, %v4016_v21  ;;  %v1415_v38 = vmul.f32 %v4240_v53, %v4107_v3 }
 0x599   :  { %v2436_v49 = vrot.slane %v2421_v2, 2  ;;  %v2474_v48 = vrot.slane %v2460_v5, 2  ;;  %v2476_v2 = vrot.slane %v2461_v52, 2  ;;  %v1455_v5 = vmul.f32 %v4379_v62, %v4107_v3 }
 0x59b   :  { %2560 = vrot.lane.b32.xlu1 %v2552_v51, %s3641_s29  ;;  %2330 = vrot.lane.b32.xlu0 %v2323_v25, %s3640_s28  ;;  %v1349_v51 = vsel %vm1312_vm3, %v1346_v32, %v1348_v11  ;;  %v2435_v25 = vsel %vm1505_vm4, %v2433_v57, %v2434_v13  ;;  %v1389_v32 = vsel %vm1312_vm3, %v1386_v45, %v1388_v18 }
 0x59c   :  { %v2437_v42 = vsel %vm1505_vm4, %v2434_v13, %v2436_v49  ;;  %v1454_v11 = vmul.f32 %v4379_v62, %v4031_v60  ;;  %v1428_v13 = vrot.slane %v1415_v38, 1  ;;  %v4391_v57 = vmul.f32 %v4237_v47, %v4016_v21 }
 0x59d   :  { %v1453_v18 = vmul.f32 %v4379_v62, %v3992_v9 }
 0x59e   :  { %v1466_v49 = vrot.slane %v1454_v11, 1  ;;  %v4419_v11 = vstv %s3145_s11  ;;  %s3164_s11 = sld [smem:[#allocation9 + $0x1e]] }
 0x59f   :  { %1262 = vrot.lane.b32.xlu1 %v1251_v12, %s3640_s28  ;;  %2370 = vrot.lane.b32.xlu0 %v2363_v36, %s3641_s29  ;;  %v1426_v36 = vrot.slane %v1414_v43, 1  ;;  %v2499_v43 = vmul.f32 %v4237_v47, %v4007_v17  ;;  %v1465_v38 = vrot.slane %v1453_v18, 1  ;;  %v1338_v18 = vmul.f32 %v4312_v19, %v4255_v10 }
 0x5a1   :  { %v4337_v56 = vpop.permute.xlu1 %2096  ;;  %v4339_v35 = vpop.permute.xlu0 %2122  ;;  %v1429_v61 = vsel %vm1312_vm3, %v1426_v36, %v1428_v13  ;;  %v2513_v52 = vrot.slane %v2499_v43, 2 }
 0x5a2   :  { %5491 = vst [vmem:[#allocation18_spill] sm:$0xff] %v4337_v56  ;;  %5492 = vst [vmem:[#allocation19_spill] sm:$0xff] %v4339_v35 }
 0x5a3   :  { %1355 = vrot.lane.b32.xlu1 %v1347_v34, %s3639_s26  ;;  %2372 = vrot.lane.b32.xlu0 %v2365_v1, %s3641_s29  ;;  %v2473_v34 = vrot.slane %v2459_v31, 2  ;;  %v1427_v1 = vsel %vm1312_vm3, %v1425_v55, %v1426_v36  ;;  %v2477_v31 = vsel %vm1505_vm4, %v2474_v48, %v2476_v2  ;;  %v1336_v55 = vmul.f32 %v4312_v19, %v4082_v54 }
 0x5a4   :  { %v1467_v36 = vsel %vm1312_vm3, %v1465_v38, %v1466_v49  ;;  %v1527_v2 = vmul.f32 %v4419_v11, %v4031_v60  ;;  %v1528_v38 = vmul.f32 %v4419_v11, %v4107_v3 }
 0x5a5   :  { %v4349_v0 = vpop.permute.xlu1 %2098  ;;  %v4351_v7 = vpop.permute.xlu0 %1204  ;;  %v2475_v37 = vsel %vm1505_vm4, %v2473_v34, %v2474_v48  ;;  %v1468_v48 = vrot.slane %v1455_v5, 1  ;;  %v1350_v43 = vrot.slane %v1336_v55, 1  ;;  %v1526_v5 = vmul.f32 %v4419_v11, %v3992_v9 }
 0x5a6   :  { %5493 = vst [vmem:[#allocation20_spill] sm:$0xff] %v4349_v0  ;;  %v1377_v55 = vmul.f32 %v4160_v39, %v4097_v59 }
 0x5a7   :  { %1357 = vrot.lane.b32.xlu1 %v1349_v51, %s3639_s26  ;;  %2442 = vrot.lane.b32.xlu0 %v2435_v25, %s3639_s26 }
 0x5a9   :  { %v4365_v63 = vpop.permute.xlu1 %2124  ;;  %v4367_v12 = vpop.permute.xlu0 %1230 }
 0x5aa   :  { %5494 = vst [vmem:[#allocation21_spill] sm:$0xff] %v4365_v63  ;;  %v1954_v63 = vmul.f32 %v4207_v22, %v4107_v3 }
 0x5ab   :  { %1397 = vrot.lane.b32.xlu1 %v1389_v32, %s3638_s3  ;;  %2444 = vrot.lane.b32.xlu0 %v2437_v42, %s3639_s26  ;;  %v5476_v32 = vrot.slane %v4391_v57, 2  ;;  %v1337_v42 = vmul.f32 %v4312_v19, %v4097_v59 }
 0x5ad   :  { %v4381_v44 = vpop.permute.xlu1 %2148  ;;  %v4383_v45 = vpop.permute.xlu0 %2100  ;;  %v1351_v13 = vrot.slane %v1337_v42, 1  ;;  %v1469_v42 = vsel %vm1312_vm3, %v1466_v49, %v1468_v48  ;;  %v1541_v48 = vrot.slane %v1528_v38, 2 }
 0x5ae   :  { %5495 = vst [vmem:[#allocation22_spill] sm:$0xff] %v4381_v44  ;;  %5496 = vst [vmem:[#allocation23_spill] sm:$0xff] %v4383_v45 }
 0x5af   :  { %1435 = vrot.lane.b32.xlu1 %v1427_v1, %s3640_s28  ;;  %2482 = vrot.lane.b32.xlu0 %v2475_v37, %s3638_s3  ;;  %v2515_v37 = vsel %vm1505_vm4, %v2513_v52, %v5476_v32  ;;  %v1352_v19 = vsel %vm1312_vm3, %v1350_v43, %v1351_v13  ;;  %v1539_v52 = vrot.slane %v1527_v2, 2  ;;  %v1376_v32 = vmul.f32 %v4160_v39, %v4082_v54 }
 0x5b0   :  { %v1393_v39 = vrot.slane %v1378_v33, 1 }
 0x5b1   :  { %v4399_v51 = vpop.permute.xlu1 %2150  ;;  %v4401_v25 = vpop.permute.xlu0 %2102 }
 0x5b2   :  { %5497 = vst [vmem:[#allocation24_spill] sm:$0xff] %v4399_v51  ;;  %5498 = vst [vmem:[#allocation25_spill] sm:$0xff] %v4401_v25  ;;  %v1651_v51 = vmul.f32 %v4491_v24, %v4255_v10 }
 0x5b3   :  { %1437 = vrot.lane.b32.xlu1 %v1429_v61, %s3640_s28  ;;  %2484 = vrot.lane.b32.xlu0 %v2477_v31, %s3638_s3 }
 0x5b5   :  { %v4414_v34 = vpop.permute.xlu1 %2174  ;;  %v4416_v1 = vpop.permute.xlu0 %2126 }
 0x5b6   :  { %5499 = vst [vmem:[#allocation26_spill] sm:$0xff] %v4414_v34  ;;  %5500 = vst [vmem:[#allocation27_spill] sm:$0xff] %v4416_v1 }
 0x5b7   :  { %1475 = vrot.lane.b32.xlu1 %v1467_v36, %s3641_s29  ;;  %2522 = vrot.lane.b32.xlu0 %v2515_v37, %s3640_s28  ;;  %v1353_v36 = vrot.slane %v1338_v18, 1  ;;  %v1538_v37 = vrot.slane %v1526_v5, 2  ;;  %v1391_v18 = vrot.slane %v1377_v55, 1  ;;  %v1390_v5 = vrot.slane %v1376_v32, 1 }
 0x5b8   :  { %v1416_v55 = vmul.f32 %v4240_v53, %v4082_v54 }
 0x5b9   :  { %v4432_v61 = vpop.permute.xlu1 %2176  ;;  %v4434_v31 = vpop.permute.xlu0 %2128  ;;  %v1540_v43 = vsel %vm1505_vm4, %v1538_v37, %v1539_v52  ;;  %v1354_v2 = vsel %vm1312_vm3, %v1351_v13, %v1353_v36  ;;  %v1542_v13 = vsel %vm1505_vm4, %v1539_v52, %v1541_v48  ;;  %v1392_v36 = vsel %vm1312_vm3, %v1390_v5, %v1391_v18 }
 0x5ba   :  { %5501 = vst [vmem:[#allocation28_spill] sm:$0xff] %v4432_v61  ;;  %5502 = vst [vmem:[#allocation29_spill] sm:$0xff] %v4434_v31  ;;  %v1394_v33 = vsel %vm1312_vm3, %v1391_v18, %v1393_v39  ;;  %v2540_v48 = vmul.f32 %v4274_v14, %v4016_v21  ;;  %v1430_v53 = vrot.slane %v1416_v55, 1  ;;  %v5507_v21 = vrot.slane %v4253_v41, 1 }
 0x5bb   :  { %1477 = vrot.lane.b32.xlu1 %v1469_v42, %s3641_s29  ;;  %1359 = vrot.lane.b32.xlu0 %v1352_v19, %s3639_s26  ;;  %v4456_v42 = vstv %s3147_s24  ;;  %s3174_s24 = sld [smem:[#allocation9 + $0x28]] }
 0x5bc   :  { %v1607_v38 = vmul.f32 %v4456_v42, %v4031_v60  ;;  %v1606_v32 = vmul.f32 %v4456_v42, %v3992_v9  ;;  %v1608_v52 = vmul.f32 %v4456_v42, %v4107_v3 }
 0x5bd   :  { %v4446_v16 = vpop.permute.xlu1 %1206  ;;  %v4448_v49 = vpop.permute.xlu0 %2152 }
 0x5be   :  { %5503 = vst [vmem:[#allocation30_spill] sm:$0xff] %v4448_v49  ;;  %v1618_v5 = vrot.slane %v1606_v32, 2  ;;  %v1621_v39 = vrot.slane %v1608_v52, 2  ;;  %v1647_v32 = vmul.f32 %v4491_v24, %v4031_v60  ;;  %v1646_v52 = vmul.f32 %v4491_v24, %v3992_v9 }
 0x5bf   :  { %1548 = vrot.lane.b32.xlu1 %v1540_v43, %s3639_s26  ;;  %1361 = vrot.lane.b32.xlu0 %v1354_v2, %s3639_s26  ;;  %v1619_v2 = vrot.slane %v1607_v38, 2  ;;  %v1571_v49 = vmul.f32 %v4095_v58, %v4255_v10 }
 0x5c1   :  { %v4458_v19 = vpop.permute.xlu1 %1232  ;;  %v4460_v26 = vpop.permute.xlu0 %2178  ;;  %v1620_v18 = vsel %vm1505_vm4, %v1618_v5, %v1619_v2 }
 0x5c2   :  { %5504 = vst [vmem:[#allocation31_spill] sm:$0xff] %v4460_v26 }
 0x5c3   :  { %1550 = vrot.lane.b32.xlu1 %v1542_v13, %s3639_s26  ;;  %1399 = vrot.lane.b32.xlu0 %v1392_v36, %s3638_s3  ;;  %v2539_v13 = vmul.f32 %v4274_v14, %v4007_v17  ;;  %v2541_v17 = vmul.f32 %v4274_v14, %v4231_v40  ;;  %v1659_v14 = vrot.slane %v1647_v32, 2  ;;  %v1720_v32 = vmul.f32 %v4518_v50, %v4031_v60 }
 0x5c5   :  { %v4472_v37 = vpop.permute.xlu1 %1256  ;;  %v4474_v43 = vpop.permute.xlu0 %2180  ;;  %v2553_v55 = vrot.slane %v2539_v13, 2  ;;  %v2556_v30 = vrot.slane %v2541_v17, 2  ;;  %v1658_v13 = vrot.slane %v1646_v52, 2  ;;  %v1458_v52 = vmul.f32 %v4379_v62, %v4255_v10 }
 0x5c6   :  { %5505 = vst [vmem:[#allocation32_spill] sm:$0xff] %v4474_v43 }
 0x5c7   :  { %1590 = vrot.lane.b32.xlu1 %v4132_v20, %s3638_s3  ;;  %1401 = vrot.lane.b32.xlu0 %v1394_v33, %s3638_s3  ;;  %v1432_v20 = vsel %vm1312_vm3, %v1430_v53, %v5507_v21  ;;  %v2554_v33 = vrot.slane %v2540_v48, 2  ;;  %v1622_v48 = vsel %vm1505_vm4, %v1619_v2, %v1621_v39  ;;  %v1648_v53 = vmul.f32 %v4491_v24, %v4107_v3 }
 0x5c8   :  { %v1660_v17 = vsel %vm1505_vm4, %v1658_v13, %v1659_v14 }
 0x5c9   :  { %v4486_v38 = vpop.permute.xlu1 %1258  ;;  %v4488_v36 = vpop.permute.xlu0 %2286  ;;  %v2555_v21 = vsel %vm1505_vm4, %v2553_v55, %v2554_v33  ;;  %v1661_v55 = vrot.slane %v1648_v53, 2 }
 0x5ca   :  { %5506 = vst [vmem:[#allocation33_spill] sm:$0xff] %v4488_v36 }
 0x5cb   :  { %1628 = vrot.lane.b32.xlu1 %v1620_v18, %s3640_s28  ;;  %1439 = vrot.lane.b32.xlu0 %v1432_v20, %s3640_s28  ;;  %v1457_v18 = vmul.f32 %v4379_v62, %v4097_v59  ;;  %v1456_v20 = vmul.f32 %v4379_v62, %v4082_v54  ;;  %v1662_v13 = vsel %vm1505_vm4, %v1659_v14, %v1661_v55 }
 0x5cc   :  { %v1721_v62 = vmul.f32 %v4518_v50, %v4107_v3  ;;  %v1761_v55 = vmul.f32 %v4189_v6, %v4107_v3 }
 0x5cd   :  { %v4504_v5 = vpop.permute.xlu1 %1282  ;;  %v4506_v41 = vpop.permute.xlu0 %2478  ;;  %v1471_v28 = vrot.slane %v1457_v18, 1  ;;  %v1470_v29 = vrot.slane %v1456_v20, 1  ;;  %v1473_v18 = vrot.slane %v1458_v52, 1 }
 0x5ce   :  { %5508 = vst [vmem:[#allocation34_spill] sm:$0xff] %v4506_v41  ;;  %v1734_v52 = vrot.slane %v1721_v62, 3  ;;  %v1774_v26 = vrot.slane %v1761_v55, 3 }
 0x5cf   :  { %1630 = vrot.lane.b32.xlu1 %v1622_v48, %s3640_s28  ;;  %2562 = vrot.lane.b32.xlu0 %v2555_v21, %s3641_s29  ;;  %v2557_v48 = vsel %vm1505_vm4, %v2554_v33, %v2556_v30  ;;  %v1719_v21 = vmul.f32 %v4518_v50, %v3992_v9  ;;  %v1732_v30 = vrot.slane %v1720_v32, 3  ;;  %v1472_v33 = vsel %vm1312_vm3, %v1470_v29, %v1471_v28 }
 0x5d0   :  { %v1474_v32 = vsel %vm1312_vm3, %v1471_v28, %v1473_v18 }
 0x5d1   :  { %v4520_v2 = vpop.permute.xlu1 %1284  ;;  %v4522_v39 = vpop.permute.xlu0 %1208  ;;  %v1731_v20 = vrot.slane %v1719_v21, 3  ;;  %v1735_v18 = vsel %vm1698_vm5, %v1732_v30, %v1734_v52 }
 0x5d3   :  { %1668 = vrot.lane.b32.xlu1 %v1660_v17, %s3641_s29  ;;  %2564 = vrot.lane.b32.xlu0 %v2557_v48, %s3641_s29  ;;  %v1530_v17 = vmul.f32 %v4419_v11, %v4097_v59  ;;  %v1529_v48 = vmul.f32 %v4419_v11, %v4082_v54  ;;  %v1733_v29 = vsel %vm1698_vm5, %v1731_v20, %v1732_v30  ;;  %v5513_v30 = vrot.slane %v4197_v15, 3 }
 0x5d4   :  { %v4592_v15 = vstv %s3153_s27 }
 0x5d5   :  { %v4534_v53 = vpop.permute.xlu1 %2154  ;;  %v4536_v43 = vpop.permute.xlu0 %1210  ;;  %v1544_v31 = vrot.slane %v1530_v17, 2  ;;  %v1543_v21 = vrot.slane %v1529_v48, 2  ;;  %v1570_v17 = vmul.f32 %v4095_v58, %v4097_v59  ;;  %v1775_v52 = vsel %vm1698_vm5, %v5513_v30, %v1774_v26 }
 0x5d6   :  { %5509 = vst [vmem:[#allocation35_spill] sm:$0xff] %v4534_v53  ;;  %v1586_v30 = vrot.slane %v1571_v49, 2  ;;  %v1841_v49 = vmul.f32 %v4592_v15, %v4107_v3 }
 0x5d7   :  { %1670 = vrot.lane.b32.xlu1 %v1662_v13, %s3641_s29  ;;  %1479 = vrot.lane.b32.xlu0 %v1472_v33, %s3641_s29  ;;  %v1531_v13 = vmul.f32 %v4419_v11, %v4255_v10  ;;  %v4560_v33 = vstv %s3152_s2  ;;  %v1545_v11 = vsel %vm1505_vm4, %v1543_v21, %v1544_v31  ;;  %s3107_s2 = sshll.u32 %s3642_s25, 4  ;;  %s3108_s2 = int_to_ptr.vmem [resolvable:$true] %s3107_s2 }
 0x5d8   :  { %v1800_v28 = vmul.f32 %v4560_v33, %v4031_v60  ;;  %v1799_v48 = vmul.f32 %v4560_v33, %v3992_v9  ;;  %s3592_s27 = scalar_lea.vmem %s3108_s2, 512  ;;  %p3597_p0 = scmp.lt.s32.totalorder %s3108_s2, %s3108_s2 }
 0x5d9   :  { %v4548_v53 = vpop.permute.xlu1 %2246  ;;  %v4550_v14 = vpop.permute.xlu0 %1234  ;;  %v1546_v62 = vrot.slane %v1531_v13, 2  ;;  %p3593_p13 = scmp.ne.s32.totalorder %s3108_s2, %s3592_s27  ;;  %p3598_p1 = scmp.lt.s32.totalorder %s3592_s27, %s3592_s27 }
 0x5da   :  { %5510 = vst [vmem:[#allocation36_spill] sm:$0xff] %v4548_v53  ;;  %v1812_v13 = vrot.slane %v1800_v28, 3  ;;  %v1811_v1 = vrot.slane %v1799_v48, 3  ;;  %v4604_v48 = vmul.f32 %v4456_v42, %v4097_v59 }
 0x5db   :  { %1741 = vrot.lane.b32.xlu1 %v1733_v29, %s3639_s26  ;;  %1481 = vrot.lane.b32.xlu0 %v1474_v32, %s3641_s29  ;;  %v1569_v29 = vmul.f32 %v4095_v58, %v4082_v54  ;;  %v1547_v21 = vsel %vm1505_vm4, %v1544_v31, %v1546_v62  ;;  %v1840_v62 = vmul.f32 %v4592_v15, %v4031_v60  ;;  %p3599_p2 = por %p3598_p1, %p3597_p0 }
 0x5dc   :  { %v1813_v31 = vsel %vm1698_vm5, %v1811_v1, %v1812_v13  ;;  %v1609_v1 = vmul.f32 %v4456_v42, %v4082_v54 }
 0x5dd   :  { %v4562_v25 = vpop.permute.xlu1 %2248  ;;  %v4564_v20 = vpop.permute.xlu0 %1236  ;;  %v1583_v45 = vrot.slane %v1569_v29, 2  ;;  %v1839_v29 = vmul.f32 %v4592_v15, %v3992_v9  ;;  %p3600_p3 = pnand %p3599_p2, %p3593_p13 }
 0x5de   :  { %5511 = vst [vmem:[#allocation37_spill] sm:$0xff] %v4562_v25  ;;  %v4629_v25 = vld [vmem:[#allocation4 + $0x30] sm:$0xff] }
 0x5df   :  { %1743 = vrot.lane.b32.xlu1 %v1735_v18, %s3639_s26  ;;  %1552 = vrot.lane.b32.xlu0 %v1545_v11, %s3639_s26  ;;  %v1584_v18 = vrot.slane %v1570_v17, 2  ;;  %v1801_v11 = vmul.f32 %v4560_v33, %v4107_v3 }
 0x5e1   :  { %v4578_v55 = vpop.permute.xlu1 %2288  ;;  %v4580_v32 = vpop.permute.xlu0 %1260  ;;  %v1585_v58 = vsel %vm1505_vm4, %v1583_v45, %v1584_v18  ;;  %v1814_v17 = vrot.slane %v1801_v11, 3  ;;  %v1852_v45 = vrot.slane %v1840_v62, 3  ;;  %v4618_v11 = vstv %s3176_s9 }
 0x5e2   :  { %5512 = vst [vmem:[#allocation38_spill] sm:$0xff] %v4578_v55  ;;  %v5485_v55 = vrot.slane %v4604_v48, 2  ;;  %v4625_v9 = vmul.f32 %v4618_v11, %v3990_v8  ;;  %v1851_v62 = vrot.slane %v1839_v29, 3  ;;  %v2648_v41 = vmul.f32 %v4629_v25, %v4618_v11 }
 0x5e3   :  { %1783 = vrot.lane.b32.xlu1 %v1775_v52, %s3638_s3  ;;  %1554 = vrot.lane.b32.xlu0 %v1547_v21, %s3639_s26  ;;  %v4638_v8 = vstv %s3155_s10 }
 0x5e5   :  { %v4594_v26 = vpop.permute.xlu1 %2326  ;;  %v4596_v28 = vpop.permute.xlu0 %1286 }
 0x5e6   :  { %5514 = vst [vmem:[#allocation39_spill] sm:$0xff] %v4594_v26 }
 0x5e7   :  { %1821 = vrot.lane.b32.xlu1 %v1813_v31, %s3640_s28  ;;  %1592 = vrot.lane.b32.xlu0 %v1585_v58, %s3638_s3  ;;  %v1815_v31 = vsel %vm1698_vm5, %v1812_v13, %v1814_v17  ;;  %v1587_v58 = vsel %vm1505_vm4, %v1584_v18, %v1586_v30  ;;  %v1853_v17 = vsel %vm1698_vm5, %v1851_v62, %v1852_v45  ;;  %v1854_v30 = vrot.slane %v1841_v49, 3  ;;  %v4650_v49 = vld [vmem:[#allocation4] sm:$0xff] }
 0x5e8   :  { %v2660_v62 = vrot.slane %v2648_v41, 3  ;;  %v5518_v41 = vrot.slane %v4625_v9, 3 }
 0x5e9   :  { %v4612_v52 = vpop.permute.xlu1 %2328  ;;  %v4614_v21 = vpop.permute.xlu0 %1288 }
 0x5ea   :  { %5515 = vst [vmem:[#allocation40_spill] sm:$0xff] %v4612_v52  ;;  %v1623_v52 = vrot.slane %v1609_v1, 2  ;;  %v1913_v1 = vmul.f32 %v4638_v8, %v4031_v60  ;;  %v1855_v60 = vsel %vm1698_vm5, %v1852_v45, %v1854_v30 }
 0x5eb   :  { %1823 = vrot.lane.b32.xlu1 %v1815_v31, %s3640_s28  ;;  %1594 = vrot.lane.b32.xlu0 %v1587_v58, %s3638_s3  ;;  %v1650_v58 = vmul.f32 %v4491_v24, %v4097_v59 }
 0x5ec   :  { %v1625_v31 = vsel %vm1505_vm4, %v1623_v52, %v5485_v55  ;;  %v1649_v52 = vmul.f32 %v4491_v24, %v4082_v54  ;;  %v1925_v61 = vrot.slane %v1913_v1, 4  ;;  %v1723_v24 = vmul.f32 %v4518_v50, %v4097_v59 }
 0x5ed   :  { %v4633_v13 = vpop.permute.xlu1 %2366  ;;  %v4635_v18 = vpop.permute.xlu0 %1395  ;;  %v1664_v26 = vrot.slane %v1650_v58, 2 }
 0x5ee   :  { %5516 = vst [vmem:[#allocation41_spill] sm:$0xff] %v4633_v13  ;;  %v1912_v13 = vmul.f32 %v4650_v49, %v4638_v8  ;;  %v1663_v36 = vrot.slane %v1649_v52, 2 }
 0x5ef   :  { %1861 = vrot.lane.b32.xlu1 %v1853_v17, %s3641_s29  ;;  %1632 = vrot.lane.b32.xlu0 %v1625_v31, %s3640_s28  ;;  %v1914_v17 = vmul.f32 %v4638_v8, %v4107_v3  ;;  %v2662_v31 = vsel %vm1698_vm5, %v2660_v62, %v5518_v41  ;;  %v1666_v62 = vrot.slane %v1651_v51, 2  ;;  %v1737_v41 = vrot.slane %v1723_v24, 3 }
 0x5f0   :  { %v1665_v58 = vsel %vm1505_vm4, %v1663_v36, %v1664_v26  ;;  %v4689_v36 = vstv %s3157_s5 }
 0x5f1   :  { %v4656_v55 = vpop.permute.xlu1 %2368  ;;  %v4658_v29 = vpop.permute.xlu0 %1588  ;;  %v1927_v53 = vrot.slane %v1914_v17, 4  ;;  %v1967_v17 = vrot.slane %v1954_v63, 4  ;;  %v1667_v51 = vsel %vm1505_vm4, %v1664_v26, %v1666_v62  ;;  %v1992_v63 = vmul.f32 %v4650_v49, %v4689_v36 }
 0x5f2   :  { %5517 = vst [vmem:[#allocation42_spill] sm:$0xff] %v4656_v55  ;;  %v1924_v55 = vrot.slane %v1912_v13, 4  ;;  %v1722_v13 = vmul.f32 %v4518_v50, %v4082_v54  ;;  %v5524_v26 = vrot.slane %v4216_v27, 4  ;;  %v1994_v24 = vmul.f32 %v4689_v36, %v4107_v3 }
 0x5f3   :  { %1863 = vrot.lane.b32.xlu1 %v1855_v60, %s3641_s29  ;;  %2670 = vrot.lane.b32.xlu0 %v2662_v31, %s3638_s3  ;;  %v4692_v31 = vld [vmem:[#allocation4 + $0x8] sm:$0xff]  ;;  %v1762_v27 = vmul.f32 %v4189_v6, %v4082_v54 }
 0x5f4   :  { %v1926_v1 = vsel %vm1891_vm6, %v1924_v55, %v1925_v61  ;;  %v1928_v55 = vsel %vm1891_vm6, %v1925_v61, %v1927_v53  ;;  %v1968_v62 = vsel %vm1891_vm6, %v5524_v26, %v1967_v17 }
 0x5f5   :  { %v4670_v45 = vpop.permute.xlu1 %2438  ;;  %v4672_v30 = vpop.permute.xlu0 %1781 }
 0x5f6   :  { %5519 = vst [vmem:[#allocation43_spill] sm:$0xff] %v4670_v45 }
 0x5f7   :  { %1934 = vrot.lane.b32.xlu1 %v1926_v1, %s3639_s26  ;;  %1672 = vrot.lane.b32.xlu0 %v1665_v58, %s3641_s29  ;;  %v1993_v1 = vmul.f32 %v4692_v31, %v4689_v36  ;;  %v1724_v58 = vmul.f32 %v4518_v50, %v4255_v10 }
 0x5f9   :  { %v4684_v52 = vpop.permute.xlu1 %2440  ;;  %v4686_v60 = vpop.permute.xlu0 %1974  ;;  %v1739_v45 = vrot.slane %v1724_v58, 3 }
 0x5fa   :  { %5520 = vst [vmem:[#allocation44_spill] sm:$0xff] %v4684_v52  ;;  %5521 = vst [vmem:[#allocation45_spill] sm:$0xff] %v4686_v60  ;;  %v1736_v52 = vrot.slane %v1722_v13, 3  ;;  %v1763_v13 = vmul.f32 %v4189_v6, %v4097_v59 }
 0x5fb   :  { %1936 = vrot.lane.b32.xlu1 %v1928_v55, %s3639_s26  ;;  %1674 = vrot.lane.b32.xlu0 %v1667_v51, %s3641_s29  ;;  %v2005_v55 = vrot.slane %v1993_v1, 4  ;;  %v2004_v51 = vrot.slane %v1992_v63, 4  ;;  %v1764_v63 = vmul.f32 %v4189_v6, %v4255_v10 }
 0x5fc   :  { %v1738_v50 = vsel %vm1698_vm5, %v1736_v52, %v1737_v41  ;;  %v2007_v52 = vrot.slane %v1994_v24, 4  ;;  %v1776_v24 = vrot.slane %v1762_v27, 3 }
 0x5fd   :  { %v4702_v61 = vpop.permute.xlu1 %2480  ;;  %v4704_v53 = vpop.permute.xlu0 %2250  ;;  %v2006_v58 = vsel %vm1891_vm6, %v2004_v51, %v2005_v55  ;;  %v4744_v51 = vmul.f32 %v4560_v33, %v4097_v59  ;;  %v4757_v59 = vstv %s3175_s13 }
 0x5fe   :  { %5522 = vst [vmem:[#allocation46_spill] sm:$0xff] %v4702_v61  ;;  %5523 = vst [vmem:[#allocation47_spill] sm:$0xff] %v4704_v53  ;;  %v4718_v53 = vstv %s3158_s12 }
 0x5ff   :  { %1976 = vrot.lane.b32.xlu1 %v1968_v62, %s3638_s3  ;;  %1745 = vrot.lane.b32.xlu0 %v1738_v50, %s3639_s26  ;;  %v2033_v1 = vmul.f32 %v4692_v31, %v4718_v53  ;;  %v1740_v62 = vsel %vm1698_vm5, %v1737_v41, %v1739_v45  ;;  %v1777_v50 = vrot.slane %v1763_v13, 3  ;;  %v2032_v54 = vmul.f32 %v4650_v49, %v4718_v53 }
 0x600   :  { %v2034_v45 = vmul.f32 %v4718_v53, %v4107_v3  ;;  %v2008_v41 = vsel %vm1891_vm6, %v2005_v55, %v2007_v52  ;;  %v1779_v13 = vrot.slane %v1764_v63, 3 }
 0x601   :  { %v4720_v17 = vpop.permute.xlu1 %2518  ;;  %v4722_v26 = vpop.permute.xlu0 %2252  ;;  %v1778_v6 = vsel %vm1698_vm5, %v1776_v24, %v1777_v50  ;;  %v2044_v27 = vrot.slane %v2032_v54, 4  ;;  %v2309_v54 = vmul.f32 %v4138_v23, %v4231_v40 }
 0x602   :  { %5525 = vst [vmem:[#allocation48_spill] sm:$0xff] %v4720_v17  ;;  %5526 = vst [vmem:[#allocation49_spill] sm:$0xff] %v4722_v26  ;;  %v2045_v17 = vrot.slane %v2033_v1, 4  ;;  %v1780_v63 = vsel %vm1698_vm5, %v1777_v50, %v1779_v13 }
 0x603   :  { %2014 = vrot.lane.b32.xlu1 %v2006_v58, %s3640_s28  ;;  %1747 = vrot.lane.b32.xlu0 %v1740_v62, %s3639_s26  ;;  %v4748_v58 = vld [vmem:[#allocation4 + $0x18] sm:$0xff]  ;;  %v2047_v62 = vrot.slane %v2034_v45, 4 }
 0x604   :  { %v1802_v1 = vmul.f32 %v4748_v58, %v4560_v33  ;;  %v2046_v52 = vsel %vm1891_vm6, %v2044_v27, %v2045_v17  ;;  %v4771_v27 = vld [vmem:[#allocation4 + $0x48] sm:$0xff] }
 0x605   :  { %v4734_v26 = vpop.permute.xlu1 %2520  ;;  %v4736_v61 = vpop.permute.xlu0 %2290  ;;  %v2611_v50 = vmul.f32 %v4771_v27, %v4757_v59  ;;  %v2048_v24 = vsel %vm1891_vm6, %v2045_v17, %v2047_v62  ;;  %v1842_v17 = vmul.f32 %v4748_v58, %v4592_v15  ;;  %v4792_v62 = vstv %s1184_s14 }
 0x606   :  { %5527 = vst [vmem:[#allocation50_spill] sm:$0xff] %v4734_v26  ;;  %5528 = vst [vmem:[#allocation51_spill] sm:$0xff] %v4736_v61  ;;  %v1816_v45 = vrot.slane %v1802_v1, 3  ;;  %v4784_v1 = vld [vmem:[#allocation4 + $0x20] sm:$0xff] }
 0x607   :  { %2016 = vrot.lane.b32.xlu1 %v2008_v41, %s3640_s28  ;;  %1785 = vrot.lane.b32.xlu0 %v1778_v6, %s3638_s3  ;;  %v4763_v41 = vld [vmem:[#allocation4 + $0x50] sm:$0xff]  ;;  %v1843_v26 = vmul.f32 %v4784_v1, %v4592_v15 }
 0x608   :  { %v4767_v6 = vmul.f32 %v4763_v41, %v4757_v59 }
 0x609   :  { %v4752_v3 = vpop.permute.xlu1 %2558  ;;  %v4754_v55 = vpop.permute.xlu0 %2292 }
 0x60a   :  { %5529 = vst [vmem:[#allocation52_spill] sm:$0xff] %v4752_v3  ;;  %5530 = vst [vmem:[#allocation53_spill] sm:$0xff] %v4754_v55  ;;  %v5533_v55 = vrot.slane %v4744_v51, 3  ;;  %v1857_v3 = vrot.slane %v1843_v26, 3  ;;  %v4820_v26 = vld [vmem:[#allocation4 + $0x38] sm:$0xff] }
 0x60b   :  { %2054 = vrot.lane.b32.xlu1 %v2046_v52, %s3641_s29  ;;  %1787 = vrot.lane.b32.xlu0 %v1780_v63, %s3638_s3  ;;  %v2324_v52 = vrot.slane %v2309_v54, 1  ;;  %v5486_v63 = vrot.slane %v4767_v6, 3  ;;  %v2501_v54 = vmul.f32 %v4237_v47, %v4231_v40  ;;  %v1187_v40 = vmul.f32 %v4692_v31, %v4792_v62 }
 0x60c   :  { %v1818_v61 = vsel %vm1698_vm5, %v1816_v45, %v5533_v55  ;;  %v1844_v45 = vmul.f32 %v4592_v15, %v4255_v10  ;;  %v4814_v47 = vstv %s3139_s15 }
 0x60d   :  { %v4775_v13 = vpop.permute.xlu1 %2560  ;;  %v4777_v23 = vpop.permute.xlu0 %2330 }
 0x60e   :  { %5531 = vst [vmem:[#allocation54_spill] sm:$0xff] %v4775_v13  ;;  %5532 = vst [vmem:[#allocation55_spill] sm:$0xff] %v4777_v23  ;;  %v2625_v13 = vrot.slane %v2611_v50, 3 }
 0x60f   :  { %2056 = vrot.lane.b32.xlu1 %v2048_v24, %s3641_s29  ;;  %1825 = vrot.lane.b32.xlu0 %v1818_v61, %s3640_s28  ;;  %v5535_v24 = vrot.slane %v4297_v4, 1  ;;  %v1856_v4 = vrot.slane %v1842_v17, 3  ;;  %v1916_v17 = vmul.f32 %v4784_v1, %v4638_v8 }
 0x610   :  { %v2627_v50 = vsel %vm1698_vm5, %v2625_v13, %v5486_v63  ;;  %v1859_v13 = vrot.slane %v1844_v45, 3  ;;  %v1217_v63 = vadd.f32 %v4446_v16, %v1187_v40  ;;  %v4838_v45 = vld [vmem:[#allocation4 + $0x10] sm:$0xf]  ;;  %v2608_v40 = vmul.f32 %v4629_v25, %v4757_v59 }
 0x611   :  { %v4794_v23 = vpop.permute.xlu1 %1262  ;;  %v4796_v55 = vpop.permute.xlu0 %2370  ;;  %v2325_v61 = vsel %vm1312_vm3, %v5535_v24, %v2324_v52  ;;  %v2516_v24 = vrot.slane %v2501_v54, 2  ;;  %v1858_v34 = vsel %vm1698_vm5, %v1856_v4, %v1857_v3  ;;  %v1301_v54 = vmul.f32 %v4692_v31, %v4814_v47 }
 0x612   :  { %5534 = vst [vmem:[#allocation56_spill] sm:$0xff] %v4796_v55  ;;  %v1186_v55 = vmul.f32 %v4650_v49, %v4792_v62  ;;  %v1302_v16 = vmul.f32 %v4838_v45, %v4814_v47  ;;  %v1915_v4 = vmul.f32 %v4748_v58, %v4638_v8  ;;  %v1860_v35 = vsel %vm1698_vm5, %v1857_v3, %v1859_v13 }
 0x613   :  { %2332 = vrot.lane.b32.xlu1 %v2325_v61, %s3640_s28  ;;  %2634 = vrot.lane.b32.xlu0 %v2627_v50, %s3639_s26  ;;  %v4824_v61 = vmul.f32 %v4820_v26, %v4757_v59 }
 0x614   :  { %v1216_v50 = vadd.f32 %v4351_v7, %v1186_v55  ;;  %v1243_v55 = vadd.f32 %v4458_v19, %v1217_v63  ;;  %v1316_v60 = vrot.slane %v1302_v16, 1 }
 0x615   :  { %v4816_v15 = vpop.permute.xlu1 %1355  ;;  %v4818_v52 = vpop.permute.xlu0 %2372  ;;  %v2621_v56 = vrot.slane %v4824_v61, 3 }
 0x616   :  { %5536 = vst [vmem:[#allocation57_spill] sm:$0xff] %v4818_v52  ;;  %v1300_v52 = vmul.f32 %v4650_v49, %v4814_v47  ;;  %v1242_v7 = vadd.f32 %v4367_v12, %v1216_v50  ;;  %v1611_v12 = vmul.f32 %v4456_v42, %v4255_v10  ;;  %v1269_v63 = vadd.f32 %v4486_v38, %v1243_v55 }
 0x617   :  { %1441 = vrot.lane.b32.xlu1 %v4289_v46, %s3640_s28  ;;  %1865 = vrot.lane.b32.xlu0 %v1858_v34, %s3641_s29  ;;  %v5538_v46 = vrot.slane %v4391_v57, 2  ;;  %v1930_v50 = vrot.slane %v1916_v17, 4  ;;  %v1314_v57 = vrot.slane %v1301_v54, 1 }
 0x618   :  { %v1268_v19 = vadd.f32 %v4472_v37, %v1242_v7  ;;  %v1295_v3 = vadd.f32 %v4520_v2, %v1269_v63  ;;  %v1929_v37 = vrot.slane %v1915_v4, 4  ;;  %v1313_v13 = vrot.slane %v1300_v52, 1 }
 0x619   :  { %v1358_v0 = vpop.permute.xlu1 %1357  ;;  %v4848_v44 = vpop.permute.xlu0 %2442  ;;  %v2517_v34 = vsel %vm1505_vm4, %v5538_v46, %v2516_v24  ;;  %v2620_v24 = vrot.slane %v2608_v40, 3  ;;  %v1626_v17 = vrot.slane %v1611_v12, 2  ;;  %v1804_v52 = vmul.f32 %v4560_v33, %v4255_v10 }
 0x61a   :  { %5537 = vst [vmem:[#allocation58_spill] sm:$0xff] %v4848_v44  ;;  %v1917_v44 = vmul.f32 %v4638_v8, %v4255_v10  ;;  %v1294_v42 = vadd.f32 %v4504_v5, %v1268_v19  ;;  %v4871_v8 = vld [vmem:[#allocation4 + $0x40] sm:$0xf]  ;;  %v1931_v5 = vsel %vm1891_vm6, %v1929_v37, %v1930_v50  ;;  %v1315_v7 = vsel %vm1312_vm3, %v1313_v13, %v1314_v57 }
 0x61b   :  { %2524 = vrot.lane.b32.xlu1 %v2517_v34, %s3640_s28  ;;  %1867 = vrot.lane.b32.xlu0 %v1860_v35, %s3641_s29  ;;  %v2610_v54 = vmul.f32 %v4871_v8, %v4757_v59  ;;  %v1956_v35 = vmul.f32 %v4784_v1, %v4207_v22  ;;  %v2622_v16 = vsel %vm1698_vm5, %v2620_v24, %v2621_v56  ;;  %v5539_v33 = vrot.slane %v4604_v48, 2 }
 0x61c   :  { %v1932_v2 = vrot.slane %v1917_v44, 4  ;;  %v1317_v55 = vsel %vm1312_vm3, %v1314_v57, %v1316_v60  ;;  %v1957_v40 = vmul.f32 %v4207_v22, %v4255_v10  ;;  %v1327_v4 = vadd.f32 %v1315_v7, %v1294_v42 }
 0x61d   :  { %v1398_v38 = vpop.permute.xlu1 %1397  ;;  %v4869_v61 = vpop.permute.xlu0 %2444  ;;  %v1328_v46 = vadd.f32 %v1317_v55, %v1295_v3  ;;  %v1955_v34 = vmul.f32 %v4748_v58, %v4207_v22  ;;  %v1627_v60 = vsel %vm1505_vm4, %v5539_v33, %v1626_v17  ;;  %v2623_v19 = vrot.slane %v2610_v54, 3 }
 0x61e   :  { %v1970_v63 = vrot.slane %v1956_v35, 4  ;;  %v4895_v57 = vstv %s4857_s16  ;;  %v1367_v24 = vadd.f32 %v4816_v15, %v1327_v4  ;;  %v1933_v42 = vsel %vm1891_vm6, %v1930_v50, %v1932_v2 }
 0x61f   :  { %2630 = vrot.lane.b32.xlu1 %v2622_v16, %s3639_s26  ;;  %1938 = vrot.lane.b32.xlu0 %v1931_v5, %s3639_s26  ;;  %v1368_v10 = vadd.f32 %v1358_v0, %v1328_v46  ;;  %v1819_v3 = vrot.slane %v1804_v52, 3  ;;  %v1972_v22 = vrot.slane %v1957_v40, 4  ;;  %v1303_v48 = vmul.f32 %v4748_v58, %v4814_v47 }
 0x620   :  { %v2650_v37 = vmul.f32 %v4871_v8, %v4618_v11  ;;  %v4906_v13 = vstv %s4865_s17  ;;  %v1188_v15 = vmul.f32 %v4748_v58, %v4792_v62  ;;  %v1969_v17 = vrot.slane %v1955_v34, 4 }
 0x621   :  { %v1436_v44 = vpop.permute.xlu1 %1435  ;;  %v4889_v12 = vpop.permute.xlu0 %2482  ;;  %v1408_v0 = vadd.f32 %v1398_v38, %v1368_v10  ;;  %v4912_v50 = vmul.f32 %v4784_v1, %v4814_v47  ;;  %v1189_v54 = vmul.f32 %v4784_v1, %v4792_v62  ;;  %v2624_v5 = vsel %vm1698_vm5, %v2621_v56, %v2623_v19 }
 0x622   :  { %v1995_v2 = vmul.f32 %v4748_v58, %v4689_v36  ;;  %v4923_v52 = vmul.f32 %v4784_v1, %v4689_v36  ;;  %v1407_v38 = vadd.f32 %v4635_v18, %v1367_v24  ;;  %v1971_v55 = vsel %vm1891_vm6, %v1969_v17, %v1970_v63 }
 0x623   :  { %1634 = vrot.lane.b32.xlu1 %v1627_v60, %s3640_s28  ;;  %1940 = vrot.lane.b32.xlu0 %v1933_v42, %s3639_s26  ;;  %v5540_v40 = vrot.slane %v4744_v51, 3  ;;  %v1973_v56 = vsel %vm1891_vm6, %v1970_v63, %v1972_v22  ;;  %v1318_v4 = vrot.slane %v1303_v48, 1  ;;  %v2663_v46 = vrot.slane %v2650_v37, 3  ;;  %v4942_v63 = vld [vmem:[#allocation4 + $0x28] sm:$0xf] }
 0x624   :  { %v1494_v34 = vmul.f32 %v4692_v31, %v4906_v13  ;;  %v1218_v18 = vadd.f32 %v4522_v39, %v1188_v15  ;;  %v1447_v33 = vadd.f32 %v1436_v44, %v1407_v38  ;;  %v1319_v60 = vrot.slane %v4912_v50, 1 }
 0x625   :  { %v1438_v35 = vpop.permute.xlu1 %1437  ;;  %v4916_v16 = vpop.permute.xlu0 %2484  ;;  %v1820_v62 = vsel %vm1698_vm5, %v5540_v40, %v1819_v3  ;;  %v1493_v51 = vmul.f32 %v4650_v49, %v4906_v13  ;;  %v2009_v10 = vrot.slane %v1995_v2, 4  ;;  %v2010_v42 = vrot.slane %v4923_v52, 4 }
 0x626   :  { %v1448_v7 = vadd.f32 %v1438_v35, %v1408_v0  ;;  %v1305_v3 = vmul.f32 %v4942_v63, %v4814_v47  ;;  %v4948_v39 = vmul.f32 %v4820_v26, %v4895_v57  ;;  %v1219_v44 = vadd.f32 %v4536_v43, %v1189_v54 }
 0x627   :  { %2632 = vrot.lane.b32.xlu1 %v2624_v5, %s3639_s26  ;;  %1978 = vrot.lane.b32.xlu0 %v1971_v55, %s3638_s3  ;;  %v1244_v22 = vadd.f32 %v4550_v14, %v1218_v18  ;;  %v2036_v37 = vmul.f32 %v4784_v1, %v4718_v53  ;;  %v5541_v15 = vrot.slane %v4625_v9, 3  ;;  %v1507_v0 = vrot.slane %v1494_v34, 2 }
 0x628   :  { %v2688_v17 = vmul.f32 %v4629_v25, %v4895_v57  ;;  %v1495_v43 = vmul.f32 %v4838_v45, %v4906_v13  ;;  %v1245_v14 = vadd.f32 %v4564_v20, %v1219_v44  ;;  %v2035_v54 = vmul.f32 %v4748_v58, %v4718_v53 }
 0x629   :  { %v1476_v19 = vpop.permute.xlu1 %1475  ;;  %v4939_v24 = vpop.permute.xlu0 %2522  ;;  %v2664_v47 = vsel %vm1698_vm5, %v5541_v15, %v2663_v46  ;;  %v1270_v50 = vadd.f32 %v4580_v32, %v1244_v22  ;;  %v1997_v9 = vmul.f32 %v4942_v63, %v4689_v36  ;;  %v2011_v2 = vsel %vm1891_vm6, %v2009_v10, %v2010_v42  ;;  %v4984_v10 = vld [vmem:[#allocation4 + $0x58] sm:$0xf] }
 0x62a   :  { %v1487_v48 = vadd.f32 %v1476_v19, %v1447_v33  ;;  %v1506_v52 = vrot.slane %v1493_v51, 2  ;;  %v2701_v38 = vrot.slane %v4948_v39, 3  ;;  %v2037_v55 = vmul.f32 %v4942_v63, %v4718_v53 }
 0x62b   :  { %1827 = vrot.lane.b32.xlu1 %v1820_v62, %s3640_s28  ;;  %1980 = vrot.lane.b32.xlu0 %v1973_v56, %s3638_s3  ;;  %v1296_v20 = vadd.f32 %v4596_v28, %v1270_v50  ;;  %v1271_v32 = vadd.f32 %v4794_v23, %v1245_v14  ;;  %v2050_v62 = vrot.slane %v2036_v37, 4  ;;  %v1320_v56 = vsel %vm1312_vm3, %v1318_v4, %v1319_v60 }
 0x62c   :  { %v1508_v36 = vsel %vm1505_vm4, %v1506_v52, %v1507_v0  ;;  %v2700_v46 = vrot.slane %v2688_v17, 3  ;;  %v1509_v34 = vrot.slane %v1495_v43, 2  ;;  %v1321_v33 = vrot.slane %v1305_v3, 1 }
 0x62d   :  { %v1478_v35 = vpop.permute.xlu1 %1477  ;;  %v1360_v5 = vpop.permute.xlu0 %1359  ;;  %v1520_v18 = vadd.f32 %v1508_v36, %v1487_v48  ;;  %v2049_v51 = vrot.slane %v2035_v54, 4  ;;  %v2012_v53 = vrot.slane %v1997_v9, 4  ;;  %v2690_v4 = vmul.f32 %v4871_v8, %v4895_v57 }
 0x62e   :  { %v1488_v40 = vadd.f32 %v1478_v35, %v1448_v7  ;;  %v2702_v23 = vsel %vm1698_vm5, %v2700_v46, %v2701_v38  ;;  %v2052_v7 = vrot.slane %v2037_v55, 4  ;;  %v2613_v39 = vmul.f32 %v4984_v10, %v4757_v59 }
 0x62f   :  { %2672 = vrot.lane.b32.xlu1 %v2664_v47, %s3638_s3  ;;  %2018 = vrot.lane.b32.xlu0 %v2011_v2, %s3640_s28  ;;  %v1297_v44 = vadd.f32 %v4614_v21, %v1271_v32  ;;  %v1329_v22 = vadd.f32 %v1320_v56, %v1296_v20  ;;  %v2051_v48 = vsel %vm1891_vm6, %v2049_v51, %v2050_v62  ;;  %v4994_v15 = vstv %s4963_s19 }
 0x630   :  { %v1510_v37 = vsel %vm1505_vm4, %v1507_v0, %v1509_v34  ;;  %v1322_v17 = vsel %vm1312_vm3, %v1319_v60, %v1321_v33  ;;  %v2013_v59 = vsel %vm1891_vm6, %v2010_v42, %v2012_v53  ;;  %v2053_v50 = vsel %vm1891_vm6, %v2050_v62, %v2052_v7 }
 0x631   :  { %v1549_v28 = vpop.permute.xlu1 %1548  ;;  %v1362_v19 = vpop.permute.xlu0 %1361  ;;  %v1369_v47 = vadd.f32 %v1360_v5, %v1329_v22  ;;  %v1521_v43 = vadd.f32 %v1510_v37, %v1488_v40  ;;  %v2703_v54 = vrot.slane %v2690_v4, 3  ;;  %v2628_v9 = vrot.slane %v2613_v39, 3 }
 0x632   :  { %v1560_v3 = vadd.f32 %v1549_v28, %v1520_v18  ;;  %v2729_v35 = vmul.f32 %v4820_v26, %v4994_v15  ;;  %v1330_v0 = vadd.f32 %v1322_v17, %v1297_v44  ;;  %v2652_v60 = vmul.f32 %v4763_v41, %v4618_v11 }
 0x633   :  { %2710 = vrot.lane.b32.xlu1 %v2702_v23, %s3640_s28  ;;  %2058 = vrot.lane.b32.xlu0 %v2051_v48, %s3641_s29  ;;  %v2728_v42 = vmul.f32 %v4629_v25, %v4994_v15  ;;  %v2651_v55 = vmul.f32 %v4771_v27, %v4618_v11  ;;  %v2704_v40 = vsel %vm1698_vm5, %v2701_v38, %v2703_v54  ;;  %v5542_v62 = vrot.slane %v4767_v6, 3 }
 0x634   :  { %v1370_v5 = vadd.f32 %v1362_v19, %v1330_v0  ;;  %v2741_v36 = vrot.slane %v2729_v35, 3  ;;  %v2730_v46 = vmul.f32 %v4871_v8, %v4994_v15  ;;  %v2666_v33 = vrot.slane %v2652_v60, 3 }
 0x635   :  { %v1551_v21 = vpop.permute.xlu1 %1550  ;;  %v1400_v14 = vpop.permute.xlu0 %1399  ;;  %v2629_v56 = vsel %vm1698_vm5, %v5542_v62, %v2628_v9  ;;  %v2653_v51 = vmul.f32 %v4984_v10, %v4618_v11  ;;  %v2740_v6 = vrot.slane %v2728_v42, 3  ;;  %v1600_v38 = vadd.f32 %v4658_v29, %v1560_v3 }
 0x636   :  { %v1561_v2 = vadd.f32 %v1551_v21, %v1521_v43  ;;  %v1409_v52 = vadd.f32 %v1400_v14, %v1369_v47  ;;  %v2665_v53 = vrot.slane %v2651_v55, 3  ;;  %v5027_v28 = vstv %s4998_s20 }
 0x637   :  { %2020 = vrot.lane.b32.xlu1 %v2013_v59, %s3640_s28  ;;  %2060 = vrot.lane.b32.xlu0 %v2053_v50, %s3641_s29  ;;  %v2742_v7 = vsel %vm1698_vm5, %v2740_v6, %v2741_v36  ;;  %v2743_v4 = vrot.slane %v2730_v46, 3  ;;  %v2692_v39 = vmul.f32 %v4763_v41, %v4895_v57  ;;  %v2693_v11 = vmul.f32 %v4984_v10, %v4895_v57 }
 0x638   :  { %v2667_v48 = vsel %vm1698_vm5, %v2665_v53, %v2666_v33  ;;  %v2668_v29 = vrot.slane %v2653_v51, 3  ;;  %v2691_v3 = vmul.f32 %v4771_v27, %v4895_v57  ;;  %v5041_v37 = vmul.f32 %v4820_v26, %v5027_v28 }
 0x639   :  { %v1591_v20 = vpop.permute.xlu1 %1590  ;;  %v1402_v32 = vpop.permute.xlu0 %1401  ;;  %v2706_v43 = vrot.slane %v2692_v39, 3  ;;  %v2708_v59 = vrot.slane %v2693_v11, 3  ;;  %v2800_v21 = vmul.f32 %v4629_v25, %v5027_v28  ;;  %v5050_v14 = vstv %s5017_s21 }
 0x63a   :  { %v1601_v34 = vadd.f32 %v1591_v20, %v1561_v2  ;;  %v5019_v18 = vadd.f32 %v1402_v32, %v1370_v5  ;;  %v2744_v54 = vsel %vm1698_vm5, %v2741_v36, %v2743_v4  ;;  %v2669_v57 = vsel %vm1698_vm5, %v2666_v33, %v2668_v29 }
 0x63b   :  { %2712 = vrot.lane.b32.xlu1 %v2704_v40, %s3640_s28  ;;  %2636 = vrot.lane.b32.xlu0 %v2629_v56, %s3639_s26  ;;  %v2732_v9 = vmul.f32 %v4763_v41, %v4994_v15  ;;  %v1687_v35 = vmul.f32 %v4692_v31, %v5050_v14  ;;  %v2705_v0 = vrot.slane %v2691_v3, 3  ;;  %v2813_v2 = vrot.slane %v5041_v37, 4 }
 0x63c   :  { %v1686_v60 = vmul.f32 %v4650_v49, %v5050_v14  ;;  %v2709_v55 = vsel %vm1698_vm5, %v2706_v43, %v2708_v59  ;;  %v2812_v20 = vrot.slane %v2800_v21, 4  ;;  %v2802_v32 = vmul.f32 %v4871_v8, %v5027_v28 }
 0x63d   :  { %v1629_v19 = vpop.permute.xlu1 %1628  ;;  %v1440_v23 = vpop.permute.xlu0 %1439  ;;  %v2707_v62 = vsel %vm1698_vm5, %v2705_v0, %v2706_v43  ;;  %v2746_v56 = vrot.slane %v2732_v9, 3  ;;  %v2733_v36 = vmul.f32 %v4984_v10, %v4994_v15  ;;  %v1700_v46 = vrot.slane %v1687_v35, 3 }
 0x63e   :  { %v1640_v44 = vadd.f32 %v1629_v19, %v1600_v38  ;;  %v1449_v22 = vadd.f32 %v1440_v23, %v1409_v52  ;;  %v2731_v52 = vmul.f32 %v4771_v27, %v4994_v15  ;;  %v5081_v33 = vmul.f32 %v4784_v1, %v4906_v13 }
 0x63f   :  { %2750 = vrot.lane.b32.xlu1 %v2742_v7, %s3641_s29  ;;  %2674 = vrot.lane.b32.xlu0 %v2667_v48, %s3638_s3  ;;  %v2814_v51 = vsel %vm1891_vm6, %v2812_v20, %v2813_v2  ;;  %v1699_v38 = vrot.slane %v1686_v60, 3  ;;  %v5085_v53 = vstv %s5043_s4  ;;  %v2815_v23 = vrot.slane %v2802_v32, 4 }
 0x640   :  { %v2745_v6 = vrot.slane %v2731_v52, 3  ;;  %v1496_v7 = vmul.f32 %v4748_v58, %v4906_v13  ;;  %v2841_v4 = vmul.f32 %v4820_v26, %v5085_v53  ;;  %v2842_v39 = vmul.f32 %v4871_v8, %v5085_v53 }
 0x641   :  { %v1631_v47 = vpop.permute.xlu1 %1630  ;;  %v5045_v17 = vpop.permute.xlu0 %2562  ;;  %v2748_v29 = vrot.slane %v2733_v36, 3  ;;  %v1701_v3 = vsel %vm1698_vm5, %v1699_v38, %v1700_v46  ;;  %v2840_v59 = vmul.f32 %v4629_v25, %v5085_v53  ;;  %v5101_v21 = vstv %s5065_s22 }
 0x642   :  { %v1641_v50 = vadd.f32 %v1631_v47, %v1601_v34  ;;  %v1688_v34 = vmul.f32 %v4838_v45, %v5050_v14  ;;  %v2747_v48 = vsel %vm1698_vm5, %v2745_v6, %v2746_v56  ;;  %v1512_v47 = vrot.slane %v5081_v33, 2  ;;  %v5553_v33 = vld [vmem:[#allocation39_spill] sm:$0xff] }
 0x643   :  { %2752 = vrot.lane.b32.xlu1 %v2744_v54, %s3641_s29  ;;  %2676 = vrot.lane.b32.xlu0 %v2669_v57, %s3638_s3  ;;  %v1511_v54 = vrot.slane %v1496_v7, 2  ;;  %v2853_v57 = vrot.slane %v2841_v4, 4  ;;  %v2855_v9 = vrot.slane %v2842_v39, 4  ;;  %v2881_v35 = vmul.f32 %v4820_v26, %v5101_v21 }
 0x644   :  { %v1702_v37 = vrot.slane %v1688_v34, 3  ;;  %v2816_v52 = vsel %vm1891_vm6, %v2813_v2, %v2815_v23  ;;  %v2749_v60 = vsel %vm1698_vm5, %v2746_v56, %v2748_v29  ;;  %v2880_v32 = vmul.f32 %v4629_v25, %v5101_v21 }
 0x645   :  { %v1669_v42 = vpop.permute.xlu1 %1668  ;;  %v5067_v5 = vpop.permute.xlu0 %2564  ;;  %v1513_v20 = vsel %vm1505_vm4, %v1511_v54, %v1512_v47  ;;  %v2803_v56 = vmul.f32 %v4771_v27, %v5027_v28  ;;  %v2893_v6 = vrot.slane %v2881_v35, 4  ;;  %v2805_v38 = vmul.f32 %v4984_v10, %v5027_v28 }
 0x646   :  { %v1680_v40 = vadd.f32 %v1669_v42, %v1640_v44  ;;  %v2804_v42 = vmul.f32 %v4763_v41, %v5027_v28  ;;  %v2892_v4 = vrot.slane %v2880_v32, 4  ;;  %v2919_v28 = vstv %s5107_s30 }
 0x647   :  { %2716 = vrot.lane.b32.xlu1 %v2709_v55, %s3640_s28  ;;  %2714 = vrot.lane.b32.xlu0 %v2707_v62, %s3640_s28  ;;  %v1703_v55 = vsel %vm1698_vm5, %v1700_v46, %v1702_v37  ;;  %v2852_v62 = vrot.slane %v2840_v59, 4  ;;  %v2882_v46 = vmul.f32 %v4871_v8, %v5101_v21  ;;  %v2817_v39 = vrot.slane %v2803_v56, 4 }
 0x648   :  { %v1713_v43 = vadd.f32 %v1701_v3, %v1680_v40  ;;  %v2818_v7 = vrot.slane %v2804_v42, 4  ;;  %v2820_v3 = vrot.slane %v2805_v38, 4  ;;  %v2921_v59 = vmul.f32 %v4820_v26, %v2919_v28 }
 0x649   :  { %v1671_v19 = vpop.permute.xlu1 %1670  ;;  %v1480_v15 = vpop.permute.xlu0 %1479  ;;  %v2854_v23 = vsel %vm1891_vm6, %v2852_v62, %v2853_v57  ;;  %v2895_v29 = vrot.slane %v2882_v46, 4  ;;  %v2920_v54 = vmul.f32 %v4629_v25, %v2919_v28  ;;  %v2845_v32 = vmul.f32 %v4984_v10, %v5085_v53 }
 0x64a   :  { %v1681_v11 = vadd.f32 %v1671_v19, %v1641_v50  ;;  %v1489_v44 = vadd.f32 %v1480_v15, %v1449_v22  ;;  %v2821_v42 = vsel %vm1891_vm6, %v2818_v7, %v2820_v3  ;;  %v2883_v46 = vmul.f32 %v4771_v27, %v5101_v21 }
 0x64b   :  { %2822 = vrot.lane.b32.xlu1 %v2814_v51, %s3639_s26  ;;  %2754 = vrot.lane.b32.xlu0 %v2747_v48, %s3641_s29  ;;  %v2856_v51 = vsel %vm1891_vm6, %v2853_v57, %v2855_v9  ;;  %v2894_v48 = vsel %vm1891_vm6, %v2892_v4, %v2893_v6  ;;  %v2843_v57 = vmul.f32 %v4771_v27, %v5085_v53  ;;  %v2932_v25 = vrot.slane %v2920_v54, 4 }
 0x64c   :  { %v1714_v40 = vadd.f32 %v1703_v55, %v1681_v11  ;;  %v1522_v2 = vadd.f32 %v1513_v20, %v1489_v44  ;;  %v2933_v55 = vrot.slane %v2921_v59, 4 }
 0x64d   :  { %v1742_v50 = vpop.permute.xlu1 %1741  ;;  %v5103_v22 = vpop.permute.xlu0 %1481 }
 0x64e   :  { %v5109_v0 = vadd.f32 %v1742_v50, %v1713_v43  ;;  %v2819_v43 = vsel %vm1891_vm6, %v2817_v39, %v2818_v7  ;;  %v2844_v50 = vmul.f32 %v4763_v41, %v5085_v53  ;;  %v2885_v53 = vmul.f32 %v4984_v10, %v5101_v21 }
 0x64f   :  { %2824 = vrot.lane.b32.xlu1 %v2816_v52, %s3639_s26  ;;  %2756 = vrot.lane.b32.xlu0 %v2749_v60, %s3641_s29  ;;  %v2896_v52 = vsel %vm1891_vm6, %v2893_v6, %v2895_v29  ;;  %v2922_v60 = vmul.f32 %v4871_v8, %v2919_v28  ;;  %v2860_v6 = vrot.slane %v2845_v32, 4  ;;  %v2897_v29 = vrot.slane %v2883_v46, 4 }
 0x650   :  { %v2858_v20 = vrot.slane %v2844_v50, 4  ;;  %v2900_v39 = vrot.slane %v2885_v53, 4 }
 0x651   :  { %v1744_v36 = vpop.permute.xlu1 %1743  ;;  %v1553_v34 = vpop.permute.xlu0 %1552  ;;  %v2935_v56 = vrot.slane %v2922_v60, 4 }
 0x652   :  { %v1754_v19 = vadd.f32 %v1744_v36, %v1714_v40  ;;  %v5130_v15 = vadd.f32 %v1553_v34, %v1522_v2  ;;  %v2857_v40 = vrot.slane %v2843_v57, 4  ;;  %v2884_v36 = vmul.f32 %v4763_v41, %v5101_v21 }
 0x653   :  { %2864 = vrot.lane.b32.xlu1 %v2856_v51, %s3638_s3  ;;  %2862 = vrot.lane.b32.xlu0 %v2854_v23, %s3638_s3  ;;  %v2934_v34 = vsel %vm1891_vm6, %v2932_v25, %v2933_v55  ;;  %v2936_v23 = vsel %vm1891_vm6, %v2933_v55, %v2935_v56  ;;  %v2861_v4 = vsel %vm1891_vm6, %v2858_v20, %v2860_v6 }
 0x654   :  { %v2859_v51 = vsel %vm1891_vm6, %v2857_v40, %v2858_v20  ;;  %v2898_v7 = vrot.slane %v2884_v36, 4  ;;  %v2923_v21 = vmul.f32 %v4771_v27, %v2919_v28  ;;  %v1793_v20 = vadd.f32 %v4672_v30, %v5109_v0  ;;  %v2982_v30 = vld [vmem:[%s5473_s6] sm:$0xff] }
 0x655   :  { %v1784_v11 = vpop.permute.xlu1 %1783  ;;  %v5135_v44 = vpop.permute.xlu0 %1554 }
 0x656   :  { %v5139_v37 = vadd.f32 %v1784_v11, %v1754_v19  ;;  %v2924_v11 = vmul.f32 %v4763_v41, %v2919_v28  ;;  %v2901_v59 = vsel %vm1891_vm6, %v2898_v7, %v2900_v39  ;;  %v2899_v50 = vsel %vm1891_vm6, %v2897_v29, %v2898_v7 }
 0x657   :  { %2902 = vrot.lane.b32.xlu1 %v2894_v48, %s3640_s28  ;;  %2826 = vrot.lane.b32.xlu0 %v2819_v43, %s3639_s26  ;;  %v2925_v48 = vmul.f32 %v4984_v10, %v2919_v28  ;;  %v2937_v41 = vrot.slane %v2923_v21, 4 }
 0x658   :  { %v2938_v54 = vrot.slane %v2924_v11, 4 }
 0x659   :  { %v1822_v9 = vpop.permute.xlu1 %1821  ;;  %v5150_v35 = vpop.permute.xlu0 %1592  ;;  %v2940_v57 = vrot.slane %v2925_v48, 4 }
 0x65a   :  { %v2939_v28 = vsel %vm1891_vm6, %v2937_v41, %v2938_v54  ;;  %v1833_v56 = vadd.f32 %v1822_v9, %v1793_v20  ;;  %v5228_v20 = vstv %s3164_s11 }
 0x65b   :  { %2904 = vrot.lane.b32.xlu1 %v2896_v52, %s3640_s28  ;;  %2828 = vrot.lane.b32.xlu0 %v2821_v42, %s3639_s26  ;;  %s3154_s26 = sld [smem:[#allocation9 + $0x14]]  ;;  %v2941_v27 = vsel %vm1891_vm6, %v2938_v54, %v2940_v57  ;;  %v5220_v54 = vstv %s3159_s0 }
 0x65d   :  { %v1824_v2 = vpop.permute.xlu1 %1823  ;;  %v5159_v62 = vpop.permute.xlu0 %1594 }
 0x65e   :  { %v1834_v46 = vadd.f32 %v1824_v2, %v5139_v37 }
 0x65f   :  { %2942 = vrot.lane.b32.xlu1 %v2934_v34, %s3641_s29  ;;  %2866 = vrot.lane.b32.xlu0 %v2859_v51, %s3638_s3 }
 0x661   :  { %v1862_v38 = vpop.permute.xlu1 %1861  ;;  %v5171_v19 = vpop.permute.xlu0 %1632  ;;  %v5188_v42 = vstv %s3154_s26 }
 0x662   :  { %v1880_v55 = vmul.f32 %v4692_v31, %v5188_v42  ;;  %v1879_v32 = vmul.f32 %v4650_v49, %v5188_v42  ;;  %v1873_v34 = vadd.f32 %v1862_v38, %v1833_v56  ;;  %v1881_v31 = vmul.f32 %v4838_v45, %v5188_v42  ;;  %v2983_v49 = vld [vmem:[%s5473_s6 + $0x8] sm:$0xff]  ;;  %s3169_s6 = sld [smem:[#allocation9 + $0x23]] }
 0x663   :  { %2944 = vrot.lane.b32.xlu1 %v2936_v23, %s3641_s29  ;;  %2868 = vrot.lane.b32.xlu0 %v2861_v4, %s3638_s3  ;;  %v3493_v0 = vpack.c.bf16 %v2983_v49, %v2982_v30  ;;  %v5232_v56 = vmul.f32 %v4820_v26, %v5228_v20  ;;  %v5545_v49 = vld [vmem:[#allocation19_spill] sm:$0xff] }
 0x664   :  { %v1893_v36 = vrot.slane %v1880_v55, 4  ;;  %v1892_v51 = vrot.slane %v1879_v32, 4  ;;  %v1895_v45 = vrot.slane %v1881_v31, 4  ;;  %v2079_v31 = vmul.f32 %v4820_v26, %v5220_v54 }
 0x665   :  { %v1864_v3 = vpop.permute.xlu1 %1863  ;;  %v5180_v43 = vpop.permute.xlu0 %2670  ;;  %3494 = vmatprep.subr.bf16.mxu0 %v3493_v0 }
 0x666   :  { %v1894_v9 = vsel %vm1891_vm6, %v1892_v51, %v1893_v36  ;;  %3496 = vmatpush3.bf16.msra.mxu0 %v3493_v0  ;;  %v1874_v4 = vadd.f32 %v1864_v3, %v1834_v46  ;;  %v1896_v11 = vsel %vm1891_vm6, %v1893_v36, %v1895_v45  ;;  %v2205_v46 = vrot.slane %v5232_v56, 1 }
 0x667   :  { %2908 = vrot.lane.b32.xlu1 %v2901_v59, %s3640_s28  ;;  %2906 = vrot.lane.b32.xlu0 %v2899_v50, %s3640_s28  ;;  %v1906_v38 = vadd.f32 %v1894_v9, %v1873_v34  ;;  %v5543_v59 = vld [vmem:[#allocation45_spill] sm:$0xff]  ;;  %v5544_v34 = vld [vmem:[#allocation18_spill] sm:$0xff] }
 0x668   :  { %v1907_v21 = vadd.f32 %v1896_v11, %v1874_v4  ;;  %v5546_v4 = vld [vmem:[#allocation22_spill] sm:$0xff]  ;;  %v5547_v11 = vld [vmem:[#allocation20_spill] sm:$0xff] }
 0x669   :  { %v1935_v52 = vpop.permute.xlu1 %1934  ;;  %v5186_v60 = vpop.permute.xlu0 %1672 }
 0x66a   :  { %v1946_v39 = vadd.f32 %v1935_v52, %v1906_v38 }
 0x66b   :  { %2948 = vrot.lane.b32.xlu1 %v2941_v27, %s3641_s29  ;;  %2946 = vrot.lane.b32.xlu0 %v2939_v28, %s3641_s29  ;;  %v5224_v28 = vld [vmem:[#allocation4 + $0x30] sm:$0xff] }
 0x66c   :  { %v1986_v50 = vadd.f32 %v5543_v59, %v1946_v39  ;;  %v2078_v3 = vmul.f32 %v5224_v28, %v5220_v54  ;;  %v2192_v30 = vmul.f32 %v5224_v28, %v5228_v20  ;;  %v5548_v59 = vld [vmem:[#allocation26_spill] sm:$0xff] }
 0x66d   :  { %v1937_v25 = vpop.permute.xlu1 %1936  ;;  %v5200_v40 = vpop.permute.xlu0 %1674 }
 0x66e   :  { %v1947_v37 = vadd.f32 %v1937_v25, %v1907_v21  ;;  %v2204_v21 = vrot.slane %v2192_v30, 1 }
 0x671   :  { %v1977_v6 = vpop.permute.xlu1 %1976  ;;  %v5204_v53 = vpop.permute.xlu0 %1745 }
 0x672   :  { %v1987_v27 = vadd.f32 %v1977_v6, %v1947_v37  ;;  %v5254_v37 = vmul.f32 %v4784_v1, %v5050_v14 }
 0x675   :  { %v2015_v23 = vpop.permute.xlu1 %2014  ;;  %v5214_v7 = vpop.permute.xlu0 %1747 }
 0x676   :  { %v2026_v2 = vadd.f32 %v2015_v23, %v1986_v50  ;;  %v1498_v23 = vmul.f32 %v4942_v63, %v4906_v13  ;;  %v1602_v13 = vadd.f32 %v5150_v35, %v5130_v15  ;;  %v1705_v15 = vrot.slane %v5254_v37, 3 }
 0x677   :  { %v2194_v35 = vmul.f32 %v4871_v8, %v5228_v20 }
 0x679   :  { %v2017_v48 = vpop.permute.xlu1 %2016  ;;  %v5217_v29 = vpop.permute.xlu0 %1785  ;;  %v2207_v37 = vrot.slane %v2194_v35, 1  ;;  %v1883_v35 = vmul.f32 %v4784_v1, %v5188_v42 }
 0x67a   :  { %v2027_v55 = vadd.f32 %v2017_v48, %v1987_v27 }
 0x67d   :  { %v2055_v57 = vpop.permute.xlu1 %2054  ;;  %v5222_v41 = vpop.permute.xlu0 %1787 }
 0x67e   :  { %v2066_v52 = vadd.f32 %v2055_v57, %v2026_v2  ;;  %v2206_v2 = vsel %vm1312_vm3, %v2204_v21, %v2205_v46  ;;  %v1514_v57 = vrot.slane %v1498_v23, 2 }
 0x680   :  { %v2082_v32 = vadd.f32 %v2078_v3, %v2066_v52  ;;  %v5257_v52 = vstv %s3169_s6 }
 0x681   :  { %v2057_v25 = vpop.permute.xlu1 %2056  ;;  %v5234_v36 = vpop.permute.xlu0 %1825 }
 0x682   :  { %v2108_v51 = vadd.f32 %v5544_v34, %v2082_v32  ;;  %v2067_v6 = vadd.f32 %v2057_v25, %v2027_v55  ;;  %v5549_v32 = vld [vmem:[#allocation21_spill] sm:$0xff]  ;;  %v1689_v34 = vmul.f32 %v4748_v58, %v5050_v14  ;;  %v1515_v58 = vsel %vm1505_vm4, %v1512_v47, %v1514_v57 }
 0x684   :  { %v2134_v0 = vadd.f32 %v5545_v49, %v2108_v51  ;;  %v2083_v9 = vadd.f32 %v2079_v31, %v2067_v6  ;;  %v5267_v51 = vmul.f32 %v4820_v26, %v5257_v52  ;;  %v1642_v31 = vadd.f32 %v5171_v19, %v1602_v13  ;;  %v5550_v6 = vld [vmem:[#allocation36_spill] sm:$0xff] }
 0x685   :  { %v5243_v38 = vpop.permute.xlu1 %2332  ;;  %v5245_v45 = vpop.permute.xlu0 %2634  ;;  %v2384_v19 = vmul.f32 %v5224_v28, %v5257_v52 }
 0x686   :  { %v2160_v39 = vadd.f32 %v5546_v4, %v2134_v0  ;;  %v2109_v48 = vadd.f32 %v5547_v11, %v2083_v9  ;;  %v1682_v9 = vadd.f32 %v5186_v60, %v1642_v31  ;;  %v5552_v4 = vld [vmem:[#allocation24_spill] sm:$0xff]  ;;  %v2397_v21 = vrot.slane %v5267_v51, 2 }
 0x687   :  { %v1691_v60 = vmul.f32 %v4942_v63, %v5050_v14  ;;  %v5299_v31 = vstv %s3174_s24 }
 0x688   :  { %v2186_v50 = vadd.f32 %v5548_v59, %v2160_v39  ;;  %v2135_v56 = vadd.f32 %v5549_v32, %v2109_v48  ;;  %v1704_v48 = vrot.slane %v1689_v34, 3  ;;  %v5305_v14 = vmul.f32 %v4820_v26, %v5299_v31 }
 0x689   :  { %v1442_v27 = vpop.permute.xlu1 %1441  ;;  %v1866_v3 = vpop.permute.xlu0 %1865 }
 0x68a   :  { %v2218_v55 = vadd.f32 %v2206_v2, %v2186_v50  ;;  %v1450_v25 = vadd.f32 %v1442_v27, %v5019_v18  ;;  %v2161_v39 = vadd.f32 %v5552_v4, %v2135_v56  ;;  %v1706_v50 = vsel %vm1698_vm5, %v1704_v48, %v1705_v15  ;;  %v5555_v56 = vld [vmem:[#allocation41_spill] sm:$0xff]  ;;  %v5557_v48 = vld [vmem:[#allocation34_spill] sm:$0xff] }
 0x68b   :  { %v2396_v2 = vrot.slane %v2384_v19, 2  ;;  %v1715_v13 = vadd.f32 %v1706_v50, %v1682_v9 }
 0x68c   :  { %v2258_v30 = vadd.f32 %v5550_v6, %v2218_v55  ;;  %v1490_v49 = vadd.f32 %v5103_v22, %v1450_v25  ;;  %v5551_v22 = vld [vmem:[#allocation33_spill] sm:$0xff]  ;;  %v5554_v55 = vld [vmem:[#allocation28_spill] sm:$0xff] }
 0x68d   :  { %v5278_v18 = vpop.permute.xlu1 %2524  ;;  %v5280_v0 = vpop.permute.xlu0 %1867  ;;  %v2187_v32 = vadd.f32 %v5554_v55, %v2161_v39  ;;  %v2398_v34 = vsel %vm1505_vm4, %v2396_v2, %v2397_v21  ;;  %v5558_v2 = vld [vmem:[#allocation37_spill] sm:$0xff]  ;;  %v5559_v55 = vld [vmem:[#allocation48_spill] sm:$0xff] }
 0x68e   :  { %v2298_v23 = vadd.f32 %v5551_v22, %v2258_v30  ;;  %v1523_v11 = vadd.f32 %v1515_v58, %v1490_v49  ;;  %v2208_v49 = vsel %vm1312_vm3, %v2205_v46, %v2207_v37  ;;  %v1707_v58 = vrot.slane %v1691_v60, 3  ;;  %v3553_v46 = vld [vmem:[#allocation4 + $0x18] sm:$0xff] }
 0x690   :  { %v2338_v59 = vadd.f32 %v5553_v33, %v2298_v23  ;;  %v1563_v47 = vadd.f32 %v5135_v44, %v1523_v11  ;;  %v1755_v44 = vadd.f32 %v5204_v53, %v1715_v13  ;;  %v2219_v53 = vadd.f32 %v2208_v49, %v2187_v32  ;;  %v5556_v23 = vld [vmem:[#allocation43_spill] sm:$0xff] }
 0x691   :  { %v2631_v57 = vpop.permute.xlu1 %2630  ;;  %v1939_v27 = vpop.permute.xlu0 %1938  ;;  %v1882_v11 = vmul.f32 %v3553_v46, %v5188_v42  ;;  %v5562_v46 = vld [vmem:[#allocation40_spill] sm:$0xff] }
 0x692   :  { %v2378_v25 = vadd.f32 %v5555_v56, %v2338_v59  ;;  %v1603_v30 = vadd.f32 %v5159_v62, %v1563_v47  ;;  %v1795_v22 = vadd.f32 %v5217_v29, %v1755_v44  ;;  %v2576_v62 = vmul.f32 %v5224_v28, %v5299_v31 }
 0x693   :  { %v2589_v59 = vrot.slane %v5305_v14, 3  ;;  %v1898_v47 = vrot.slane %v1883_v35, 4  ;;  %v1708_v29 = vsel %vm1698_vm5, %v1705_v15, %v1707_v58  ;;  %v2259_v60 = vadd.f32 %v5558_v2, %v2219_v53  ;;  %v5561_v35 = vld [vmem:[#allocation38_spill] sm:$0xff] }
 0x694   :  { %v2410_v6 = vadd.f32 %v2398_v34, %v2378_v25  ;;  %v1835_v26 = vadd.f32 %v5234_v36, %v1795_v22  ;;  %v2588_v25 = vrot.slane %v2576_v62, 3  ;;  %v1897_v36 = vrot.slane %v1882_v11, 4 }
 0x695   :  { %v1635_v19 = vpop.permute.xlu1 %1634  ;;  %v1941_v9 = vpop.permute.xlu0 %1940  ;;  %v1884_v34 = vmul.f32 %v4942_v63, %v5188_v42  ;;  %v2299_v58 = vadd.f32 %v5561_v35, %v2259_v60  ;;  %v5563_v60 = vld [vmem:[#allocation42_spill] sm:$0xff] }
 0x696   :  { %v2450_v4 = vadd.f32 %v5556_v23, %v2410_v6  ;;  %v1643_v39 = vadd.f32 %v1635_v19, %v1603_v30  ;;  %v1875_v13 = vadd.f32 %v1866_v3, %v1835_v26  ;;  %v2590_v15 = vsel %vm1698_vm5, %v2588_v25, %v2589_v59  ;;  %v5353_v25 = vld [vmem:[#allocation4 + $0x50] sm:$0xff] }
 0x697   :  { %v1899_v30 = vsel %vm1891_vm6, %v1897_v36, %v1898_v47  ;;  %v1900_v23 = vrot.slane %v1884_v34, 4  ;;  %v2339_v11 = vadd.f32 %v5562_v46, %v2299_v58  ;;  %v2196_v36 = vmul.f32 %v5353_v25, %v5228_v20 }
 0x698   :  { %v2490_v33 = vadd.f32 %v5557_v48, %v2450_v4  ;;  %v1683_v1 = vadd.f32 %v5200_v40, %v1643_v39  ;;  %v5560_v40 = vld [vmem:[#allocation52_spill] sm:$0xff]  ;;  %v1908_v22 = vadd.f32 %v1899_v30, %v1875_v13  ;;  %v2081_v51 = vmul.f32 %v5353_v25, %v5220_v54 }
 0x699   :  { %v5319_v50 = vpop.permute.xlu1 %2632  ;;  %v1979_v37 = vpop.permute.xlu0 %1978  ;;  %v2379_v13 = vadd.f32 %v5563_v60, %v2339_v11  ;;  %v2210_v35 = vrot.slane %v2196_v36, 1  ;;  %v5569_v11 = vld [vmem:[#allocation25_spill] sm:$0xff] }
 0x69a   :  { %v2530_v32 = vadd.f32 %v5559_v55, %v2490_v33  ;;  %v1716_v56 = vadd.f32 %v1708_v29, %v1683_v1  ;;  %v1948_v42 = vadd.f32 %v1939_v27, %v1908_v22  ;;  %v5566_v22 = vld [vmem:[#allocation44_spill] sm:$0xff] }
 0x69c   :  { %v2570_v44 = vadd.f32 %v5560_v40, %v2530_v32  ;;  %v1756_v6 = vadd.f32 %v5214_v7, %v1716_v56  ;;  %v2386_v7 = vmul.f32 %v4871_v8, %v5257_v52  ;;  %v1988_v26 = vadd.f32 %v1979_v37, %v1948_v42  ;;  %v5346_v32 = vld [vmem:[#allocation4 + $0x48] sm:$0xff] }
 0x69d   :  { %v1828_v49 = vpop.permute.xlu1 %1827  ;;  %v1981_v3 = vpop.permute.xlu0 %1980  ;;  %v2080_v37 = vmul.f32 %v5346_v32, %v5220_v54  ;;  %v2195_v30 = vmul.f32 %v5346_v32, %v5228_v20 }
 0x69e   :  { %v2602_v19 = vadd.f32 %v2590_v15, %v2570_v44  ;;  %v1796_v53 = vadd.f32 %v5222_v41, %v1756_v6  ;;  %v1901_v41 = vsel %vm1891_vm6, %v1898_v47, %v1900_v23  ;;  %v2399_v27 = vrot.slane %v2386_v7, 2  ;;  %v5564_v44 = vld [vmem:[#allocation23_spill] sm:$0xff]  ;;  %v5567_v23 = vld [vmem:[#allocation30_spill] sm:$0xff] }
 0x69f   :  { %v2197_v7 = vmul.f32 %v4984_v10, %v5228_v20  ;;  %v5572_v20 = vld [vmem:[#allocation47_spill] sm:$0xff] }
 0x6a0   :  { %v2642_v63 = vadd.f32 %v2631_v57, %v2602_v19  ;;  %v1836_v4 = vadd.f32 %v1828_v49, %v1796_v53  ;;  %v2400_v47 = vsel %vm1505_vm4, %v2397_v21, %v2399_v27  ;;  %v5565_v49 = vld [vmem:[#allocation27_spill] sm:$0xff] }
 0x6a1   :  { %v5335_v39 = vpop.permute.xlu1 %2672  ;;  %v2019_v62 = vpop.permute.xlu0 %2018 }
 0x6a2   :  { %v1876_v48 = vadd.f32 %v5280_v0, %v1836_v4  ;;  %v5340_v33 = vadd.f32 %v5180_v43, %v2642_v63  ;;  %v2028_v57 = vadd.f32 %v2019_v62, %v1988_v26  ;;  %v2209_v4 = vrot.slane %v2195_v30, 1  ;;  %v5568_v62 = vld [vmem:[#allocation31_spill] sm:$0xff] }
 0x6a4   :  { %v1909_v1 = vadd.f32 %v1901_v41, %v1876_v48  ;;  %v2211_v54 = vsel %vm1312_vm3, %v2209_v4, %v2210_v35  ;;  %v5578_v4 = vld [vmem:[#allocation54_spill] sm:$0xff] }
 0x6a5   :  { %v5343_v29 = vpop.permute.xlu1 %2710  ;;  %v2059_v2 = vpop.permute.xlu0 %2058 }
 0x6a6   :  { %v1949_v55 = vadd.f32 %v1941_v9, %v1909_v1  ;;  %v2068_v0 = vadd.f32 %v2059_v2, %v2028_v57  ;;  %v2411_v9 = vadd.f32 %v2400_v47, %v2379_v13  ;;  %v5570_v1 = vld [vmem:[#allocation46_spill] sm:$0xff]  ;;  %v5571_v2 = vld [vmem:[#allocation29_spill] sm:$0xff]  ;;  %v2212_v13 = vrot.slane %v2197_v7, 1 }
 0x6a7   :  { %v2387_v47 = vmul.f32 %v5346_v32, %v5257_v52 }
 0x6a8   :  { %v1989_v56 = vadd.f32 %v1981_v3, %v1949_v55  ;;  %v2084_v43 = vadd.f32 %v2080_v37, %v2068_v0  ;;  %v2451_v53 = vadd.f32 %v5566_v22, %v2411_v9  ;;  %v2388_v55 = vmul.f32 %v5353_v25, %v5257_v52  ;;  %v5573_v0 = vld [vmem:[#allocation35_spill] sm:$0xff] }
 0x6a9   :  { %v2021_v34 = vpop.permute.xlu1 %2020  ;;  %v2061_v40 = vpop.permute.xlu0 %2060 }
 0x6aa   :  { %v2110_v6 = vadd.f32 %v5564_v44, %v2084_v43  ;;  %v2029_v15 = vadd.f32 %v2021_v34, %v1989_v56  ;;  %v2491_v57 = vadd.f32 %v5570_v1, %v2451_v53  ;;  %v2578_v43 = vmul.f32 %v4871_v8, %v5299_v31  ;;  %v5575_v44 = vld [vmem:[#allocation51_spill] sm:$0xff] }
 0x6ab   :  { %v2389_v53 = vmul.f32 %v4984_v10, %v5257_v52 }
 0x6ac   :  { %v2136_v3 = vadd.f32 %v5565_v49, %v2110_v6  ;;  %v2069_v21 = vadd.f32 %v2061_v40, %v2029_v15  ;;  %v5574_v40 = vld [vmem:[#allocation50_spill] sm:$0xff]  ;;  %v5576_v15 = vld [vmem:[#allocation32_spill] sm:$0xff]  ;;  %v2213_v49 = vsel %vm1312_vm3, %v2210_v35, %v2212_v13  ;;  %v2591_v8 = vrot.slane %v2578_v43, 3  ;;  %v5583_v43 = vld [vmem:[#allocation57_spill] sm:$0xff] }
 0x6ad   :  { %v5363_v58 = vpop.permute.xlu1 %2712  ;;  %v5365_v19 = vpop.permute.xlu0 %2636  ;;  %v2531_v9 = vadd.f32 %v5574_v40, %v2491_v57  ;;  %v2404_v52 = vrot.slane %v2389_v53, 2  ;;  %v2767_v40 = vstv %s3179_s1 }
 0x6ae   :  { %v2162_v63 = vadd.f32 %v5567_v23, %v2136_v3  ;;  %v2085_v42 = vadd.f32 %v2081_v51, %v2069_v21  ;;  %v2402_v3 = vrot.slane %v2388_v55, 2  ;;  %v5577_v21 = vld [vmem:[#allocation55_spill] sm:$0xff]  ;;  %v2401_v23 = vrot.slane %v2387_v47, 2 }
 0x6af   :  { %v2571_v7 = vadd.f32 %v5578_v4, %v2531_v9 }
 0x6b0   :  { %v2188_v46 = vadd.f32 %v5568_v62, %v2162_v63  ;;  %v2111_v26 = vadd.f32 %v5569_v11, %v2085_v42  ;;  %v5579_v62 = vld [vmem:[#allocation49_spill] sm:$0xff]  ;;  %v5580_v11 = vld [vmem:[#allocation56_spill] sm:$0xff]  ;;  %v2403_v35 = vsel %vm1505_vm4, %v2401_v23, %v2402_v3 }
 0x6b1   :  { %v5374_v48 = vpop.permute.xlu1 %2750  ;;  %v5376_v41 = vpop.permute.xlu0 %2674 }
 0x6b2   :  { %v2220_v27 = vadd.f32 %v2211_v54, %v2188_v46  ;;  %v2137_v60 = vadd.f32 %v5571_v2, %v2111_v26  ;;  %v5581_v54 = vld [vmem:[#allocation53_spill] sm:$0xff]  ;;  %v2580_v2 = vmul.f32 %v5353_v25, %v5299_v31 }
 0x6b4   :  { %v2260_v37 = vadd.f32 %v5572_v20, %v2220_v27  ;;  %v2163_v56 = vadd.f32 %v5573_v0, %v2137_v60  ;;  %v2592_v27 = vsel %vm1698_vm5, %v2589_v59, %v2591_v8  ;;  %v2405_v59 = vsel %vm1505_vm4, %v2402_v3, %v2404_v52 }
 0x6b5   :  { %v5388_v36 = vpop.permute.xlu1 %2752  ;;  %v5390_v34 = vpop.permute.xlu0 %2676  ;;  %v2603_v55 = vadd.f32 %v2592_v27, %v2571_v7  ;;  %v2594_v9 = vrot.slane %v2580_v2, 3  ;;  %v2768_v8 = vmul.f32 %v5224_v28, %v2767_v40 }
 0x6b6   :  { %v2300_v6 = vadd.f32 %v5575_v44, %v2260_v37  ;;  %v2189_v30 = vadd.f32 %v5576_v15, %v2163_v56  ;;  %v5582_v37 = vld [vmem:[#allocation58_spill] sm:$0xff]  ;;  %v2579_v56 = vmul.f32 %v5346_v32, %v5299_v31  ;;  %v3556_v44 = vld [vmem:[#allocation4 + $0x38] sm:$0xff] }
 0x6b8   :  { %v2221_v51 = vadd.f32 %v2213_v49, %v2189_v30  ;;  %v2340_v22 = vadd.f32 %v5577_v21, %v2300_v6  ;;  %v2769_v6 = vmul.f32 %v3556_v44, %v2767_v40  ;;  %v2643_v49 = vadd.f32 %v5319_v50, %v2603_v55  ;;  %v3557_v50 = vld [vmem:[#allocation4 + $0x40] sm:$0xf] }
 0x6b9   :  { %v5399_v63 = vpop.permute.xlu1 %2716  ;;  %v2715_v42 = vpop.permute.xlu0 %2714  ;;  %v2581_v21 = vmul.f32 %v4984_v10, %v5299_v31  ;;  %v2770_v7 = vmul.f32 %v3557_v50, %v2767_v40 }
 0x6ba   :  { %v2261_v46 = vadd.f32 %v5579_v62, %v2221_v51  ;;  %v2380_v26 = vadd.f32 %v5580_v11, %v2340_v22  ;;  %v2593_v22 = vrot.slane %v2579_v56, 3  ;;  %v2781_v4 = vrot.slane %v2769_v6, 4 }
 0x6bc   :  { %v2301_v1 = vadd.f32 %v5581_v54, %v2261_v46  ;;  %v2412_v57 = vadd.f32 %v2403_v35, %v2380_v26  ;;  %v2595_v23 = vsel %vm1698_vm5, %v2593_v22, %v2594_v9  ;;  %v2683_v46 = vadd.f32 %v5335_v39, %v2643_v49 }
 0x6bd   :  { %v2823_v60 = vpop.permute.xlu1 %2822  ;;  %v2755_v13 = vpop.permute.xlu0 %2754  ;;  %v2596_v26 = vrot.slane %v2581_v21, 3  ;;  %v2783_v54 = vrot.slane %v2770_v7, 4 }
 0x6be   :  { %v2341_v20 = vadd.f32 %v5243_v38, %v2301_v1  ;;  %v2452_v0 = vadd.f32 %v5582_v37, %v2412_v57  ;;  %v2772_v57 = vmul.f32 %v5353_v25, %v2767_v40  ;;  %v2773_v25 = vmul.f32 %v4984_v10, %v2767_v40 }
 0x6c0   :  { %v2381_v47 = vadd.f32 %v5583_v43, %v2341_v20  ;;  %v2492_v14 = vadd.f32 %v4889_v12, %v2452_v0  ;;  %v2722_v12 = vadd.f32 %v5343_v29, %v5340_v33  ;;  %v2780_v33 = vrot.slane %v2768_v8, 4 }
 0x6c1   :  { %v2825_v15 = vpop.permute.xlu1 %2824  ;;  %v2757_v30 = vpop.permute.xlu0 %2756  ;;  %v2784_v20 = vsel %vm1891_vm6, %v2781_v4, %v2783_v54  ;;  %v2786_v37 = vrot.slane %v2772_v57, 4 }
 0x6c2   :  { %v2413_v38 = vadd.f32 %v2405_v59, %v2381_v47  ;;  %v2532_v51 = vadd.f32 %v4939_v24, %v2492_v14  ;;  %v2762_v28 = vadd.f32 %v5374_v48, %v2722_v12  ;;  %v2782_v35 = vsel %vm1891_vm6, %v2780_v33, %v2781_v4 }
 0x6c4   :  { %v2453_v3 = vadd.f32 %v4869_v61, %v2413_v38  ;;  %v2572_v53 = vadd.f32 %v5045_v17, %v2532_v51  ;;  %v2723_v61 = vadd.f32 %v5363_v58, %v2683_v46  ;;  %v2794_v52 = vadd.f32 %v2782_v35, %v2762_v28 }
 0x6c5   :  { %v2865_v62 = vpop.permute.xlu1 %2864  ;;  %v2863_v24 = vpop.permute.xlu0 %2862  ;;  %v2597_v58 = vsel %vm1698_vm5, %v2594_v9, %v2596_v26 }
 0x6c6   :  { %v2493_v31 = vadd.f32 %v4916_v16, %v2453_v3  ;;  %v2604_v11 = vadd.f32 %v2595_v23, %v2572_v53  ;;  %v2763_v27 = vadd.f32 %v5388_v36, %v2723_v61  ;;  %v2834_v55 = vadd.f32 %v2823_v60, %v2794_v52 }
 0x6c7   :  { %v2788_v60 = vrot.slane %v2773_v25, 4  ;;  %v5586_v25 = vld [vmem:[#allocation17_spill] sm:$0xff] }
 0x6c8   :  { %v2533_v17 = vadd.f32 %v5278_v18, %v2493_v31  ;;  %v2644_v29 = vadd.f32 %v5245_v45, %v2604_v11  ;;  %v2771_v18 = vmul.f32 %v5346_v32, %v2767_v40  ;;  %v2795_v43 = vadd.f32 %v2784_v20, %v2763_v27  ;;  %v5584_v27 = vld [vmem:[#allocation15_spill] sm:$0xff] }
 0x6c9   :  { %v2903_v1 = vpop.permute.xlu1 %2902  ;;  %v2827_v39 = vpop.permute.xlu0 %2826  ;;  %v2874_v36 = vadd.f32 %v2863_v24, %v2834_v55  ;;  %v2789_v51 = vsel %vm1891_vm6, %v2786_v37, %v2788_v60 }
 0x6ca   :  { %v2573_v16 = vadd.f32 %v5067_v5, %v2533_v17  ;;  %v2684_v48 = vadd.f32 %v5376_v41, %v2644_v29  ;;  %v2785_v47 = vrot.slane %v2771_v18, 4  ;;  %v2835_v59 = vadd.f32 %v2825_v15, %v2795_v43  ;;  %v5585_v18 = vld [vmem:[#allocation14_spill] sm:$0xff] }
 0x6cb   :  { %v2914_v32 = vadd.f32 %v2903_v1, %v2874_v36 }
 0x6cc   :  { %v2605_v2 = vadd.f32 %v2597_v58, %v2573_v16  ;;  %v2724_v45 = vadd.f32 %v2715_v42, %v2684_v48  ;;  %v2787_v42 = vsel %vm1891_vm6, %v2785_v47, %v2786_v37  ;;  %v2875_v49 = vadd.f32 %v2865_v62, %v2835_v59 }
 0x6cd   :  { %v2905_v0 = vpop.permute.xlu1 %2904  ;;  %v2829_v56 = vpop.permute.xlu0 %2828 }
 0x6ce   :  { %v2645_v5 = vadd.f32 %v5365_v19, %v2605_v2  ;;  %v2764_v41 = vadd.f32 %v2755_v13, %v2724_v45  ;;  %v2915_v19 = vadd.f32 %v2905_v0, %v2875_v49 }
 0x6d0   :  { %v2685_v14 = vadd.f32 %v5390_v34, %v2645_v5  ;;  %v2796_v10 = vadd.f32 %v2787_v42, %v2764_v41  ;;  %v5587_v41 = vld [vmem:[#allocation16_spill] sm:$0xff] }
 0x6d1   :  { %v2943_v9 = vpop.permute.xlu1 %2942  ;;  %v2867_v44 = vpop.permute.xlu0 %2866 }
 0x6d2   :  { %v2725_v6 = vadd.f32 %v5399_v63, %v2685_v14  ;;  %v2954_v40 = vadd.f32 %v2943_v9, %v2914_v32  ;;  %v2836_v34 = vadd.f32 %v2827_v39, %v2796_v10 }
 0x6d4   :  { %v2765_v38 = vadd.f32 %v2757_v30, %v2725_v6  ;;  %v3184_v13 = vmul.f32 -1.442695, %v2954_v40  ;;  %v2876_v4 = vadd.f32 %v2867_v44, %v2836_v34 }
 0x6d5   :  { %v2945_v21 = vpop.permute.xlu1 %2944  ;;  %v2869_v22 = vpop.permute.xlu0 %2868 }
 0x6d6   :  { %v2797_v15 = vadd.f32 %v2789_v51, %v2765_v38  ;;  %3524 = vpow2.f32 %v3184_v13  ;;  %v2955_v8 = vadd.f32 %v2945_v21, %v2915_v19 }
 0x6d8   :  { %v2837_v12 = vadd.f32 %v2829_v56, %v2797_v15  ;;  %v3185_v3 = vmul.f32 -1.442695, %v2955_v8 }
 0x6d9   :  { %v2909_v53 = vpop.permute.xlu1 %2908  ;;  %v2907_v23 = vpop.permute.xlu0 %2906 }
 0x6da   :  { %3526 = vpow2.f32 %v3185_v3  ;;  %v2877_v63 = vadd.f32 %v2869_v22, %v2837_v12  ;;  %v2916_v7 = vadd.f32 %v2907_v23, %v2876_v4 }
 0x6dc   :  { %v2917_v50 = vadd.f32 %v2909_v53, %v2877_v63 }
 0x6dd   :  { %v2949_v30 = vpop.permute.xlu1 %2948  ;;  %v2947_v62 = vpop.permute.xlu0 %2946 }
 0x6de   :  { %v2957_v24 = vadd.f32 %v2949_v30, %v2917_v50  ;;  %v2956_v46 = vadd.f32 %v2947_v62, %v2916_v7 }
 0x6e0   :  { %v3525_v31 = vpop.eup %3524  ;;  %v3187_v28 = vmul.f32 -1.442695, %v2957_v24  ;;  %v3186_v11 = vmul.f32 -1.442695, %v2956_v46 }
 0x6e1   :  { %v2970_v26 = vadd.f32 1.0, %v3525_v31 }
 0x6e2   :  { %3528 = vpow2.f32 %v3187_v28 }
 0x6e3   :  { %3530 = vrcp.f32 %v2970_v26 }
 0x6e4   :  { %v3527_v33 = vpop.eup %3526  ;;  %3532 = vpow2.f32 %v3186_v11 }
 0x6e5   :  { %v2971_v61 = vadd.f32 1.0, %v3527_v33 }
 0x6e7   :  { %3534 = vrcp.f32 %v2971_v61 }
 0x6ec   :  { %v3529_v17 = vpop.eup %3528 }
 0x6ed   :  { %v3531_v29 = vpop.eup %3530  ;;  %v2973_v35 = vadd.f32 1.0, %v3529_v17 }
 0x6ee   :  { %v3533_v54 = vpop.eup %3532  ;;  %3383 = vmatprep.mubr.msk.f32.mxu0 %vm2984_vm7, %v3531_v29 }
 0x6ef   :  { %v2972_v1 = vadd.f32 1.0, %v3533_v54  ;;  %3536 = vrcp.f32 %v2973_v35 }
 0x6f1   :  { %v3535_v57 = vpop.eup %3534  ;;  %3538 = vrcp.f32 %v2972_v1 }
 0x6f2   :  { %3384 = vmatmul.mubr.msk.f32.vlgmr.msra.gmra.mrb[14].mxu0 %vm2984_vm7, %v3535_v57 }
 0x6f9   :  { %v3537_v39 = vpop.eup %3536 }
 0x6fb   :  { %v3539_v16 = vpop.eup %3538 }
 0x6fc   :  { %3386 = vmatprep.mubr.msk.f32.mxu0 %vm2984_vm7, %v3539_v16 }
 0x6fd   :  { %3387 = vmatmul.mubr.msk.f32.gmra.mrb[16].mxu0 %vm2984_vm7, %v3537_v39 }
 0x7c5   :  { %v3385_v48 = vpop.f32.mrb[14].mxu0 }
 0x7c6   :  { %v3083_v52 = vmul.f32 %v3385_v48, %v5584_v27  ;;  %v3063_v58 = vpop.f32.mrb[15].mxu0 }
 0x7c7   :  { %v3082_v2 = vmul.f32 %v3063_v58, %v5585_v18 }
 0x7c8   :  { %vm3087_vm8 = vcmp.ge.f32.partialorder %v3083_v52, 0.0  ;;  %v3091_v45 = vmul.f32 0.2, %v3083_v52 }
 0x7c9   :  { %vm3086_vm9 = vcmp.ge.f32.partialorder %v3082_v2, 0.0  ;;  %v3090_v55 = vmul.f32 0.2, %v3082_v2 }
 0x7ca   :  { %v3095_v20 = vsel %vm3087_vm8, %v3083_v52, %v3091_v45 }
 0x7cb   :  { %3099 = vst [vmem:[#allocation10 + $0x8] sm:$0xff] %v3095_v20  ;;  %v3094_v37 = vsel %vm3086_vm9, %v3082_v2, %v3090_v55 }
 0x7cc   :  { %3098 = vst [vmem:[#allocation10] sm:$0xff] %v3094_v37 }
 0x7d0   :  { %v3388_v0 = vpop.f32.mrb[16].mxu0 }
 0x7d1   :  { %v3085_v56 = vmul.f32 %v3388_v0, %v5586_v25  ;;  %v3073_v5 = vpop.f32.mrb[17].mxu0 }
 0x7d2   :  { %v3084_v43 = vmul.f32 %v3073_v5, %v5587_v41 }
 0x7d3   :  { %vm3089_vm10 = vcmp.ge.f32.partialorder %v3085_v56, 0.0  ;;  %v3093_v36 = vmul.f32 0.2, %v3085_v56 }
 0x7d4   :  { %vm3088_vm11 = vcmp.ge.f32.partialorder %v3084_v43, 0.0  ;;  %v3092_v47 = vmul.f32 0.2, %v3084_v43 }
 0x7d5   :  { %v3097_v14 = vsel %vm3089_vm10, %v3085_v56, %v3093_v36 }
 0x7d6   :  { %3101 = vst [vmem:[#allocation10 + $0x18] sm:$0xff] %v3097_v14  ;;  %v3096_v59 = vsel %vm3088_vm11, %v3084_v43, %v3092_v47 }
 0x7d7   :  { %3100 = vst [vmem:[#allocation10 + $0x10] sm:$0xff] %v3096_v59 }
 0x7d8   :  { %3603 = shalt.err (!%p3600_p3)
}
 0x7d9   :  { %s3604_s5 = scalar_lea.hbm %s5475_s8, 512 }
 0x7da   :  { %p3605_p4 = scmp.ne.s32.totalorder %s5475_s8, %s3604_s5  ;;  %p3608_p5 = scmp.lt.u32.totalorder %s3604_s5, %s5475_s8 }
 0x7dc   :  { %p3610_p6 = pnand %p3608_p5, %p3605_p4 }
 0x7de   :  { %3613 = shalt.err (!%p3610_p6)
}
 0x7df   :  { %3113 = dma.vmem_to_hbm [thread:$0]  %s3108_s2, 512, %s5475_s8, [#allocation7], %s3621_s7, %s3621_s7, %s3622_s18  }
 0x7e0   :  { %3618 = dma.done.wait [#allocation7], 512  }
 0x7e1   :  { %3619 = vsyncadd [#allocation7], 4294966784 }
 0x7e2   :  { %3117 = vsyncpa [#allocation6], 1 }
 0x7e3   :  { %3118 = vsyncpa [#allocation7], 1 }
 0x7e4   :  { %3119 = vsyncpa [#allocation8], 1 }

</bundles_post_ra>
